<compile_context>
chip_gen: v6e
topology: v6e:2x2x1
jax: 0.10.0
libtpu: 0.0.40
codegen_flags: <defaults>
</compile_context>

<pallas_src>
import functools

import jax
import jax.numpy as jnp
import numpy as np
from jax.experimental import pallas as pl
from jax.experimental.pallas import tpu as pltpu

# Safe scoped-VMEM budget on v5e/v6e/v7x at these shapes; for production
# shapes derive from pltpu.get_tpu_info().vmem_capacity_bytes instead.
VMEM_LIMIT_BYTES = 32 * 1024 * 1024


# ---------------------------------------------------------------------------
# Pallas kernel 1: directional GRU.  grid = (num_directions, num_time_chunks).
# Direction axis is "parallel" (fwd/bwd encoder passes are independent);
# the chunk axis is "arbitrary" and carries the hidden state in VMEM scratch.
# ---------------------------------------------------------------------------
def gru_kernel(x_ref, wih_ref, bih_ref, whh_ref, bhh_ref, h0_ref,
               out_ref, hfin_ref, gi_ref, h_ref):
    """One (direction, time-chunk) GRU step.

    x_ref    : (T*B, E)  time-major chunk, rows flattened as (t, b)
    wih_ref  : (E, 3H)   input->gates weights for this direction
    bih_ref  : (1, 3H)
    whh_ref  : (H, 3H)   hidden->gates weights
    bhh_ref  : (1, 3H)
    h0_ref   : (B, H)    initial hidden state for this direction
    out_ref  : (T*B, H)  per-timestep hidden outputs of this chunk
    hfin_ref : (B, H)    final hidden (block resident across the chunk axis)
    gi_ref   : (T*B, 3H) scratch: hoisted input projection
    h_ref    : (B, H)    scratch: hidden-state carry across chunks
    Gate order is PyTorch's [r | z | n].
    """
    d = pl.program_id(0)          # 0 = forward, 1 = backward (encoder only)
    c = pl.program_id(1)          # time-chunk index
    B, H = h0_ref.shape
    T = x_ref.shape[0] // B
    H3 = wih_ref.shape[1]

    # Hoisted input projection: one (T*B, E) x (E, 3H) MXU matmul per chunk
    # instead of T tiny matmuls on the serial critical path (fp32 accumulate).
    gi_ref[...] = (
        jnp.dot(x_ref[...], wih_ref[...], preferred_element_type=jnp.float32)
        + bih_ref[...])

    @pl.when(c == 0)
    def _():
        h_ref[...] = h0_ref[...]

    # Hoist weight loads out of the serial loop (no per-iter broadcasts).
    whh = whh_ref[...]
    bhh = bhh_ref[...]

    def step(s, h):
        # Direction 1 walks the chunk in reverse; whole chunks are already
        # reversed by the BlockSpec index_map, giving full time reversal.
        t = s + d * (T - 1 - 2 * s)
        row = pl.multiple_of(t * B, B)
        gi_t = gi_ref[pl.ds(row, B), :]                       # (B, 3H)
        gh = jnp.dot(h.astype(whh.dtype), whh,
                     preferred_element_type=jnp.float32) + bhh
        # fp32 gate math (v5e has no bf16 VPU/EUP); fp32 hidden carry.
        r = jax.nn.sigmoid(gi_t[:, 0:H] + gh[:, 0:H])
        z = jax.nn.sigmoid(gi_t[:, H:2 * H] + gh[:, H:2 * H])
        n = jnp.tanh(gi_t[:, 2 * H:H3] + r * gh[:, 2 * H:H3])
        h_new = (1.0 - z) * n + z * h
        out_ref[pl.ds(row, B), :] = h_new
        return h_new

    # Short fixed trip counts are unrolled so the LLO scheduler can overlap
    # the tiny per-step MXU op with gate VPU/EUP work of adjacent steps.
    h_fin = jax.lax.fori_loop(0, T, step, h_ref[...], unroll=(T <= 8))
    h_ref[...] = h_fin
    hfin_ref[...] = h_fin


def run_gru(x_tm, wih, bih, whh, bhh, h0, *, time_chunk=None,
            matmul_dtype=jnp.float32):
    """x_tm:(S,B,E)  wih:(D,E,3H) bih:(D,1,3H) whh:(D,H,3H) bhh:(D,1,3H)
    h0:(D,B,H).  Direction d==1 runs the sequence reversed (bi-GRU backward).
    Returns out:(D,S,B,H) (time-major hidden per step) and h_final:(D,B,H)."""
    S, B, E = x_tm.shape
    D, _, H3 = wih.shape
    H = H3 // 3

    T = min(S, time_chunk or S)
    while S % T:
        T -= 1
    C = S // T

    # Flatten (t, b) rows so the kernel does plain row-sliced loads/stores.
    x_flat = x_tm.reshape(S * B, E).astype(matmul_dtype)
    wih = wih.astype(matmul_dtype)
    whh = whh.astype(matmul_dtype)
    bih = bih.astype(jnp.float32)
    bhh = bhh.astype(jnp.float32)
    h0 = h0.astype(jnp.float32)

    # chunk index: c (forward) / C-1-c (backward) without data-dependent ops.
    def x_map(d, c):
        return (c + d * (C - 1 - 2 * c), 0)

    def out_map(d, c):
        return (d, c + d * (C - 1 - 2 * c), 0)

    def w_map(d, c):
        return (d, 0, 0)

    flops = 2 * D * S * B * (E + H) * H3
    transcendentals = D * S * B * H3
    bytes_accessed = 4 * (S * B * E + D * (E + H + 2) * H3
                          + 2 * D * B * H + D * S * B * H)

    out_flat, hfin = pl.pallas_call(
        gru_kernel,
        grid=(D, C),
        in_specs=[
            pl.BlockSpec((T * B, E), x_map),
            pl.BlockSpec((None, E, H3), w_map),
            pl.BlockSpec((None, 1, H3), w_map),
            pl.BlockSpec((None, H, H3), w_map),
            pl.BlockSpec((None, 1, H3), w_map),
            pl.BlockSpec((None, B, H), w_map),
        ],
        out_specs=(
            pl.BlockSpec((None, T * B, H), out_map),
            pl.BlockSpec((None, B, H), w_map),      # resident across chunks
        ),
        out_shape=(
            jax.ShapeDtypeStruct((D, S * B, H), jnp.float32),
            jax.ShapeDtypeStruct((D, B, H), jnp.float32),
        ),
        scratch_shapes=[
            pltpu.VMEM((T * B, H3), jnp.float32),   # hoisted input projection
            pltpu.VMEM((B, H), jnp.float32),        # hidden-state carry
        ],
        compiler_params=pltpu.CompilerParams(
            dimension_semantics=("parallel", "arbitrary"),
            vmem_limit_bytes=VMEM_LIMIT_BYTES),
        cost_estimate=pl.CostEstimate(flops=int(flops),
                                      transcendentals=int(transcendentals),
                                      bytes_accessed=int(bytes_accessed)),
    )(x_flat, wih, bih, whh, bhh, h0)
    return out_flat.reshape(D, S, B, H), hfin


# ---------------------------------------------------------------------------
# Pallas kernel 2: attention (bmm -> softmax over encoder axis -> bmm) fused
# with attention_fc + tanh + fc.  grid over batch blocks; weights resident.
# ---------------------------------------------------------------------------
def attn_kernel(enc_ref, dec_ref, wac_ref, wad_ref, ba_ref, wfc_ref, bfc_ref,
                logits_ref):
    """enc:(Bt,S_enc,D2) dec:(Bt,S_dec,D2) -> logits:(Bt,S_dec,Vp).
    Softmax is over the encoder axis (PyTorch softmax(dim=1))."""
    enc = enc_ref[...]
    dec = dec_ref[...]
    # scores[b, t, s] = dec[b, t] . enc[b, s]   (no explicit transposes)
    scores = jax.lax.dot_general(
        dec, enc, (((2,), (2,)), ((0,), (0,))),
        preferred_element_type=jnp.float32)                  # (Bt,S_dec,S_enc)
    scores = scores - jnp.max(scores, axis=-1, keepdims=True)
    e = jnp.exp(scores)
    # EUP approx reciprocal: softmax denominator off the VPU critical path.
    p = e * pl.reciprocal(jnp.sum(e, axis=-1, keepdims=True), approx=True)
    c = jax.lax.dot_general(
        p.astype(enc.dtype), enc, (((2,), (1,)), ((0,), (0,))),
        preferred_element_type=jnp.float32)                  # (Bt,S_dec,D2)

    Bt, Sd, D2 = c.shape
    c2 = c.reshape(Bt * Sd, D2)
    d2 = dec.reshape(Bt * Sd, D2)
    # cat(c, dec) @ W_att  ==  c @ W_att[:D2] + dec @ W_att[D2:]
    out = jnp.tanh(
        jnp.dot(c2.astype(wac_ref.dtype), wac_ref[...],
                preferred_element_type=jnp.float32)
        + jnp.dot(d2, wad_ref[...], preferred_element_type=jnp.float32)
        + ba_ref[...])
    logits = jnp.dot(out.astype(wfc_ref.dtype), wfc_ref[...],
                     preferred_element_type=jnp.float32) + bfc_ref[...]
    logits_ref[...] = logits.reshape(Bt, Sd, -1)


def run_attention(enc_out, dec_out, w_att, b_att, w_fc, b_fc, *,
                  block_b=None, matmul_dtype=jnp.float32):
    B, S_enc, D2 = enc_out.shape
    _, S_dec, _ = dec_out.shape
    V = w_fc.shape[1]
    Vp = int(pl.cdiv(V, 128) * 128)          # lane-dense (unmasked) logits

    block_b = min(block_b or B, B)
    while B % block_b:
        block_b -= 1

    w_att_c = w_att[:D2].astype(matmul_dtype)
    w_att_d = w_att[D2:].astype(matmul_dtype)
    w_fc_p = jnp.pad(w_fc, ((0, 0), (0, Vp - V))).astype(matmul_dtype)
    b_fc_p = jnp.pad(b_fc, ((0, 0), (0, Vp - V))).astype(jnp.float32)
    enc_out = enc_out.astype(matmul_dtype)
    dec_out = dec_out.astype(matmul_dtype)
    b_att = b_att.astype(jnp.float32)

    flops = 2 * B * S_dec * (2 * S_enc * D2 + 2 * D2 * D2 + D2 * Vp)
    transcendentals = B * S_dec * (S_enc + D2)
    bytes_accessed = 4 * (B * S_enc * D2 + B * S_dec * D2 + 2 * D2 * D2
                          + D2 * Vp + B * S_dec * Vp)

    logits_p = pl.pallas_call(
        attn_kernel,
        grid=(B // block_b,),
        in_specs=[
            pl.BlockSpec((block_b, S_enc, D2), lambda b: (b, 0, 0)),
            pl.BlockSpec((block_b, S_dec, D2), lambda b: (b, 0, 0)),
            pl.BlockSpec((D2, D2), lambda b: (0, 0)),    # resident weights
            pl.BlockSpec((D2, D2), lambda b: (0, 0)),
            pl.BlockSpec((1, D2), lambda b: (0, 0)),
            pl.BlockSpec((D2, Vp), lambda b: (0, 0)),
            pl.BlockSpec((1, Vp), lambda b: (0, 0)),
        ],
        out_specs=pl.BlockSpec((block_b, S_dec, Vp), lambda b: (b, 0, 0)),
        out_shape=jax.ShapeDtypeStruct((B, S_dec, Vp), jnp.float32),
        compiler_params=pltpu.CompilerParams(
            dimension_semantics=("parallel",),
            vmem_limit_bytes=VMEM_LIMIT_BYTES),
        cost_estimate=pl.CostEstimate(flops=int(flops),
                                      transcendentals=int(transcendentals),
                                      bytes_accessed=int(bytes_accessed)),
    )(enc_out, dec_out, w_att_c, w_att_d, b_att, w_fc_p, b_fc_p)
    return logits_p[..., :V]


# ---------------------------------------------------------------------------
# Parameter init (deterministic; shapes follow the module's __init__)
# ---------------------------------------------------------------------------
def init_params(key, enc_vocab, dec_vocab, emb_dim, hidden):
    H = hidden
    D2 = 2 * H
    ks = jax.random.split(key, 12)

    def nrm(k, shape, scale=0.1):
        return (scale * jax.random.normal(k, shape)).astype(jnp.float32)

    return dict(
        enc_emb=nrm(ks[0], (enc_vocab, emb_dim)),
        # bidirectional encoder GRU; leading axis = direction (0=fwd, 1=bwd)
        enc_wih=nrm(ks[1], (2, emb_dim, 3 * H)),
        enc_bih=nrm(ks[2], (2, 1, 3 * H)),
        enc_whh=nrm(ks[3], (2, H, 3 * H)),
        enc_bhh=nrm(ks[4], (2, 1, 3 * H)),
        dec_emb=nrm(ks[5], (dec_vocab, emb_dim)),
        # decoder GRU (single direction, hidden = 2H as mod == 0)
        dec_wih=nrm(ks[6], (1, emb_dim, 3 * D2)),
        dec_bih=nrm(ks[7], (1, 1, 3 * D2)),
        dec_whh=nrm(ks[8], (1, D2, 3 * D2)),
        dec_bhh=nrm(ks[9], (1, 1, 3 * D2)),
        att_w=nrm(ks[10], (2 * D2, D2)),     # the intended `atteniton_fc`
        att_b=jnp.zeros((1, D2), jnp.float32),
        fc_w=nrm(ks[11], (D2, dec_vocab)),
        fc_b=jnp.zeros((1, dec_vocab), jnp.float32),
    )


# ---------------------------------------------------------------------------
# Seq2Seq forward (glue in JAX, hot paths in Pallas)
# ---------------------------------------------------------------------------
def seq2seq_forward(p, enc_input, dec_input, *, time_chunk=None,
                    attn_block_b=None, matmul_dtype=jnp.float32):
    H = p['enc_whh'].shape[1]
    B = enc_input.shape[0]

    # ---- Encoder (fused bidirectional GRU) ----
    # Embed directly in time-major order: transpose the cheap int32 ids,
    # not the (B, S, E) activation tensor.
    x_e = jnp.take(p['enc_emb'], enc_input.T, axis=0)           # (S_enc,B,E)
    h0 = jnp.zeros((2, B, H), jnp.float32)
    enc_out, enc_h = run_gru(x_e, p['enc_wih'], p['enc_bih'],
                             p['enc_whh'], p['enc_bhh'], h0,
                             time_chunk=time_chunk, matmul_dtype=matmul_dtype)
    enc_outputs = jnp.transpose(
        jnp.concatenate([enc_out[0], enc_out[1]], axis=-1), (1, 0, 2))  # (B,S,2H)
    encoder_state = jnp.concatenate([enc_h[0], enc_h[1]], axis=1)       # (B,2H)

    # ---- Decoder GRU (hidden = 2H, initialized from the encoder state) ----
    x_d = jnp.take(p['dec_emb'], dec_input.T, axis=0)           # (S_dec,B,E)
    dec_out, dec_h = run_gru(x_d, p['dec_wih'], p['dec_bih'],
                             p['dec_whh'], p['dec_bhh'], encoder_state[None],
                             time_chunk=time_chunk, matmul_dtype=matmul_dtype)
    dec_outputs = jnp.transpose(dec_out[0], (1, 0, 2))          # (B,S_dec,2H)

    # ---- Attention + attention_fc + tanh + fc ----
    logits = run_attention(enc_outputs, dec_outputs,
                           p['att_w'], p['att_b'], p['fc_w'], p['fc_b'],
                           block_b=attn_block_b, matmul_dtype=matmul_dtype)
    hidden = dec_h                                              # (1,B,2H)
    return logits, hidden


# ---------------------------------------------------------------------------
# Pure-JAX reference (mirrors the PyTorch ops) for correctness checking
# ---------------------------------------------------------------------------
def gru_ref(x_tm, wih, bih, whh, bhh, h0):
    H = h0.shape[1]

    def step(h, x_t):
        gi = x_t @ wih + bih
        gh = h @ whh + bhh
        r = jax.nn.sigmoid(gi[:, :H] + gh[:, :H])
        z = jax.nn.sigmoid(gi[:, H:2 * H] + gh[:, H:2 * H])
        n = jnp.tanh(gi[:, 2 * H:] + r * gh[:, 2 * H:])
        h_new = (1.0 - z) * n + z * h
        return h_new, h_new

    h_fin, outs = jax.lax.scan(step, h0, x_tm)
    return outs, h_fin


def seq2seq_ref(p, enc_input, dec_input):
    H = p['enc_whh'].shape[1]
    B = enc_input.shape[0]
    emb_e = jnp.take(p['enc_emb'], enc_input, axis=0)
    x_tm = jnp.transpose(emb_e, (1, 0, 2))
    h0 = jnp.zeros((B, H), jnp.float32)
    out_f, h_f = gru_ref(x_tm, p['enc_wih'][0], p['enc_bih'][0],
                         p['enc_whh'][0], p['enc_bhh'][0], h0)
    out_b_rev, h_b = gru_ref(x_tm[::-1], p['enc_wih'][1], p['enc_bih'][1],
                             p['enc_whh'][1], p['enc_bhh'][1], h0)
    out_b = out_b_rev[::-1]
    enc_outputs = jnp.transpose(jnp.concatenate([out_f, out_b], axis=-1),
                                (1, 0, 2))
    encoder_state = jnp.concatenate([h_f, h_b], axis=1)
    emb_d = jnp.take(p['dec_emb'], dec_input, axis=0)
    xd_tm = jnp.transpose(emb_d, (1, 0, 2))
    dec_out_tm, dec_h = gru_ref(xd_tm, p['dec_wih'][0], p['dec_bih'][0],
                                p['dec_whh'][0], p['dec_bhh'][0],
                                encoder_state)
    dec_outputs = jnp.transpose(dec_out_tm, (1, 0, 2))
    a_t = jnp.einsum('bse,bte->bst', enc_outputs, dec_outputs)
    a_t = jax.nn.softmax(a_t, axis=1)
    c_t = jnp.einsum('bst,bse->bte', a_t, enc_outputs)
    cat = jnp.concatenate([c_t, dec_outputs], axis=-1)
    out = jnp.tanh(cat @ p['att_w'] + p['att_b'][0])
    logits = out @ p['fc_w'] + p['fc_b'][0]
    return logits, dec_h[None]


if __name__ == "__main__":
    key = jax.random.PRNGKey(0)
    pkey, k1, k2 = jax.random.split(key, 3)

    ENC_V, DEC_V = 13, 11
    EMB, H = 32, 64            # decoder hidden / attention width 2H = 128
    B, S_ENC, S_DEC = 8, 16, 8

    params = init_params(pkey, ENC_V, DEC_V, EMB, H)
    enc_in = jax.random.randint(k1, (B, S_ENC), 0, ENC_V, dtype=jnp.int32)
    dec_in = jax.random.randint(k2, (B, S_DEC), 0, DEC_V, dtype=jnp.int32)

    # fp32 path (exercises multi-chunk time tiling and batched attention grid)
    fwd_f32 = jax.jit(functools.partial(seq2seq_forward,
                                        time_chunk=8, attn_block_b=4))
    logits, hidden = fwd_f32(params, enc_in, dec_in)
    jax.block_until_ready((logits, hidden))

    logits_ref, hidden_ref = seq2seq_ref(params, enc_in, dec_in)
    np.testing.assert_allclose(np.asarray(logits), np.asarray(logits_ref),
                               rtol=1e-2, atol=1e-3)
    np.testing.assert_allclose(np.asarray(hidden), np.asarray(hidden_ref),
                               rtol=1e-2, atol=1e-3)
    assert logits.shape == (B, S_DEC, DEC_V)
    assert hidden.shape == (1, B, 2 * H)

    # bf16 matmul operands (fp32 accumulation / gate math): loose sanity check.
    fwd_bf16 = jax.jit(functools.partial(seq2seq_forward,
                                         time_chunk=8, attn_block_b=4,
                                         matmul_dtype=jnp.bfloat16))
    logits_bf, hidden_bf = fwd_bf16(params, enc_in, dec_in)
    jax.block_until_ready((logits_bf, hidden_bf))
    np.testing.assert_allclose(np.asarray(logits_bf), np.asarray(logits_ref),
                               rtol=2e-1, atol=5e-2)

    print("KERNEL_OK")
</pallas_src>

<mosaic_0001>
module attributes {stable_mosaic.version = 11 : i64} {
  func.func @gru_kernel(%arg0: i32, %arg1: i32, %arg2: memref<64x32xf32, #tpu.memory_space<vmem>>, %arg3: memref<1x32x192xf32, #tpu.memory_space<vmem>>, %arg4: memref<1x1x192xf32, #tpu.memory_space<vmem>>, %arg5: memref<1x64x192xf32, #tpu.memory_space<vmem>>, %arg6: memref<1x1x192xf32, #tpu.memory_space<vmem>>, %arg7: memref<1x8x64xf32, #tpu.memory_space<vmem>>, %arg8: memref<1x64x64xf32, #tpu.memory_space<vmem>>, %arg9: memref<1x8x64xf32, #tpu.memory_space<vmem>>, %arg10: memref<64x192xf32, #tpu.memory_space<vmem>>, %arg11: memref<8x64xf32, #tpu.memory_space<vmem>>) attributes {dimension_semantics = [#tpu.dimension_semantics<parallel>, #tpu.dimension_semantics<arbitrary>], iteration_bounds = array<i64: 2, 2>, scalar_prefetch = 0 : i64, scratch_operands = 2 : i64, tpu.core_type = #tpu.core_type<tc>, window_params = [{transform_indices = @transform_0, window_bounds = array<i64: 64, 32>}, {transform_indices = @transform_1, window_bounds = array<i64: 1, 32, 192>}, {transform_indices = @transform_2, window_bounds = array<i64: 1, 1, 192>}, {transform_indices = @transform_3, window_bounds = array<i64: 1, 64, 192>}, {transform_indices = @transform_4, window_bounds = array<i64: 1, 1, 192>}, {transform_indices = @transform_5, window_bounds = array<i64: 1, 8, 64>}, {transform_indices = @transform_6, window_bounds = array<i64: 1, 64, 64>}, {transform_indices = @transform_7, window_bounds = array<i64: 1, 8, 64>}]} {
    %c0 = arith.constant 0 : index
    %c0_0 = arith.constant 0 : index
    %0 = vector.load %arg2[%c0, %c0_0] : memref<64x32xf32, #tpu.memory_space<vmem>>, vector<64x32xf32>
    %c0_1 = arith.constant 0 : index
    %c0_2 = arith.constant 0 : index
    %c0_3 = arith.constant 0 : index
    %1 = vector.load %arg3[%c0_1, %c0_2, %c0_3] : memref<1x32x192xf32, #tpu.memory_space<vmem>>, vector<1x32x192xf32>
    %2 = vector.shape_cast %1 : vector<1x32x192xf32> to vector<32x192xf32>
    %cst = arith.constant dense<0.000000e+00> : vector<64x192xf32>
    %3 = tpu.matmul %0, %2, %cst {dimension_numbers = #tpu.dot_dimension_numbers<[1], [0], [0], [1], [0, 0, 1, 1], [], []>} : vector<64x32xf32>, vector<32x192xf32>, vector<64x192xf32> -> vector<64x192xf32>
    %c0_4 = arith.constant 0 : index
    %c0_5 = arith.constant 0 : index
    %c0_6 = arith.constant 0 : index
    %4 = vector.load %arg4[%c0_4, %c0_5, %c0_6] : memref<1x1x192xf32, #tpu.memory_space<vmem>>, vector<1x1x192xf32>
    %5 = vector.shape_cast %4 : vector<1x1x192xf32> to vector<1x192xf32>
    %6 = vector.broadcast %5 : vector<1x192xf32> to vector<64x192xf32>
    %7 = arith.addf %3, %6 : vector<64x192xf32>
    %c0_7 = arith.constant 0 : index
    %c0_8 = arith.constant 0 : index
    %8 = vector.load %arg10[%c0_7, %c0_8] : memref<64x192xf32, #tpu.memory_space<vmem>>, vector<64x192xf32>
    tpu.vector_store %arg10[%c0_7, %c0_8], %7 {strides = array<i32>} : memref<64x192xf32, #tpu.memory_space<vmem>>, vector<64x192xf32>,
    %c0_i32 = arith.constant 0 : i32
    %9 = arith.cmpi eq, %arg1, %c0_i32 : i32
    %10 = arith.extui %9 : i1 to i32
    %c0_i32_9 = arith.constant 0 : i32
    %11 = arith.cmpi ne, %10, %c0_i32_9 : i32
    scf.if %11 {
      %c0_104 = arith.constant 0 : index
      %c0_105 = arith.constant 0 : index
      %c0_106 = arith.constant 0 : index
      %349 = vector.load %arg7[%c0_104, %c0_105, %c0_106] : memref<1x8x64xf32, #tpu.memory_space<vmem>>, vector<1x8x64xf32>
      %350 = vector.shape_cast %349 : vector<1x8x64xf32> to vector<8x64xf32>
      %c0_107 = arith.constant 0 : index
      %c0_108 = arith.constant 0 : index
      %351 = vector.load %arg11[%c0_107, %c0_108] : memref<8x64xf32, #tpu.memory_space<vmem>>, vector<8x64xf32>
      tpu.vector_store %arg11[%c0_107, %c0_108], %350 {strides = array<i32>} : memref<8x64xf32, #tpu.memory_space<vmem>>, vector<8x64xf32>,
    } else {
    }
    %c0_10 = arith.constant 0 : index
    %c0_11 = arith.constant 0 : index
    %c0_12 = arith.constant 0 : index
    %12 = vector.load %arg5[%c0_10, %c0_11, %c0_12] : memref<1x64x192xf32, #tpu.memory_space<vmem>>, vector<1x64x192xf32>
    %13 = vector.shape_cast %12 : vector<1x64x192xf32> to vector<64x192xf32>
    %c0_13 = arith.constant 0 : index
    %c0_14 = arith.constant 0 : index
    %c0_15 = arith.constant 0 : index
    %14 = vector.load %arg6[%c0_13, %c0_14, %c0_15] : memref<1x1x192xf32, #tpu.memory_space<vmem>>, vector<1x1x192xf32>
    %15 = vector.shape_cast %14 : vector<1x1x192xf32> to vector<1x192xf32>
    %c0_16 = arith.constant 0 : index
    %c0_17 = arith.constant 0 : index
    %16 = vector.load %arg11[%c0_16, %c0_17] : memref<8x64xf32, #tpu.memory_space<vmem>>, vector<8x64xf32>
    %c0_i32_18 = arith.constant 0 : i32
    %c2_i32 = arith.constant 2 : i32
    %17 = arith.muli %c2_i32, %c0_i32_18 : i32
    %c7_i32 = arith.constant 7 : i32
    %18 = arith.subi %c7_i32, %17 : i32
    %19 = arith.muli %arg0, %18 : i32
    %20 = arith.addi %c0_i32_18, %19 : i32
    %c8_i32 = arith.constant 8 : i32
    %21 = arith.muli %20, %c8_i32 : i32
    %22 = tpu.assume_multiple %21, 8 : i32
    %23 = arith.index_cast %22 : i32 to index
    %c0_19 = arith.constant 0 : index
    %24 = vector.load %arg10[%23, %c0_19] : memref<64x192xf32, #tpu.memory_space<vmem>>, vector<8x192xf32>
    %cst_20 = arith.constant dense<0.000000e+00> : vector<8x192xf32>
    %25 = tpu.matmul %16, %13, %cst_20 {dimension_numbers = #tpu.dot_dimension_numbers<[1], [0], [0], [1], [0, 0, 1, 1], [], []>} : vector<8x64xf32>, vector<64x192xf32>, vector<8x192xf32> -> vector<8x192xf32>
    %26 = vector.broadcast %15 : vector<1x192xf32> to vector<8x192xf32>
    %27 = arith.addf %25, %26 : vector<8x192xf32>
    %28 = vector.extract_strided_slice %24 {offsets = [0, 0], sizes = [8, 64], strides = [1, 1]} : vector<8x192xf32> to vector<8x64xf32>
    %29 = vector.extract_strided_slice %27 {offsets = [0, 0], sizes = [8, 64], strides = [1, 1]} : vector<8x192xf32> to vector<8x64xf32>
    %30 = arith.addf %28, %29 : vector<8x64xf32>
    %31 = arith.negf %30 : vector<8x64xf32>
    %32 = math.exp %31 : vector<8x64xf32>
    %cst_21 = arith.constant 1.000000e+00 : f32
    %33 = vector.broadcast %cst_21 : f32 to vector<8x64xf32>
    %34 = arith.addf %33, %32 : vector<8x64xf32>
    %35 = arith.divf %33, %34 : vector<8x64xf32>
    %36 = vector.extract_strided_slice %24 {offsets = [0, 64], sizes = [8, 64], strides = [1, 1]} : vector<8x192xf32> to vector<8x64xf32>
    %37 = vector.extract_strided_slice %27 {offsets = [0, 64], sizes = [8, 64], strides = [1, 1]} : vector<8x192xf32> to vector<8x64xf32>
    %38 = arith.addf %36, %37 : vector<8x64xf32>
    %39 = arith.negf %38 : vector<8x64xf32>
    %40 = math.exp %39 : vector<8x64xf32>
    %cst_22 = arith.constant 1.000000e+00 : f32
    %41 = vector.broadcast %cst_22 : f32 to vector<8x64xf32>
    %42 = arith.addf %41, %40 : vector<8x64xf32>
    %43 = arith.divf %41, %42 : vector<8x64xf32>
    %44 = vector.extract_strided_slice %24 {offsets = [0, 128], sizes = [8, 64], strides = [1, 1]} : vector<8x192xf32> to vector<8x64xf32>
    %45 = vector.extract_strided_slice %27 {offsets = [0, 128], sizes = [8, 64], strides = [1, 1]} : vector<8x192xf32> to vector<8x64xf32>
    %46 = arith.mulf %35, %45 : vector<8x64xf32>
    %47 = arith.addf %44, %46 : vector<8x64xf32>
    %48 = math.tanh %47 : vector<8x64xf32>
    %cst_23 = arith.constant 1.000000e+00 : f32
    %49 = vector.broadcast %cst_23 : f32 to vector<8x64xf32>
    %50 = arith.subf %49, %43 : vector<8x64xf32>
    %51 = arith.mulf %50, %48 : vector<8x64xf32>
    %52 = arith.mulf %43, %16 : vector<8x64xf32>
    %53 = arith.addf %51, %52 : vector<8x64xf32>
    %c0_24 = arith.constant 0 : index
    %54 = arith.index_cast %22 : i32 to index
    %c0_25 = arith.constant 0 : index
    %55 = vector.load %arg8[%c0_24, %54, %c0_25] : memref<1x64x64xf32, #tpu.memory_space<vmem>>, vector<1x8x64xf32>
    %56 = vector.shape_cast %55 : vector<1x8x64xf32> to vector<8x64xf32>
    %57 = vector.shape_cast %53 : vector<8x64xf32> to vector<1x8x64xf32>
    tpu.vector_store %arg8[%c0_24, %54, %c0_25], %57 {strides = array<i32>} : memref<1x64x64xf32, #tpu.memory_space<vmem>>, vector<1x8x64xf32>,
    %c1_i32 = arith.constant 1 : i32
    %c2_i32_26 = arith.constant 2 : i32
    %58 = arith.muli %c2_i32_26, %c1_i32 : i32
    %c7_i32_27 = arith.constant 7 : i32
    %59 = arith.subi %c7_i32_27, %58 : i32
    %60 = arith.muli %arg0, %59 : i32
    %61 = arith.addi %c1_i32, %60 : i32
    %c8_i32_28 = arith.constant 8 : i32
    %62 = arith.muli %61, %c8_i32_28 : i32
    %63 = tpu.assume_multiple %62, 8 : i32
    %64 = arith.index_cast %63 : i32 to index
    %c0_29 = arith.constant 0 : index
    %65 = vector.load %arg10[%64, %c0_29] : memref<64x192xf32, #tpu.memory_space<vmem>>, vector<8x192xf32>
    %cst_30 = arith.constant dense<0.000000e+00> : vector<8x192xf32>
    %66 = tpu.matmul %53, %13, %cst_30 {dimension_numbers = #tpu.dot_dimension_numbers<[1], [0], [0], [1], [0, 0, 1, 1], [], []>} : vector<8x64xf32>, vector<64x192xf32>, vector<8x192xf32> -> vector<8x192xf32>
    %67 = vector.broadcast %15 : vector<1x192xf32> to vector<8x192xf32>
    %68 = arith.addf %66, %67 : vector<8x192xf32>
    %69 = vector.extract_strided_slice %65 {offsets = [0, 0], sizes = [8, 64], strides = [1, 1]} : vector<8x192xf32> to vector<8x64xf32>
    %70 = vector.extract_strided_slice %68 {offsets = [0, 0], sizes = [8, 64], strides = [1, 1]} : vector<8x192xf32> to vector<8x64xf32>
    %71 = arith.addf %69, %70 : vector<8x64xf32>
    %72 = arith.negf %71 : vector<8x64xf32>
    %73 = math.exp %72 : vector<8x64xf32>
    %cst_31 = arith.constant 1.000000e+00 : f32
    %74 = vector.broadcast %cst_31 : f32 to vector<8x64xf32>
    %75 = arith.addf %74, %73 : vector<8x64xf32>
    %76 = arith.divf %74, %75 : vector<8x64xf32>
    %77 = vector.extract_strided_slice %65 {offsets = [0, 64], sizes = [8, 64], strides = [1, 1]} : vector<8x192xf32> to vector<8x64xf32>
    %78 = vector.extract_strided_slice %68 {offsets = [0, 64], sizes = [8, 64], strides = [1, 1]} : vector<8x192xf32> to vector<8x64xf32>
    %79 = arith.addf %77, %78 : vector<8x64xf32>
    %80 = arith.negf %79 : vector<8x64xf32>
    %81 = math.exp %80 : vector<8x64xf32>
    %cst_32 = arith.constant 1.000000e+00 : f32
    %82 = vector.broadcast %cst_32 : f32 to vector<8x64xf32>
    %83 = arith.addf %82, %81 : vector<8x64xf32>
    %84 = arith.divf %82, %83 : vector<8x64xf32>
    %85 = vector.extract_strided_slice %65 {offsets = [0, 128], sizes = [8, 64], strides = [1, 1]} : vector<8x192xf32> to vector<8x64xf32>
    %86 = vector.extract_strided_slice %68 {offsets = [0, 128], sizes = [8, 64], strides = [1, 1]} : vector<8x192xf32> to vector<8x64xf32>
    %87 = arith.mulf %76, %86 : vector<8x64xf32>
    %88 = arith.addf %85, %87 : vector<8x64xf32>
    %89 = math.tanh %88 : vector<8x64xf32>
    %cst_33 = arith.constant 1.000000e+00 : f32
    %90 = vector.broadcast %cst_33 : f32 to vector<8x64xf32>
    %91 = arith.subf %90, %84 : vector<8x64xf32>
    %92 = arith.mulf %91, %89 : vector<8x64xf32>
    %93 = arith.mulf %84, %53 : vector<8x64xf32>
    %94 = arith.addf %92, %93 : vector<8x64xf32>
    %c0_34 = arith.constant 0 : index
    %95 = arith.index_cast %63 : i32 to index
    %c0_35 = arith.constant 0 : index
    %96 = vector.load %arg8[%c0_34, %95, %c0_35] : memref<1x64x64xf32, #tpu.memory_space<vmem>>, vector<1x8x64xf32>
    %97 = vector.shape_cast %96 : vector<1x8x64xf32> to vector<8x64xf32>
    %98 = vector.shape_cast %94 : vector<8x64xf32> to vector<1x8x64xf32>
    tpu.vector_store %arg8[%c0_34, %95, %c0_35], %98 {strides = array<i32>} : memref<1x64x64xf32, #tpu.memory_space<vmem>>, vector<1x8x64xf32>,
    %c2_i32_36 = arith.constant 2 : i32
    %c2_i32_37 = arith.constant 2 : i32
    %99 = arith.muli %c2_i32_37, %c2_i32_36 : i32
    %c7_i32_38 = arith.constant 7 : i32
    %100 = arith.subi %c7_i32_38, %99 : i32
    %101 = arith.muli %arg0, %100 : i32
    %102 = arith.addi %c2_i32_36, %101 : i32
    %c8_i32_39 = arith.constant 8 : i32
    %103 = arith.muli %102, %c8_i32_39 : i32
    %104 = tpu.assume_multiple %103, 8 : i32
    %105 = arith.index_cast %104 : i32 to index
    %c0_40 = arith.constant 0 : index
    %106 = vector.load %arg10[%105, %c0_40] : memref<64x192xf32, #tpu.memory_space<vmem>>, vector<8x192xf32>
    %cst_41 = arith.constant dense<0.000000e+00> : vector<8x192xf32>
    %107 = tpu.matmul %94, %13, %cst_41 {dimension_numbers = #tpu.dot_dimension_numbers<[1], [0], [0], [1], [0, 0, 1, 1], [], []>} : vector<8x64xf32>, vector<64x192xf32>, vector<8x192xf32> -> vector<8x192xf32>
    %108 = vector.broadcast %15 : vector<1x192xf32> to vector<8x192xf32>
    %109 = arith.addf %107, %108 : vector<8x192xf32>
    %110 = vector.extract_strided_slice %106 {offsets = [0, 0], sizes = [8, 64], strides = [1, 1]} : vector<8x192xf32> to vector<8x64xf32>
    %111 = vector.extract_strided_slice %109 {offsets = [0, 0], sizes = [8, 64], strides = [1, 1]} : vector<8x192xf32> to vector<8x64xf32>
    %112 = arith.addf %110, %111 : vector<8x64xf32>
    %113 = arith.negf %112 : vector<8x64xf32>
    %114 = math.exp %113 : vector<8x64xf32>
    %cst_42 = arith.constant 1.000000e+00 : f32
    %115 = vector.broadcast %cst_42 : f32 to vector<8x64xf32>
    %116 = arith.addf %115, %114 : vector<8x64xf32>
    %117 = arith.divf %115, %116 : vector<8x64xf32>
    %118 = vector.extract_strided_slice %106 {offsets = [0, 64], sizes = [8, 64], strides = [1, 1]} : vector<8x192xf32> to vector<8x64xf32>
    %119 = vector.extract_strided_slice %109 {offsets = [0, 64], sizes = [8, 64], strides = [1, 1]} : vector<8x192xf32> to vector<8x64xf32>
    %120 = arith.addf %118, %119 : vector<8x64xf32>
    %121 = arith.negf %120 : vector<8x64xf32>
    %122 = math.exp %121 : vector<8x64xf32>
    %cst_43 = arith.constant 1.000000e+00 : f32
    %123 = vector.broadcast %cst_43 : f32 to vector<8x64xf32>
    %124 = arith.addf %123, %122 : vector<8x64xf32>
    %125 = arith.divf %123, %124 : vector<8x64xf32>
    %126 = vector.extract_strided_slice %106 {offsets = [0, 128], sizes = [8, 64], strides = [1, 1]} : vector<8x192xf32> to vector<8x64xf32>
    %127 = vector.extract_strided_slice %109 {offsets = [0, 128], sizes = [8, 64], strides = [1, 1]} : vector<8x192xf32> to vector<8x64xf32>
    %128 = arith.mulf %117, %127 : vector<8x64xf32>
    %129 = arith.addf %126, %128 : vector<8x64xf32>
    %130 = math.tanh %129 : vector<8x64xf32>
    %cst_44 = arith.constant 1.000000e+00 : f32
    %131 = vector.broadcast %cst_44 : f32 to vector<8x64xf32>
    %132 = arith.subf %131, %125 : vector<8x64xf32>
    %133 = arith.mulf %132, %130 : vector<8x64xf32>
    %134 = arith.mulf %125, %94 : vector<8x64xf32>
    %135 = arith.addf %133, %134 : vector<8x64xf32>
    %c0_45 = arith.constant 0 : index
    %136 = arith.index_cast %104 : i32 to index
    %c0_46 = arith.constant 0 : index
    %137 = vector.load %arg8[%c0_45, %136, %c0_46] : memref<1x64x64xf32, #tpu.memory_space<vmem>>, vector<1x8x64xf32>
    %138 = vector.shape_cast %137 : vector<1x8x64xf32> to vector<8x64xf32>
    %139 = vector.shape_cast %135 : vector<8x64xf32> to vector<1x8x64xf32>
    tpu.vector_store %arg8[%c0_45, %136, %c0_46], %139 {strides = array<i32>} : memref<1x64x64xf32, #tpu.memory_space<vmem>>, vector<1x8x64xf32>,
    %c3_i32 = arith.constant 3 : i32
    %c2_i32_47 = arith.constant 2 : i32
    %140 = arith.muli %c2_i32_47, %c3_i32 : i32
    %c7_i32_48 = arith.constant 7 : i32
    %141 = arith.subi %c7_i32_48, %140 : i32
    %142 = arith.muli %arg0, %141 : i32
    %143 = arith.addi %c3_i32, %142 : i32
    %c8_i32_49 = arith.constant 8 : i32
    %144 = arith.muli %143, %c8_i32_49 : i32
    %145 = tpu.assume_multiple %144, 8 : i32
    %146 = arith.index_cast %145 : i32 to index
    %c0_50 = arith.constant 0 : index
    %147 = vector.load %arg10[%146, %c0_50] : memref<64x192xf32, #tpu.memory_space<vmem>>, vector<8x192xf32>
    %cst_51 = arith.constant dense<0.000000e+00> : vector<8x192xf32>
    %148 = tpu.matmul %135, %13, %cst_51 {dimension_numbers = #tpu.dot_dimension_numbers<[1], [0], [0], [1], [0, 0, 1, 1], [], []>} : vector<8x64xf32>, vector<64x192xf32>, vector<8x192xf32> -> vector<8x192xf32>
    %149 = vector.broadcast %15 : vector<1x192xf32> to vector<8x192xf32>
    %150 = arith.addf %148, %149 : vector<8x192xf32>
    %151 = vector.extract_strided_slice %147 {offsets = [0, 0], sizes = [8, 64], strides = [1, 1]} : vector<8x192xf32> to vector<8x64xf32>
    %152 = vector.extract_strided_slice %150 {offsets = [0, 0], sizes = [8, 64], strides = [1, 1]} : vector<8x192xf32> to vector<8x64xf32>
    %153 = arith.addf %151, %152 : vector<8x64xf32>
    %154 = arith.negf %153 : vector<8x64xf32>
    %155 = math.exp %154 : vector<8x64xf32>
    %cst_52 = arith.constant 1.000000e+00 : f32
    %156 = vector.broadcast %cst_52 : f32 to vector<8x64xf32>
    %157 = arith.addf %156, %155 : vector<8x64xf32>
    %158 = arith.divf %156, %157 : vector<8x64xf32>
    %159 = vector.extract_strided_slice %147 {offsets = [0, 64], sizes = [8, 64], strides = [1, 1]} : vector<8x192xf32> to vector<8x64xf32>
    %160 = vector.extract_strided_slice %150 {offsets = [0, 64], sizes = [8, 64], strides = [1, 1]} : vector<8x192xf32> to vector<8x64xf32>
    %161 = arith.addf %159, %160 : vector<8x64xf32>
    %162 = arith.negf %161 : vector<8x64xf32>
    %163 = math.exp %162 : vector<8x64xf32>
    %cst_53 = arith.constant 1.000000e+00 : f32
    %164 = vector.broadcast %cst_53 : f32 to vector<8x64xf32>
    %165 = arith.addf %164, %163 : vector<8x64xf32>
    %166 = arith.divf %164, %165 : vector<8x64xf32>
    %167 = vector.extract_strided_slice %147 {offsets = [0, 128], sizes = [8, 64], strides = [1, 1]} : vector<8x192xf32> to vector<8x64xf32>
    %168 = vector.extract_strided_slice %150 {offsets = [0, 128], sizes = [8, 64], strides = [1, 1]} : vector<8x192xf32> to vector<8x64xf32>
    %169 = arith.mulf %158, %168 : vector<8x64xf32>
    %170 = arith.addf %167, %169 : vector<8x64xf32>
    %171 = math.tanh %170 : vector<8x64xf32>
    %cst_54 = arith.constant 1.000000e+00 : f32
    %172 = vector.broadcast %cst_54 : f32 to vector<8x64xf32>
    %173 = arith.subf %172, %166 : vector<8x64xf32>
    %174 = arith.mulf %173, %171 : vector<8x64xf32>
    %175 = arith.mulf %166, %135 : vector<8x64xf32>
    %176 = arith.addf %174, %175 : vector<8x64xf32>
    %c0_55 = arith.constant 0 : index
    %177 = arith.index_cast %145 : i32 to index
    %c0_56 = arith.constant 0 : index
    %178 = vector.load %arg8[%c0_55, %177, %c0_56] : memref<1x64x64xf32, #tpu.memory_space<vmem>>, vector<1x8x64xf32>
    %179 = vector.shape_cast %178 : vector<1x8x64xf32> to vector<8x64xf32>
    %180 = vector.shape_cast %176 : vector<8x64xf32> to vector<1x8x64xf32>
    tpu.vector_store %arg8[%c0_55, %177, %c0_56], %180 {strides = array<i32>} : memref<1x64x64xf32, #tpu.memory_space<vmem>>, vector<1x8x64xf32>,
    %c4_i32 = arith.constant 4 : i32
    %c2_i32_57 = arith.constant 2 : i32
    %181 = arith.muli %c2_i32_57, %c4_i32 : i32
    %c7_i32_58 = arith.constant 7 : i32
    %182 = arith.subi %c7_i32_58, %181 : i32
    %183 = arith.muli %arg0, %182 : i32
    %184 = arith.addi %c4_i32, %183 : i32
    %c8_i32_59 = arith.constant 8 : i32
    %185 = arith.muli %184, %c8_i32_59 : i32
    %186 = tpu.assume_multiple %185, 8 : i32
    %187 = arith.index_cast %186 : i32 to index
    %c0_60 = arith.constant 0 : index
    %188 = vector.load %arg10[%187, %c0_60] : memref<64x192xf32, #tpu.memory_space<vmem>>, vector<8x192xf32>
    %cst_61 = arith.constant dense<0.000000e+00> : vector<8x192xf32>
    %189 = tpu.matmul %176, %13, %cst_61 {dimension_numbers = #tpu.dot_dimension_numbers<[1], [0], [0], [1], [0, 0, 1, 1], [], []>} : vector<8x64xf32>, vector<64x192xf32>, vector<8x192xf32> -> vector<8x192xf32>
    %190 = vector.broadcast %15 : vector<1x192xf32> to vector<8x192xf32>
    %191 = arith.addf %189, %190 : vector<8x192xf32>
    %192 = vector.extract_strided_slice %188 {offsets = [0, 0], sizes = [8, 64], strides = [1, 1]} : vector<8x192xf32> to vector<8x64xf32>
    %193 = vector.extract_strided_slice %191 {offsets = [0, 0], sizes = [8, 64], strides = [1, 1]} : vector<8x192xf32> to vector<8x64xf32>
    %194 = arith.addf %192, %193 : vector<8x64xf32>
    %195 = arith.negf %194 : vector<8x64xf32>
    %196 = math.exp %195 : vector<8x64xf32>
    %cst_62 = arith.constant 1.000000e+00 : f32
    %197 = vector.broadcast %cst_62 : f32 to vector<8x64xf32>
    %198 = arith.addf %197, %196 : vector<8x64xf32>
    %199 = arith.divf %197, %198 : vector<8x64xf32>
    %200 = vector.extract_strided_slice %188 {offsets = [0, 64], sizes = [8, 64], strides = [1, 1]} : vector<8x192xf32> to vector<8x64xf32>
    %201 = vector.extract_strided_slice %191 {offsets = [0, 64], sizes = [8, 64], strides = [1, 1]} : vector<8x192xf32> to vector<8x64xf32>
    %202 = arith.addf %200, %201 : vector<8x64xf32>
    %203 = arith.negf %202 : vector<8x64xf32>
    %204 = math.exp %203 : vector<8x64xf32>
    %cst_63 = arith.constant 1.000000e+00 : f32
    %205 = vector.broadcast %cst_63 : f32 to vector<8x64xf32>
    %206 = arith.addf %205, %204 : vector<8x64xf32>
    %207 = arith.divf %205, %206 : vector<8x64xf32>
    %208 = vector.extract_strided_slice %188 {offsets = [0, 128], sizes = [8, 64], strides = [1, 1]} : vector<8x192xf32> to vector<8x64xf32>
    %209 = vector.extract_strided_slice %191 {offsets = [0, 128], sizes = [8, 64], strides = [1, 1]} : vector<8x192xf32> to vector<8x64xf32>
    %210 = arith.mulf %199, %209 : vector<8x64xf32>
    %211 = arith.addf %208, %210 : vector<8x64xf32>
    %212 = math.tanh %211 : vector<8x64xf32>
    %cst_64 = arith.constant 1.000000e+00 : f32
    %213 = vector.broadcast %cst_64 : f32 to vector<8x64xf32>
    %214 = arith.subf %213, %207 : vector<8x64xf32>
    %215 = arith.mulf %214, %212 : vector<8x64xf32>
    %216 = arith.mulf %207, %176 : vector<8x64xf32>
    %217 = arith.addf %215, %216 : vector<8x64xf32>
    %c0_65 = arith.constant 0 : index
    %218 = arith.index_cast %186 : i32 to index
    %c0_66 = arith.constant 0 : index
    %219 = vector.load %arg8[%c0_65, %218, %c0_66] : memref<1x64x64xf32, #tpu.memory_space<vmem>>, vector<1x8x64xf32>
    %220 = vector.shape_cast %219 : vector<1x8x64xf32> to vector<8x64xf32>
    %221 = vector.shape_cast %217 : vector<8x64xf32> to vector<1x8x64xf32>
    tpu.vector_store %arg8[%c0_65, %218, %c0_66], %221 {strides = array<i32>} : memref<1x64x64xf32, #tpu.memory_space<vmem>>, vector<1x8x64xf32>,
    %c5_i32 = arith.constant 5 : i32
    %c2_i32_67 = arith.constant 2 : i32
    %222 = arith.muli %c2_i32_67, %c5_i32 : i32
    %c7_i32_68 = arith.constant 7 : i32
    %223 = arith.subi %c7_i32_68, %222 : i32
    %224 = arith.muli %arg0, %223 : i32
    %225 = arith.addi %c5_i32, %224 : i32
    %c8_i32_69 = arith.constant 8 : i32
    %226 = arith.muli %225, %c8_i32_69 : i32
    %227 = tpu.assume_multiple %226, 8 : i32
    %228 = arith.index_cast %227 : i32 to index
    %c0_70 = arith.constant 0 : index
    %229 = vector.load %arg10[%228, %c0_70] : memref<64x192xf32, #tpu.memory_space<vmem>>, vector<8x192xf32>
    %cst_71 = arith.constant dense<0.000000e+00> : vector<8x192xf32>
    %230 = tpu.matmul %217, %13, %cst_71 {dimension_numbers = #tpu.dot_dimension_numbers<[1], [0], [0], [1], [0, 0, 1, 1], [], []>} : vector<8x64xf32>, vector<64x192xf32>, vector<8x192xf32> -> vector<8x192xf32>
    %231 = vector.broadcast %15 : vector<1x192xf32> to vector<8x192xf32>
    %232 = arith.addf %230, %231 : vector<8x192xf32>
    %233 = vector.extract_strided_slice %229 {offsets = [0, 0], sizes = [8, 64], strides = [1, 1]} : vector<8x192xf32> to vector<8x64xf32>
    %234 = vector.extract_strided_slice %232 {offsets = [0, 0], sizes = [8, 64], strides = [1, 1]} : vector<8x192xf32> to vector<8x64xf32>
    %235 = arith.addf %233, %234 : vector<8x64xf32>
    %236 = arith.negf %235 : vector<8x64xf32>
    %237 = math.exp %236 : vector<8x64xf32>
    %cst_72 = arith.constant 1.000000e+00 : f32
    %238 = vector.broadcast %cst_72 : f32 to vector<8x64xf32>
    %239 = arith.addf %238, %237 : vector<8x64xf32>
    %240 = arith.divf %238, %239 : vector<8x64xf32>
    %241 = vector.extract_strided_slice %229 {offsets = [0, 64], sizes = [8, 64], strides = [1, 1]} : vector<8x192xf32> to vector<8x64xf32>
    %242 = vector.extract_strided_slice %232 {offsets = [0, 64], sizes = [8, 64], strides = [1, 1]} : vector<8x192xf32> to vector<8x64xf32>
    %243 = arith.addf %241, %242 : vector<8x64xf32>
    %244 = arith.negf %243 : vector<8x64xf32>
    %245 = math.exp %244 : vector<8x64xf32>
    %cst_73 = arith.constant 1.000000e+00 : f32
    %246 = vector.broadcast %cst_73 : f32 to vector<8x64xf32>
    %247 = arith.addf %246, %245 : vector<8x64xf32>
    %248 = arith.divf %246, %247 : vector<8x64xf32>
    %249 = vector.extract_strided_slice %229 {offsets = [0, 128], sizes = [8, 64], strides = [1, 1]} : vector<8x192xf32> to vector<8x64xf32>
    %250 = vector.extract_strided_slice %232 {offsets = [0, 128], sizes = [8, 64], strides = [1, 1]} : vector<8x192xf32> to vector<8x64xf32>
    %251 = arith.mulf %240, %250 : vector<8x64xf32>
    %252 = arith.addf %249, %251 : vector<8x64xf32>
    %253 = math.tanh %252 : vector<8x64xf32>
    %cst_74 = arith.constant 1.000000e+00 : f32
    %254 = vector.broadcast %cst_74 : f32 to vector<8x64xf32>
    %255 = arith.subf %254, %248 : vector<8x64xf32>
    %256 = arith.mulf %255, %253 : vector<8x64xf32>
    %257 = arith.mulf %248, %217 : vector<8x64xf32>
    %258 = arith.addf %256, %257 : vector<8x64xf32>
    %c0_75 = arith.constant 0 : index
    %259 = arith.index_cast %227 : i32 to index
    %c0_76 = arith.constant 0 : index
    %260 = vector.load %arg8[%c0_75, %259, %c0_76] : memref<1x64x64xf32, #tpu.memory_space<vmem>>, vector<1x8x64xf32>
    %261 = vector.shape_cast %260 : vector<1x8x64xf32> to vector<8x64xf32>
    %262 = vector.shape_cast %258 : vector<8x64xf32> to vector<1x8x64xf32>
    tpu.vector_store %arg8[%c0_75, %259, %c0_76], %262 {strides = array<i32>} : memref<1x64x64xf32, #tpu.memory_space<vmem>>, vector<1x8x64xf32>,
    %c6_i32 = arith.constant 6 : i32
    %c2_i32_77 = arith.constant 2 : i32
    %263 = arith.muli %c2_i32_77, %c6_i32 : i32
    %c7_i32_78 = arith.constant 7 : i32
    %264 = arith.subi %c7_i32_78, %263 : i32
    %265 = arith.muli %arg0, %264 : i32
    %266 = arith.addi %c6_i32, %265 : i32
    %c8_i32_79 = arith.constant 8 : i32
    %267 = arith.muli %266, %c8_i32_79 : i32
    %268 = tpu.assume_multiple %267, 8 : i32
    %269 = arith.index_cast %268 : i32 to index
    %c0_80 = arith.constant 0 : index
    %270 = vector.load %arg10[%269, %c0_80] : memref<64x192xf32, #tpu.memory_space<vmem>>, vector<8x192xf32>
    %cst_81 = arith.constant dense<0.000000e+00> : vector<8x192xf32>
    %271 = tpu.matmul %258, %13, %cst_81 {dimension_numbers = #tpu.dot_dimension_numbers<[1], [0], [0], [1], [0, 0, 1, 1], [], []>} : vector<8x64xf32>, vector<64x192xf32>, vector<8x192xf32> -> vector<8x192xf32>
    %272 = vector.broadcast %15 : vector<1x192xf32> to vector<8x192xf32>
    %273 = arith.addf %271, %272 : vector<8x192xf32>
    %274 = vector.extract_strided_slice %270 {offsets = [0, 0], sizes = [8, 64], strides = [1, 1]} : vector<8x192xf32> to vector<8x64xf32>
    %275 = vector.extract_strided_slice %273 {offsets = [0, 0], sizes = [8, 64], strides = [1, 1]} : vector<8x192xf32> to vector<8x64xf32>
    %276 = arith.addf %274, %275 : vector<8x64xf32>
    %277 = arith.negf %276 : vector<8x64xf32>
    %278 = math.exp %277 : vector<8x64xf32>
    %cst_82 = arith.constant 1.000000e+00 : f32
    %279 = vector.broadcast %cst_82 : f32 to vector<8x64xf32>
    %280 = arith.addf %279, %278 : vector<8x64xf32>
    %281 = arith.divf %279, %280 : vector<8x64xf32>
    %282 = vector.extract_strided_slice %270 {offsets = [0, 64], sizes = [8, 64], strides = [1, 1]} : vector<8x192xf32> to vector<8x64xf32>
    %283 = vector.extract_strided_slice %273 {offsets = [0, 64], sizes = [8, 64], strides = [1, 1]} : vector<8x192xf32> to vector<8x64xf32>
    %284 = arith.addf %282, %283 : vector<8x64xf32>
    %285 = arith.negf %284 : vector<8x64xf32>
    %286 = math.exp %285 : vector<8x64xf32>
    %cst_83 = arith.constant 1.000000e+00 : f32
    %287 = vector.broadcast %cst_83 : f32 to vector<8x64xf32>
    %288 = arith.addf %287, %286 : vector<8x64xf32>
    %289 = arith.divf %287, %288 : vector<8x64xf32>
    %290 = vector.extract_strided_slice %270 {offsets = [0, 128], sizes = [8, 64], strides = [1, 1]} : vector<8x192xf32> to vector<8x64xf32>
    %291 = vector.extract_strided_slice %273 {offsets = [0, 128], sizes = [8, 64], strides = [1, 1]} : vector<8x192xf32> to vector<8x64xf32>
    %292 = arith.mulf %281, %291 : vector<8x64xf32>
    %293 = arith.addf %290, %292 : vector<8x64xf32>
    %294 = math.tanh %293 : vector<8x64xf32>
    %cst_84 = arith.constant 1.000000e+00 : f32
    %295 = vector.broadcast %cst_84 : f32 to vector<8x64xf32>
    %296 = arith.subf %295, %289 : vector<8x64xf32>
    %297 = arith.mulf %296, %294 : vector<8x64xf32>
    %298 = arith.mulf %289, %258 : vector<8x64xf32>
    %299 = arith.addf %297, %298 : vector<8x64xf32>
    %c0_85 = arith.constant 0 : index
    %300 = arith.index_cast %268 : i32 to index
    %c0_86 = arith.constant 0 : index
    %301 = vector.load %arg8[%c0_85, %300, %c0_86] : memref<1x64x64xf32, #tpu.memory_space<vmem>>, vector<1x8x64xf32>
    %302 = vector.shape_cast %301 : vector<1x8x64xf32> to vector<8x64xf32>
    %303 = vector.shape_cast %299 : vector<8x64xf32> to vector<1x8x64xf32>
    tpu.vector_store %arg8[%c0_85, %300, %c0_86], %303 {strides = array<i32>} : memref<1x64x64xf32, #tpu.memory_space<vmem>>, vector<1x8x64xf32>,
    %c7_i32_87 = arith.constant 7 : i32
    %c2_i32_88 = arith.constant 2 : i32
    %304 = arith.muli %c2_i32_88, %c7_i32_87 : i32
    %c7_i32_89 = arith.constant 7 : i32
    %305 = arith.subi %c7_i32_89, %304 : i32
    %306 = arith.muli %arg0, %305 : i32
    %307 = arith.addi %c7_i32_87, %306 : i32
    %c8_i32_90 = arith.constant 8 : i32
    %308 = arith.muli %307, %c8_i32_90 : i32
    %309 = tpu.assume_multiple %308, 8 : i32
    %310 = arith.index_cast %309 : i32 to index
    %c0_91 = arith.constant 0 : index
    %311 = vector.load %arg10[%310, %c0_91] : memref<64x192xf32, #tpu.memory_space<vmem>>, vector<8x192xf32>
    %cst_92 = arith.constant dense<0.000000e+00> : vector<8x192xf32>
    %312 = tpu.matmul %299, %13, %cst_92 {dimension_numbers = #tpu.dot_dimension_numbers<[1], [0], [0], [1], [0, 0, 1, 1], [], []>} : vector<8x64xf32>, vector<64x192xf32>, vector<8x192xf32> -> vector<8x192xf32>
    %313 = vector.broadcast %15 : vector<1x192xf32> to vector<8x192xf32>
    %314 = arith.addf %312, %313 : vector<8x192xf32>
    %315 = vector.extract_strided_slice %311 {offsets = [0, 0], sizes = [8, 64], strides = [1, 1]} : vector<8x192xf32> to vector<8x64xf32>
    %316 = vector.extract_strided_slice %314 {offsets = [0, 0], sizes = [8, 64], strides = [1, 1]} : vector<8x192xf32> to vector<8x64xf32>
    %317 = arith.addf %315, %316 : vector<8x64xf32>
    %318 = arith.negf %317 : vector<8x64xf32>
    %319 = math.exp %318 : vector<8x64xf32>
    %cst_93 = arith.constant 1.000000e+00 : f32
    %320 = vector.broadcast %cst_93 : f32 to vector<8x64xf32>
    %321 = arith.addf %320, %319 : vector<8x64xf32>
    %322 = arith.divf %320, %321 : vector<8x64xf32>
    %323 = vector.extract_strided_slice %311 {offsets = [0, 64], sizes = [8, 64], strides = [1, 1]} : vector<8x192xf32> to vector<8x64xf32>
    %324 = vector.extract_strided_slice %314 {offsets = [0, 64], sizes = [8, 64], strides = [1, 1]} : vector<8x192xf32> to vector<8x64xf32>
    %325 = arith.addf %323, %324 : vector<8x64xf32>
    %326 = arith.negf %325 : vector<8x64xf32>
    %327 = math.exp %326 : vector<8x64xf32>
    %cst_94 = arith.constant 1.000000e+00 : f32
    %328 = vector.broadcast %cst_94 : f32 to vector<8x64xf32>
    %329 = arith.addf %328, %327 : vector<8x64xf32>
    %330 = arith.divf %328, %329 : vector<8x64xf32>
    %331 = vector.extract_strided_slice %311 {offsets = [0, 128], sizes = [8, 64], strides = [1, 1]} : vector<8x192xf32> to vector<8x64xf32>
    %332 = vector.extract_strided_slice %314 {offsets = [0, 128], sizes = [8, 64], strides = [1, 1]} : vector<8x192xf32> to vector<8x64xf32>
    %333 = arith.mulf %322, %332 : vector<8x64xf32>
    %334 = arith.addf %331, %333 : vector<8x64xf32>
    %335 = math.tanh %334 : vector<8x64xf32>
    %cst_95 = arith.constant 1.000000e+00 : f32
    %336 = vector.broadcast %cst_95 : f32 to vector<8x64xf32>
    %337 = arith.subf %336, %330 : vector<8x64xf32>
    %338 = arith.mulf %337, %335 : vector<8x64xf32>
    %339 = arith.mulf %330, %299 : vector<8x64xf32>
    %340 = arith.addf %338, %339 : vector<8x64xf32>
    %c0_96 = arith.constant 0 : index
    %341 = arith.index_cast %309 : i32 to index
    %c0_97 = arith.constant 0 : index
    %342 = vector.load %arg8[%c0_96, %341, %c0_97] : memref<1x64x64xf32, #tpu.memory_space<vmem>>, vector<1x8x64xf32>
    %343 = vector.shape_cast %342 : vector<1x8x64xf32> to vector<8x64xf32>
    %344 = vector.shape_cast %340 : vector<8x64xf32> to vector<1x8x64xf32>
    tpu.vector_store %arg8[%c0_96, %341, %c0_97], %344 {strides = array<i32>} : memref<1x64x64xf32, #tpu.memory_space<vmem>>, vector<1x8x64xf32>,
    %c8_i32_98 = arith.constant 8 : i32
    %c0_99 = arith.constant 0 : index
    %c0_100 = arith.constant 0 : index
    %345 = vector.load %arg11[%c0_99, %c0_100] : memref<8x64xf32, #tpu.memory_space<vmem>>, vector<8x64xf32>
    tpu.vector_store %arg11[%c0_99, %c0_100], %340 {strides = array<i32>} : memref<8x64xf32, #tpu.memory_space<vmem>>, vector<8x64xf32>,
    %c0_101 = arith.constant 0 : index
    %c0_102 = arith.constant 0 : index
    %c0_103 = arith.constant 0 : index
    %346 = vector.load %arg9[%c0_101, %c0_102, %c0_103] : memref<1x8x64xf32, #tpu.memory_space<vmem>>, vector<1x8x64xf32>
    %347 = vector.shape_cast %346 : vector<1x8x64xf32> to vector<8x64xf32>
    %348 = vector.shape_cast %340 : vector<8x64xf32> to vector<1x8x64xf32>
    tpu.vector_store %arg9[%c0_101, %c0_102, %c0_103], %348 {strides = array<i32>} : memref<1x8x64xf32, #tpu.memory_space<vmem>>, vector<1x8x64xf32>,
    return
  }
  func.func @transform_0(%arg0: i32, %arg1: i32) -> (i32, i32) {
    %c2_i32 = arith.constant 2 : i32
    %0 = arith.muli %c2_i32, %arg1 : i32
    %c1_i32 = arith.constant 1 : i32
    %1 = arith.subi %c1_i32, %0 : i32
    %2 = arith.muli %arg0, %1 : i32
    %3 = arith.addi %arg1, %2 : i32
    %c0_i32 = arith.constant 0 : i32
    %c0_i32_0 = arith.constant 0 : i32
    return %3, %c0_i32 : i32, i32
  }
  func.func @transform_1(%arg0: i32, %arg1: i32) -> (i32, i32, i32) {
    %c0_i32 = arith.constant 0 : i32
    %c0_i32_0 = arith.constant 0 : i32
    %c0_i32_1 = arith.constant 0 : i32
    return %arg0, %c0_i32, %c0_i32_0 : i32, i32, i32
  }
  func.func @transform_2(%arg0: i32, %arg1: i32) -> (i32, i32, i32) {
    %c0_i32 = arith.constant 0 : i32
    %c0_i32_0 = arith.constant 0 : i32
    %c0_i32_1 = arith.constant 0 : i32
    return %arg0, %c0_i32, %c0_i32_0 : i32, i32, i32
  }
  func.func @transform_3(%arg0: i32, %arg1: i32) -> (i32, i32, i32) {
    %c0_i32 = arith.constant 0 : i32
    %c0_i32_0 = arith.constant 0 : i32
    %c0_i32_1 = arith.constant 0 : i32
    return %arg0, %c0_i32, %c0_i32_0 : i32, i32, i32
  }
  func.func @transform_4(%arg0: i32, %arg1: i32) -> (i32, i32, i32) {
    %c0_i32 = arith.constant 0 : i32
    %c0_i32_0 = arith.constant 0 : i32
    %c0_i32_1 = arith.constant 0 : i32
    return %arg0, %c0_i32, %c0_i32_0 : i32, i32, i32
  }
  func.func @transform_5(%arg0: i32, %arg1: i32) -> (i32, i32, i32) {
    %c0_i32 = arith.constant 0 : i32
    %c0_i32_0 = arith.constant 0 : i32
    %c0_i32_1 = arith.constant 0 : i32
    return %arg0, %c0_i32, %c0_i32_0 : i32, i32, i32
  }
  func.func @transform_6(%arg0: i32, %arg1: i32) -> (i32, i32, i32) {
    %c2_i32 = arith.constant 2 : i32
    %0 = arith.muli %c2_i32, %arg1 : i32
    %c1_i32 = arith.constant 1 : i32
    %1 = arith.subi %c1_i32, %0 : i32
    %2 = arith.muli %arg0, %1 : i32
    %3 = arith.addi %arg1, %2 : i32
    %c0_i32 = arith.constant 0 : i32
    %c0_i32_0 = arith.constant 0 : i32
    return %arg0, %3, %c0_i32 : i32, i32, i32
  }
  func.func @transform_7(%arg0: i32, %arg1: i32) -> (i32, i32, i32) {
    %c0_i32 = arith.constant 0 : i32
    %c0_i32_0 = arith.constant 0 : i32
    %c0_i32_1 = arith.constant 0 : i32
    return %arg0, %c0_i32, %c0_i32_0 : i32, i32, i32
  }
}

module attributes {stable_mosaic.version = 11 : i64} {
  func.func @gru_kernel(%arg0: i32, %arg1: i32, %arg2: memref<64x32xf32, #tpu.memory_space<vmem>>, %arg3: memref<1x32x384xf32, #tpu.memory_space<vmem>>, %arg4: memref<1x1x384xf32, #tpu.memory_space<vmem>>, %arg5: memref<1x128x384xf32, #tpu.memory_space<vmem>>, %arg6: memref<1x1x384xf32, #tpu.memory_space<vmem>>, %arg7: memref<1x8x128xf32, #tpu.memory_space<vmem>>, %arg8: memref<1x64x128xf32, #tpu.memory_space<vmem>>, %arg9: memref<1x8x128xf32, #tpu.memory_space<vmem>>, %arg10: memref<64x384xf32, #tpu.memory_space<vmem>>, %arg11: memref<8x128xf32, #tpu.memory_space<vmem>>) attributes {dimension_semantics = [#tpu.dimension_semantics<parallel>, #tpu.dimension_semantics<arbitrary>], iteration_bounds = array<i64: 1, 1>, scalar_prefetch = 0 : i64, scratch_operands = 2 : i64, tpu.core_type = #tpu.core_type<tc>, window_params = [{transform_indices = @transform_0, window_bounds = array<i64: 64, 32>}, {transform_indices = @transform_1, window_bounds = array<i64: 1, 32, 384>}, {transform_indices = @transform_2, window_bounds = array<i64: 1, 1, 384>}, {transform_indices = @transform_3, window_bounds = array<i64: 1, 128, 384>}, {transform_indices = @transform_4, window_bounds = array<i64: 1, 1, 384>}, {transform_indices = @transform_5, window_bounds = array<i64: 1, 8, 128>}, {transform_indices = @transform_6, window_bounds = array<i64: 1, 64, 128>}, {transform_indices = @transform_7, window_bounds = array<i64: 1, 8, 128>}]} {
    %c0 = arith.constant 0 : index
    %c0_0 = arith.constant 0 : index
    %0 = vector.load %arg2[%c0, %c0_0] : memref<64x32xf32, #tpu.memory_space<vmem>>, vector<64x32xf32>
    %c0_1 = arith.constant 0 : index
    %c0_2 = arith.constant 0 : index
    %c0_3 = arith.constant 0 : index
    %1 = vector.load %arg3[%c0_1, %c0_2, %c0_3] : memref<1x32x384xf32, #tpu.memory_space<vmem>>, vector<1x32x384xf32>
    %2 = vector.shape_cast %1 : vector<1x32x384xf32> to vector<32x384xf32>
    %cst = arith.constant dense<0.000000e+00> : vector<64x384xf32>
    %3 = tpu.matmul %0, %2, %cst {dimension_numbers = #tpu.dot_dimension_numbers<[1], [0], [0], [1], [0, 0, 1, 1], [], []>} : vector<64x32xf32>, vector<32x384xf32>, vector<64x384xf32> -> vector<64x384xf32>
    %c0_4 = arith.constant 0 : index
    %c0_5 = arith.constant 0 : index
    %c0_6 = arith.constant 0 : index
    %4 = vector.load %arg4[%c0_4, %c0_5, %c0_6] : memref<1x1x384xf32, #tpu.memory_space<vmem>>, vector<1x1x384xf32>
    %5 = vector.shape_cast %4 : vector<1x1x384xf32> to vector<1x384xf32>
    %6 = vector.broadcast %5 : vector<1x384xf32> to vector<64x384xf32>
    %7 = arith.addf %3, %6 : vector<64x384xf32>
    %c0_7 = arith.constant 0 : index
    %c0_8 = arith.constant 0 : index
    %8 = vector.load %arg10[%c0_7, %c0_8] : memref<64x384xf32, #tpu.memory_space<vmem>>, vector<64x384xf32>
    tpu.vector_store %arg10[%c0_7, %c0_8], %7 {strides = array<i32>} : memref<64x384xf32, #tpu.memory_space<vmem>>, vector<64x384xf32>,
    %c0_i32 = arith.constant 0 : i32
    %9 = arith.cmpi eq, %arg1, %c0_i32 : i32
    %10 = arith.extui %9 : i1 to i32
    %c0_i32_9 = arith.constant 0 : i32
    %11 = arith.cmpi ne, %10, %c0_i32_9 : i32
    scf.if %11 {
      %c0_104 = arith.constant 0 : index
      %c0_105 = arith.constant 0 : index
      %c0_106 = arith.constant 0 : index
      %349 = vector.load %arg7[%c0_104, %c0_105, %c0_106] : memref<1x8x128xf32, #tpu.memory_space<vmem>>, vector<1x8x128xf32>
      %350 = vector.shape_cast %349 : vector<1x8x128xf32> to vector<8x128xf32>
      %c0_107 = arith.constant 0 : index
      %c0_108 = arith.constant 0 : index
      %351 = vector.load %arg11[%c0_107, %c0_108] : memref<8x128xf32, #tpu.memory_space<vmem>>, vector<8x128xf32>
      tpu.vector_store %arg11[%c0_107, %c0_108], %350 {strides = array<i32>} : memref<8x128xf32, #tpu.memory_space<vmem>>, vector<8x128xf32>,
    } else {
    }
    %c0_10 = arith.constant 0 : index
    %c0_11 = arith.constant 0 : index
    %c0_12 = arith.constant 0 : index
    %12 = vector.load %arg5[%c0_10, %c0_11, %c0_12] : memref<1x128x384xf32, #tpu.memory_space<vmem>>, vector<1x128x384xf32>
    %13 = vector.shape_cast %12 : vector<1x128x384xf32> to vector<128x384xf32>
    %c0_13 = arith.constant 0 : index
    %c0_14 = arith.constant 0 : index
    %c0_15 = arith.constant 0 : index
    %14 = vector.load %arg6[%c0_13, %c0_14, %c0_15] : memref<1x1x384xf32, #tpu.memory_space<vmem>>, vector<1x1x384xf32>
    %15 = vector.shape_cast %14 : vector<1x1x384xf32> to vector<1x384xf32>
    %c0_16 = arith.constant 0 : index
    %c0_17 = arith.constant 0 : index
    %16 = vector.load %arg11[%c0_16, %c0_17] : memref<8x128xf32, #tpu.memory_space<vmem>>, vector<8x128xf32>
    %c0_i32_18 = arith.constant 0 : i32
    %c2_i32 = arith.constant 2 : i32
    %17 = arith.muli %c2_i32, %c0_i32_18 : i32
    %c7_i32 = arith.constant 7 : i32
    %18 = arith.subi %c7_i32, %17 : i32
    %19 = arith.muli %arg0, %18 : i32
    %20 = arith.addi %c0_i32_18, %19 : i32
    %c8_i32 = arith.constant 8 : i32
    %21 = arith.muli %20, %c8_i32 : i32
    %22 = tpu.assume_multiple %21, 8 : i32
    %23 = arith.index_cast %22 : i32 to index
    %c0_19 = arith.constant 0 : index
    %24 = vector.load %arg10[%23, %c0_19] : memref<64x384xf32, #tpu.memory_space<vmem>>, vector<8x384xf32>
    %cst_20 = arith.constant dense<0.000000e+00> : vector<8x384xf32>
    %25 = tpu.matmul %16, %13, %cst_20 {dimension_numbers = #tpu.dot_dimension_numbers<[1], [0], [0], [1], [0, 0, 1, 1], [], []>} : vector<8x128xf32>, vector<128x384xf32>, vector<8x384xf32> -> vector<8x384xf32>
    %26 = vector.broadcast %15 : vector<1x384xf32> to vector<8x384xf32>
    %27 = arith.addf %25, %26 : vector<8x384xf32>
    %28 = vector.extract_strided_slice %24 {offsets = [0, 0], sizes = [8, 128], strides = [1, 1]} : vector<8x384xf32> to vector<8x128xf32>
    %29 = vector.extract_strided_slice %27 {offsets = [0, 0], sizes = [8, 128], strides = [1, 1]} : vector<8x384xf32> to vector<8x128xf32>
    %30 = arith.addf %28, %29 : vector<8x128xf32>
    %31 = arith.negf %30 : vector<8x128xf32>
    %32 = math.exp %31 : vector<8x128xf32>
    %cst_21 = arith.constant 1.000000e+00 : f32
    %33 = vector.broadcast %cst_21 : f32 to vector<8x128xf32>
    %34 = arith.addf %33, %32 : vector<8x128xf32>
    %35 = arith.divf %33, %34 : vector<8x128xf32>
    %36 = vector.extract_strided_slice %24 {offsets = [0, 128], sizes = [8, 128], strides = [1, 1]} : vector<8x384xf32> to vector<8x128xf32>
    %37 = vector.extract_strided_slice %27 {offsets = [0, 128], sizes = [8, 128], strides = [1, 1]} : vector<8x384xf32> to vector<8x128xf32>
    %38 = arith.addf %36, %37 : vector<8x128xf32>
    %39 = arith.negf %38 : vector<8x128xf32>
    %40 = math.exp %39 : vector<8x128xf32>
    %cst_22 = arith.constant 1.000000e+00 : f32
    %41 = vector.broadcast %cst_22 : f32 to vector<8x128xf32>
    %42 = arith.addf %41, %40 : vector<8x128xf32>
    %43 = arith.divf %41, %42 : vector<8x128xf32>
    %44 = vector.extract_strided_slice %24 {offsets = [0, 256], sizes = [8, 128], strides = [1, 1]} : vector<8x384xf32> to vector<8x128xf32>
    %45 = vector.extract_strided_slice %27 {offsets = [0, 256], sizes = [8, 128], strides = [1, 1]} : vector<8x384xf32> to vector<8x128xf32>
    %46 = arith.mulf %35, %45 : vector<8x128xf32>
    %47 = arith.addf %44, %46 : vector<8x128xf32>
    %48 = math.tanh %47 : vector<8x128xf32>
    %cst_23 = arith.constant 1.000000e+00 : f32
    %49 = vector.broadcast %cst_23 : f32 to vector<8x128xf32>
    %50 = arith.subf %49, %43 : vector<8x128xf32>
    %51 = arith.mulf %50, %48 : vector<8x128xf32>
    %52 = arith.mulf %43, %16 : vector<8x128xf32>
    %53 = arith.addf %51, %52 : vector<8x128xf32>
    %c0_24 = arith.constant 0 : index
    %54 = arith.index_cast %22 : i32 to index
    %c0_25 = arith.constant 0 : index
    %55 = vector.load %arg8[%c0_24, %54, %c0_25] : memref<1x64x128xf32, #tpu.memory_space<vmem>>, vector<1x8x128xf32>
    %56 = vector.shape_cast %55 : vector<1x8x128xf32> to vector<8x128xf32>
    %57 = vector.shape_cast %53 : vector<8x128xf32> to vector<1x8x128xf32>
    tpu.vector_store %arg8[%c0_24, %54, %c0_25], %57 {strides = array<i32>} : memref<1x64x128xf32, #tpu.memory_space<vmem>>, vector<1x8x128xf32>,
    %c1_i32 = arith.constant 1 : i32
    %c2_i32_26 = arith.constant 2 : i32
    %58 = arith.muli %c2_i32_26, %c1_i32 : i32
    %c7_i32_27 = arith.constant 7 : i32
    %59 = arith.subi %c7_i32_27, %58 : i32
    %60 = arith.muli %arg0, %59 : i32
    %61 = arith.addi %c1_i32, %60 : i32
    %c8_i32_28 = arith.constant 8 : i32
    %62 = arith.muli %61, %c8_i32_28 : i32
    %63 = tpu.assume_multiple %62, 8 : i32
    %64 = arith.index_cast %63 : i32 to index
    %c0_29 = arith.constant 0 : index
    %65 = vector.load %arg10[%64, %c0_29] : memref<64x384xf32, #tpu.memory_space<vmem>>, vector<8x384xf32>
    %cst_30 = arith.constant dense<0.000000e+00> : vector<8x384xf32>
    %66 = tpu.matmul %53, %13, %cst_30 {dimension_numbers = #tpu.dot_dimension_numbers<[1], [0], [0], [1], [0, 0, 1, 1], [], []>} : vector<8x128xf32>, vector<128x384xf32>, vector<8x384xf32> -> vector<8x384xf32>
    %67 = vector.broadcast %15 : vector<1x384xf32> to vector<8x384xf32>
    %68 = arith.addf %66, %67 : vector<8x384xf32>
    %69 = vector.extract_strided_slice %65 {offsets = [0, 0], sizes = [8, 128], strides = [1, 1]} : vector<8x384xf32> to vector<8x128xf32>
    %70 = vector.extract_strided_slice %68 {offsets = [0, 0], sizes = [8, 128], strides = [1, 1]} : vector<8x384xf32> to vector<8x128xf32>
    %71 = arith.addf %69, %70 : vector<8x128xf32>
    %72 = arith.negf %71 : vector<8x128xf32>
    %73 = math.exp %72 : vector<8x128xf32>
    %cst_31 = arith.constant 1.000000e+00 : f32
    %74 = vector.broadcast %cst_31 : f32 to vector<8x128xf32>
    %75 = arith.addf %74, %73 : vector<8x128xf32>
    %76 = arith.divf %74, %75 : vector<8x128xf32>
    %77 = vector.extract_strided_slice %65 {offsets = [0, 128], sizes = [8, 128], strides = [1, 1]} : vector<8x384xf32> to vector<8x128xf32>
    %78 = vector.extract_strided_slice %68 {offsets = [0, 128], sizes = [8, 128], strides = [1, 1]} : vector<8x384xf32> to vector<8x128xf32>
    %79 = arith.addf %77, %78 : vector<8x128xf32>
    %80 = arith.negf %79 : vector<8x128xf32>
    %81 = math.exp %80 : vector<8x128xf32>
    %cst_32 = arith.constant 1.000000e+00 : f32
    %82 = vector.broadcast %cst_32 : f32 to vector<8x128xf32>
    %83 = arith.addf %82, %81 : vector<8x128xf32>
    %84 = arith.divf %82, %83 : vector<8x128xf32>
    %85 = vector.extract_strided_slice %65 {offsets = [0, 256], sizes = [8, 128], strides = [1, 1]} : vector<8x384xf32> to vector<8x128xf32>
    %86 = vector.extract_strided_slice %68 {offsets = [0, 256], sizes = [8, 128], strides = [1, 1]} : vector<8x384xf32> to vector<8x128xf32>
    %87 = arith.mulf %76, %86 : vector<8x128xf32>
    %88 = arith.addf %85, %87 : vector<8x128xf32>
    %89 = math.tanh %88 : vector<8x128xf32>
    %cst_33 = arith.constant 1.000000e+00 : f32
    %90 = vector.broadcast %cst_33 : f32 to vector<8x128xf32>
    %91 = arith.subf %90, %84 : vector<8x128xf32>
    %92 = arith.mulf %91, %89 : vector<8x128xf32>
    %93 = arith.mulf %84, %53 : vector<8x128xf32>
    %94 = arith.addf %92, %93 : vector<8x128xf32>
    %c0_34 = arith.constant 0 : index
    %95 = arith.index_cast %63 : i32 to index
    %c0_35 = arith.constant 0 : index
    %96 = vector.load %arg8[%c0_34, %95, %c0_35] : memref<1x64x128xf32, #tpu.memory_space<vmem>>, vector<1x8x128xf32>
    %97 = vector.shape_cast %96 : vector<1x8x128xf32> to vector<8x128xf32>
    %98 = vector.shape_cast %94 : vector<8x128xf32> to vector<1x8x128xf32>
    tpu.vector_store %arg8[%c0_34, %95, %c0_35], %98 {strides = array<i32>} : memref<1x64x128xf32, #tpu.memory_space<vmem>>, vector<1x8x128xf32>,
    %c2_i32_36 = arith.constant 2 : i32
    %c2_i32_37 = arith.constant 2 : i32
    %99 = arith.muli %c2_i32_37, %c2_i32_36 : i32
    %c7_i32_38 = arith.constant 7 : i32
    %100 = arith.subi %c7_i32_38, %99 : i32
    %101 = arith.muli %arg0, %100 : i32
    %102 = arith.addi %c2_i32_36, %101 : i32
    %c8_i32_39 = arith.constant 8 : i32
    %103 = arith.muli %102, %c8_i32_39 : i32
    %104 = tpu.assume_multiple %103, 8 : i32
    %105 = arith.index_cast %104 : i32 to index
    %c0_40 = arith.constant 0 : index
    %106 = vector.load %arg10[%105, %c0_40] : memref<64x384xf32, #tpu.memory_space<vmem>>, vector<8x384xf32>
    %cst_41 = arith.constant dense<0.000000e+00> : vector<8x384xf32>
    %107 = tpu.matmul %94, %13, %cst_41 {dimension_numbers = #tpu.dot_dimension_numbers<[1], [0], [0], [1], [0, 0, 1, 1], [], []>} : vector<8x128xf32>, vector<128x384xf32>, vector<8x384xf32> -> vector<8x384xf32>
    %108 = vector.broadcast %15 : vector<1x384xf32> to vector<8x384xf32>
    %109 = arith.addf %107, %108 : vector<8x384xf32>
    %110 = vector.extract_strided_slice %106 {offsets = [0, 0], sizes = [8, 128], strides = [1, 1]} : vector<8x384xf32> to vector<8x128xf32>
    %111 = vector.extract_strided_slice %109 {offsets = [0, 0], sizes = [8, 128], strides = [1, 1]} : vector<8x384xf32> to vector<8x128xf32>
    %112 = arith.addf %110, %111 : vector<8x128xf32>
    %113 = arith.negf %112 : vector<8x128xf32>
    %114 = math.exp %113 : vector<8x128xf32>
    %cst_42 = arith.constant 1.000000e+00 : f32
    %115 = vector.broadcast %cst_42 : f32 to vector<8x128xf32>
    %116 = arith.addf %115, %114 : vector<8x128xf32>
    %117 = arith.divf %115, %116 : vector<8x128xf32>
    %118 = vector.extract_strided_slice %106 {offsets = [0, 128], sizes = [8, 128], strides = [1, 1]} : vector<8x384xf32> to vector<8x128xf32>
    %119 = vector.extract_strided_slice %109 {offsets = [0, 128], sizes = [8, 128], strides = [1, 1]} : vector<8x384xf32> to vector<8x128xf32>
    %120 = arith.addf %118, %119 : vector<8x128xf32>
    %121 = arith.negf %120 : vector<8x128xf32>
    %122 = math.exp %121 : vector<8x128xf32>
    %cst_43 = arith.constant 1.000000e+00 : f32
    %123 = vector.broadcast %cst_43 : f32 to vector<8x128xf32>
    %124 = arith.addf %123, %122 : vector<8x128xf32>
    %125 = arith.divf %123, %124 : vector<8x128xf32>
    %126 = vector.extract_strided_slice %106 {offsets = [0, 256], sizes = [8, 128], strides = [1, 1]} : vector<8x384xf32> to vector<8x128xf32>
    %127 = vector.extract_strided_slice %109 {offsets = [0, 256], sizes = [8, 128], strides = [1, 1]} : vector<8x384xf32> to vector<8x128xf32>
    %128 = arith.mulf %117, %127 : vector<8x128xf32>
    %129 = arith.addf %126, %128 : vector<8x128xf32>
    %130 = math.tanh %129 : vector<8x128xf32>
    %cst_44 = arith.constant 1.000000e+00 : f32
    %131 = vector.broadcast %cst_44 : f32 to vector<8x128xf32>
    %132 = arith.subf %131, %125 : vector<8x128xf32>
    %133 = arith.mulf %132, %130 : vector<8x128xf32>
    %134 = arith.mulf %125, %94 : vector<8x128xf32>
    %135 = arith.addf %133, %134 : vector<8x128xf32>
    %c0_45 = arith.constant 0 : index
    %136 = arith.index_cast %104 : i32 to index
    %c0_46 = arith.constant 0 : index
    %137 = vector.load %arg8[%c0_45, %136, %c0_46] : memref<1x64x128xf32, #tpu.memory_space<vmem>>, vector<1x8x128xf32>
    %138 = vector.shape_cast %137 : vector<1x8x128xf32> to vector<8x128xf32>
    %139 = vector.shape_cast %135 : vector<8x128xf32> to vector<1x8x128xf32>
    tpu.vector_store %arg8[%c0_45, %136, %c0_46], %139 {strides = array<i32>} : memref<1x64x128xf32, #tpu.memory_space<vmem>>, vector<1x8x128xf32>,
    %c3_i32 = arith.constant 3 : i32
    %c2_i32_47 = arith.constant 2 : i32
    %140 = arith.muli %c2_i32_47, %c3_i32 : i32
    %c7_i32_48 = arith.constant 7 : i32
    %141 = arith.subi %c7_i32_48, %140 : i32
    %142 = arith.muli %arg0, %141 : i32
    %143 = arith.addi %c3_i32, %142 : i32
    %c8_i32_49 = arith.constant 8 : i32
    %144 = arith.muli %143, %c8_i32_49 : i32
    %145 = tpu.assume_multiple %144, 8 : i32
    %146 = arith.index_cast %145 : i32 to index
    %c0_50 = arith.constant 0 : index
    %147 = vector.load %arg10[%146, %c0_50] : memref<64x384xf32, #tpu.memory_space<vmem>>, vector<8x384xf32>
    %cst_51 = arith.constant dense<0.000000e+00> : vector<8x384xf32>
    %148 = tpu.matmul %135, %13, %cst_51 {dimension_numbers = #tpu.dot_dimension_numbers<[1], [0], [0], [1], [0, 0, 1, 1], [], []>} : vector<8x128xf32>, vector<128x384xf32>, vector<8x384xf32> -> vector<8x384xf32>
    %149 = vector.broadcast %15 : vector<1x384xf32> to vector<8x384xf32>
    %150 = arith.addf %148, %149 : vector<8x384xf32>
    %151 = vector.extract_strided_slice %147 {offsets = [0, 0], sizes = [8, 128], strides = [1, 1]} : vector<8x384xf32> to vector<8x128xf32>
    %152 = vector.extract_strided_slice %150 {offsets = [0, 0], sizes = [8, 128], strides = [1, 1]} : vector<8x384xf32> to vector<8x128xf32>
    %153 = arith.addf %151, %152 : vector<8x128xf32>
    %154 = arith.negf %153 : vector<8x128xf32>
    %155 = math.exp %154 : vector<8x128xf32>
    %cst_52 = arith.constant 1.000000e+00 : f32
    %156 = vector.broadcast %cst_52 : f32 to vector<8x128xf32>
    %157 = arith.addf %156, %155 : vector<8x128xf32>
    %158 = arith.divf %156, %157 : vector<8x128xf32>
    %159 = vector.extract_strided_slice %147 {offsets = [0, 128], sizes = [8, 128], strides = [1, 1]} : vector<8x384xf32> to vector<8x128xf32>
    %160 = vector.extract_strided_slice %150 {offsets = [0, 128], sizes = [8, 128], strides = [1, 1]} : vector<8x384xf32> to vector<8x128xf32>
    %161 = arith.addf %159, %160 : vector<8x128xf32>
    %162 = arith.negf %161 : vector<8x128xf32>
    %163 = math.exp %162 : vector<8x128xf32>
    %cst_53 = arith.constant 1.000000e+00 : f32
    %164 = vector.broadcast %cst_53 : f32 to vector<8x128xf32>
    %165 = arith.addf %164, %163 : vector<8x128xf32>
    %166 = arith.divf %164, %165 : vector<8x128xf32>
    %167 = vector.extract_strided_slice %147 {offsets = [0, 256], sizes = [8, 128], strides = [1, 1]} : vector<8x384xf32> to vector<8x128xf32>
    %168 = vector.extract_strided_slice %150 {offsets = [0, 256], sizes = [8, 128], strides = [1, 1]} : vector<8x384xf32> to vector<8x128xf32>
    %169 = arith.mulf %158, %168 : vector<8x128xf32>
    %170 = arith.addf %167, %169 : vector<8x128xf32>
    %171 = math.tanh %170 : vector<8x128xf32>
    %cst_54 = arith.constant 1.000000e+00 : f32
    %172 = vector.broadcast %cst_54 : f32 to vector<8x128xf32>
    %173 = arith.subf %172, %166 : vector<8x128xf32>
    %174 = arith.mulf %173, %171 : vector<8x128xf32>
    %175 = arith.mulf %166, %135 : vector<8x128xf32>
    %176 = arith.addf %174, %175 : vector<8x128xf32>
    %c0_55 = arith.constant 0 : index
    %177 = arith.index_cast %145 : i32 to index
    %c0_56 = arith.constant 0 : index
    %178 = vector.load %arg8[%c0_55, %177, %c0_56] : memref<1x64x128xf32, #tpu.memory_space<vmem>>, vector<1x8x128xf32>
    %179 = vector.shape_cast %178 : vector<1x8x128xf32> to vector<8x128xf32>
    %180 = vector.shape_cast %176 : vector<8x128xf32> to vector<1x8x128xf32>
    tpu.vector_store %arg8[%c0_55, %177, %c0_56], %180 {strides = array<i32>} : memref<1x64x128xf32, #tpu.memory_space<vmem>>, vector<1x8x128xf32>,
    %c4_i32 = arith.constant 4 : i32
    %c2_i32_57 = arith.constant 2 : i32
    %181 = arith.muli %c2_i32_57, %c4_i32 : i32
    %c7_i32_58 = arith.constant 7 : i32
    %182 = arith.subi %c7_i32_58, %181 : i32
    %183 = arith.muli %arg0, %182 : i32
    %184 = arith.addi %c4_i32, %183 : i32
    %c8_i32_59 = arith.constant 8 : i32
    %185 = arith.muli %184, %c8_i32_59 : i32
    %186 = tpu.assume_multiple %185, 8 : i32
    %187 = arith.index_cast %186 : i32 to index
    %c0_60 = arith.constant 0 : index
    %188 = vector.load %arg10[%187, %c0_60] : memref<64x384xf32, #tpu.memory_space<vmem>>, vector<8x384xf32>
    %cst_61 = arith.constant dense<0.000000e+00> : vector<8x384xf32>
    %189 = tpu.matmul %176, %13, %cst_61 {dimension_numbers = #tpu.dot_dimension_numbers<[1], [0], [0], [1], [0, 0, 1, 1], [], []>} : vector<8x128xf32>, vector<128x384xf32>, vector<8x384xf32> -> vector<8x384xf32>
    %190 = vector.broadcast %15 : vector<1x384xf32> to vector<8x384xf32>
    %191 = arith.addf %189, %190 : vector<8x384xf32>
    %192 = vector.extract_strided_slice %188 {offsets = [0, 0], sizes = [8, 128], strides = [1, 1]} : vector<8x384xf32> to vector<8x128xf32>
    %193 = vector.extract_strided_slice %191 {offsets = [0, 0], sizes = [8, 128], strides = [1, 1]} : vector<8x384xf32> to vector<8x128xf32>
    %194 = arith.addf %192, %193 : vector<8x128xf32>
    %195 = arith.negf %194 : vector<8x128xf32>
    %196 = math.exp %195 : vector<8x128xf32>
    %cst_62 = arith.constant 1.000000e+00 : f32
    %197 = vector.broadcast %cst_62 : f32 to vector<8x128xf32>
    %198 = arith.addf %197, %196 : vector<8x128xf32>
    %199 = arith.divf %197, %198 : vector<8x128xf32>
    %200 = vector.extract_strided_slice %188 {offsets = [0, 128], sizes = [8, 128], strides = [1, 1]} : vector<8x384xf32> to vector<8x128xf32>
    %201 = vector.extract_strided_slice %191 {offsets = [0, 128], sizes = [8, 128], strides = [1, 1]} : vector<8x384xf32> to vector<8x128xf32>
    %202 = arith.addf %200, %201 : vector<8x128xf32>
    %203 = arith.negf %202 : vector<8x128xf32>
    %204 = math.exp %203 : vector<8x128xf32>
    %cst_63 = arith.constant 1.000000e+00 : f32
    %205 = vector.broadcast %cst_63 : f32 to vector<8x128xf32>
    %206 = arith.addf %205, %204 : vector<8x128xf32>
    %207 = arith.divf %205, %206 : vector<8x128xf32>
    %208 = vector.extract_strided_slice %188 {offsets = [0, 256], sizes = [8, 128], strides = [1, 1]} : vector<8x384xf32> to vector<8x128xf32>
    %209 = vector.extract_strided_slice %191 {offsets = [0, 256], sizes = [8, 128], strides = [1, 1]} : vector<8x384xf32> to vector<8x128xf32>
    %210 = arith.mulf %199, %209 : vector<8x128xf32>
    %211 = arith.addf %208, %210 : vector<8x128xf32>
    %212 = math.tanh %211 : vector<8x128xf32>
    %cst_64 = arith.constant 1.000000e+00 : f32
    %213 = vector.broadcast %cst_64 : f32 to vector<8x128xf32>
    %214 = arith.subf %213, %207 : vector<8x128xf32>
    %215 = arith.mulf %214, %212 : vector<8x128xf32>
    %216 = arith.mulf %207, %176 : vector<8x128xf32>
    %217 = arith.addf %215, %216 : vector<8x128xf32>
    %c0_65 = arith.constant 0 : index
    %218 = arith.index_cast %186 : i32 to index
    %c0_66 = arith.constant 0 : index
    %219 = vector.load %arg8[%c0_65, %218, %c0_66] : memref<1x64x128xf32, #tpu.memory_space<vmem>>, vector<1x8x128xf32>
    %220 = vector.shape_cast %219 : vector<1x8x128xf32> to vector<8x128xf32>
    %221 = vector.shape_cast %217 : vector<8x128xf32> to vector<1x8x128xf32>
    tpu.vector_store %arg8[%c0_65, %218, %c0_66], %221 {strides = array<i32>} : memref<1x64x128xf32, #tpu.memory_space<vmem>>, vector<1x8x128xf32>,
    %c5_i32 = arith.constant 5 : i32
    %c2_i32_67 = arith.constant 2 : i32
    %222 = arith.muli %c2_i32_67, %c5_i32 : i32
    %c7_i32_68 = arith.constant 7 : i32
    %223 = arith.subi %c7_i32_68, %222 : i32
    %224 = arith.muli %arg0, %223 : i32
    %225 = arith.addi %c5_i32, %224 : i32
    %c8_i32_69 = arith.constant 8 : i32
    %226 = arith.muli %225, %c8_i32_69 : i32
    %227 = tpu.assume_multiple %226, 8 : i32
    %228 = arith.index_cast %227 : i32 to index
    %c0_70 = arith.constant 0 : index
    %229 = vector.load %arg10[%228, %c0_70] : memref<64x384xf32, #tpu.memory_space<vmem>>, vector<8x384xf32>
    %cst_71 = arith.constant dense<0.000000e+00> : vector<8x384xf32>
    %230 = tpu.matmul %217, %13, %cst_71 {dimension_numbers = #tpu.dot_dimension_numbers<[1], [0], [0], [1], [0, 0, 1, 1], [], []>} : vector<8x128xf32>, vector<128x384xf32>, vector<8x384xf32> -> vector<8x384xf32>
    %231 = vector.broadcast %15 : vector<1x384xf32> to vector<8x384xf32>
    %232 = arith.addf %230, %231 : vector<8x384xf32>
    %233 = vector.extract_strided_slice %229 {offsets = [0, 0], sizes = [8, 128], strides = [1, 1]} : vector<8x384xf32> to vector<8x128xf32>
    %234 = vector.extract_strided_slice %232 {offsets = [0, 0], sizes = [8, 128], strides = [1, 1]} : vector<8x384xf32> to vector<8x128xf32>
    %235 = arith.addf %233, %234 : vector<8x128xf32>
    %236 = arith.negf %235 : vector<8x128xf32>
    %237 = math.exp %236 : vector<8x128xf32>
    %cst_72 = arith.constant 1.000000e+00 : f32
    %238 = vector.broadcast %cst_72 : f32 to vector<8x128xf32>
    %239 = arith.addf %238, %237 : vector<8x128xf32>
    %240 = arith.divf %238, %239 : vector<8x128xf32>
    %241 = vector.extract_strided_slice %229 {offsets = [0, 128], sizes = [8, 128], strides = [1, 1]} : vector<8x384xf32> to vector<8x128xf32>
    %242 = vector.extract_strided_slice %232 {offsets = [0, 128], sizes = [8, 128], strides = [1, 1]} : vector<8x384xf32> to vector<8x128xf32>
    %243 = arith.addf %241, %242 : vector<8x128xf32>
    %244 = arith.negf %243 : vector<8x128xf32>
    %245 = math.exp %244 : vector<8x128xf32>
    %cst_73 = arith.constant 1.000000e+00 : f32
    %246 = vector.broadcast %cst_73 : f32 to vector<8x128xf32>
    %247 = arith.addf %246, %245 : vector<8x128xf32>
    %248 = arith.divf %246, %247 : vector<8x128xf32>
    %249 = vector.extract_strided_slice %229 {offsets = [0, 256], sizes = [8, 128], strides = [1, 1]} : vector<8x384xf32> to vector<8x128xf32>
    %250 = vector.extract_strided_slice %232 {offsets = [0, 256], sizes = [8, 128], strides = [1, 1]} : vector<8x384xf32> to vector<8x128xf32>
    %251 = arith.mulf %240, %250 : vector<8x128xf32>
    %252 = arith.addf %249, %251 : vector<8x128xf32>
    %253 = math.tanh %252 : vector<8x128xf32>
    %cst_74 = arith.constant 1.000000e+00 : f32
    %254 = vector.broadcast %cst_74 : f32 to vector<8x128xf32>
    %255 = arith.subf %254, %248 : vector<8x128xf32>
    %256 = arith.mulf %255, %253 : vector<8x128xf32>
    %257 = arith.mulf %248, %217 : vector<8x128xf32>
    %258 = arith.addf %256, %257 : vector<8x128xf32>
    %c0_75 = arith.constant 0 : index
    %259 = arith.index_cast %227 : i32 to index
    %c0_76 = arith.constant 0 : index
    %260 = vector.load %arg8[%c0_75, %259, %c0_76] : memref<1x64x128xf32, #tpu.memory_space<vmem>>, vector<1x8x128xf32>
    %261 = vector.shape_cast %260 : vector<1x8x128xf32> to vector<8x128xf32>
    %262 = vector.shape_cast %258 : vector<8x128xf32> to vector<1x8x128xf32>
    tpu.vector_store %arg8[%c0_75, %259, %c0_76], %262 {strides = array<i32>} : memref<1x64x128xf32, #tpu.memory_space<vmem>>, vector<1x8x128xf32>,
    %c6_i32 = arith.constant 6 : i32
    %c2_i32_77 = arith.constant 2 : i32
    %263 = arith.muli %c2_i32_77, %c6_i32 : i32
    %c7_i32_78 = arith.constant 7 : i32
    %264 = arith.subi %c7_i32_78, %263 : i32
    %265 = arith.muli %arg0, %264 : i32
    %266 = arith.addi %c6_i32, %265 : i32
    %c8_i32_79 = arith.constant 8 : i32
    %267 = arith.muli %266, %c8_i32_79 : i32
    %268 = tpu.assume_multiple %267, 8 : i32
    %269 = arith.index_cast %268 : i32 to index
    %c0_80 = arith.constant 0 : index
    %270 = vector.load %arg10[%269, %c0_80] : memref<64x384xf32, #tpu.memory_space<vmem>>, vector<8x384xf32>
    %cst_81 = arith.constant dense<0.000000e+00> : vector<8x384xf32>
    %271 = tpu.matmul %258, %13, %cst_81 {dimension_numbers = #tpu.dot_dimension_numbers<[1], [0], [0], [1], [0, 0, 1, 1], [], []>} : vector<8x128xf32>, vector<128x384xf32>, vector<8x384xf32> -> vector<8x384xf32>
    %272 = vector.broadcast %15 : vector<1x384xf32> to vector<8x384xf32>
    %273 = arith.addf %271, %272 : vector<8x384xf32>
    %274 = vector.extract_strided_slice %270 {offsets = [0, 0], sizes = [8, 128], strides = [1, 1]} : vector<8x384xf32> to vector<8x128xf32>
    %275 = vector.extract_strided_slice %273 {offsets = [0, 0], sizes = [8, 128], strides = [1, 1]} : vector<8x384xf32> to vector<8x128xf32>
    %276 = arith.addf %274, %275 : vector<8x128xf32>
    %277 = arith.negf %276 : vector<8x128xf32>
    %278 = math.exp %277 : vector<8x128xf32>
    %cst_82 = arith.constant 1.000000e+00 : f32
    %279 = vector.broadcast %cst_82 : f32 to vector<8x128xf32>
    %280 = arith.addf %279, %278 : vector<8x128xf32>
    %281 = arith.divf %279, %280 : vector<8x128xf32>
    %282 = vector.extract_strided_slice %270 {offsets = [0, 128], sizes = [8, 128], strides = [1, 1]} : vector<8x384xf32> to vector<8x128xf32>
    %283 = vector.extract_strided_slice %273 {offsets = [0, 128], sizes = [8, 128], strides = [1, 1]} : vector<8x384xf32> to vector<8x128xf32>
    %284 = arith.addf %282, %283 : vector<8x128xf32>
    %285 = arith.negf %284 : vector<8x128xf32>
    %286 = math.exp %285 : vector<8x128xf32>
    %cst_83 = arith.constant 1.000000e+00 : f32
    %287 = vector.broadcast %cst_83 : f32 to vector<8x128xf32>
    %288 = arith.addf %287, %286 : vector<8x128xf32>
    %289 = arith.divf %287, %288 : vector<8x128xf32>
    %290 = vector.extract_strided_slice %270 {offsets = [0, 256], sizes = [8, 128], strides = [1, 1]} : vector<8x384xf32> to vector<8x128xf32>
    %291 = vector.extract_strided_slice %273 {offsets = [0, 256], sizes = [8, 128], strides = [1, 1]} : vector<8x384xf32> to vector<8x128xf32>
    %292 = arith.mulf %281, %291 : vector<8x128xf32>
    %293 = arith.addf %290, %292 : vector<8x128xf32>
    %294 = math.tanh %293 : vector<8x128xf32>
    %cst_84 = arith.constant 1.000000e+00 : f32
    %295 = vector.broadcast %cst_84 : f32 to vector<8x128xf32>
    %296 = arith.subf %295, %289 : vector<8x128xf32>
    %297 = arith.mulf %296, %294 : vector<8x128xf32>
    %298 = arith.mulf %289, %258 : vector<8x128xf32>
    %299 = arith.addf %297, %298 : vector<8x128xf32>
    %c0_85 = arith.constant 0 : index
    %300 = arith.index_cast %268 : i32 to index
    %c0_86 = arith.constant 0 : index
    %301 = vector.load %arg8[%c0_85, %300, %c0_86] : memref<1x64x128xf32, #tpu.memory_space<vmem>>, vector<1x8x128xf32>
    %302 = vector.shape_cast %301 : vector<1x8x128xf32> to vector<8x128xf32>
    %303 = vector.shape_cast %299 : vector<8x128xf32> to vector<1x8x128xf32>
    tpu.vector_store %arg8[%c0_85, %300, %c0_86], %303 {strides = array<i32>} : memref<1x64x128xf32, #tpu.memory_space<vmem>>, vector<1x8x128xf32>,
    %c7_i32_87 = arith.constant 7 : i32
    %c2_i32_88 = arith.constant 2 : i32
    %304 = arith.muli %c2_i32_88, %c7_i32_87 : i32
    %c7_i32_89 = arith.constant 7 : i32
    %305 = arith.subi %c7_i32_89, %304 : i32
    %306 = arith.muli %arg0, %305 : i32
    %307 = arith.addi %c7_i32_87, %306 : i32
    %c8_i32_90 = arith.constant 8 : i32
    %308 = arith.muli %307, %c8_i32_90 : i32
    %309 = tpu.assume_multiple %308, 8 : i32
    %310 = arith.index_cast %309 : i32 to index
    %c0_91 = arith.constant 0 : index
    %311 = vector.load %arg10[%310, %c0_91] : memref<64x384xf32, #tpu.memory_space<vmem>>, vector<8x384xf32>
    %cst_92 = arith.constant dense<0.000000e+00> : vector<8x384xf32>
    %312 = tpu.matmul %299, %13, %cst_92 {dimension_numbers = #tpu.dot_dimension_numbers<[1], [0], [0], [1], [0, 0, 1, 1], [], []>} : vector<8x128xf32>, vector<128x384xf32>, vector<8x384xf32> -> vector<8x384xf32>
    %313 = vector.broadcast %15 : vector<1x384xf32> to vector<8x384xf32>
    %314 = arith.addf %312, %313 : vector<8x384xf32>
    %315 = vector.extract_strided_slice %311 {offsets = [0, 0], sizes = [8, 128], strides = [1, 1]} : vector<8x384xf32> to vector<8x128xf32>
    %316 = vector.extract_strided_slice %314 {offsets = [0, 0], sizes = [8, 128], strides = [1, 1]} : vector<8x384xf32> to vector<8x128xf32>
    %317 = arith.addf %315, %316 : vector<8x128xf32>
    %318 = arith.negf %317 : vector<8x128xf32>
    %319 = math.exp %318 : vector<8x128xf32>
    %cst_93 = arith.constant 1.000000e+00 : f32
    %320 = vector.broadcast %cst_93 : f32 to vector<8x128xf32>
    %321 = arith.addf %320, %319 : vector<8x128xf32>
    %322 = arith.divf %320, %321 : vector<8x128xf32>
    %323 = vector.extract_strided_slice %311 {offsets = [0, 128], sizes = [8, 128], strides = [1, 1]} : vector<8x384xf32> to vector<8x128xf32>
    %324 = vector.extract_strided_slice %314 {offsets = [0, 128], sizes = [8, 128], strides = [1, 1]} : vector<8x384xf32> to vector<8x128xf32>
    %325 = arith.addf %323, %324 : vector<8x128xf32>
    %326 = arith.negf %325 : vector<8x128xf32>
    %327 = math.exp %326 : vector<8x128xf32>
    %cst_94 = arith.constant 1.000000e+00 : f32
    %328 = vector.broadcast %cst_94 : f32 to vector<8x128xf32>
    %329 = arith.addf %328, %327 : vector<8x128xf32>
    %330 = arith.divf %328, %329 : vector<8x128xf32>
    %331 = vector.extract_strided_slice %311 {offsets = [0, 256], sizes = [8, 128], strides = [1, 1]} : vector<8x384xf32> to vector<8x128xf32>
    %332 = vector.extract_strided_slice %314 {offsets = [0, 256], sizes = [8, 128], strides = [1, 1]} : vector<8x384xf32> to vector<8x128xf32>
    %333 = arith.mulf %322, %332 : vector<8x128xf32>
    %334 = arith.addf %331, %333 : vector<8x128xf32>
    %335 = math.tanh %334 : vector<8x128xf32>
    %cst_95 = arith.constant 1.000000e+00 : f32
    %336 = vector.broadcast %cst_95 : f32 to vector<8x128xf32>
    %337 = arith.subf %336, %330 : vector<8x128xf32>
    %338 = arith.mulf %337, %335 : vector<8x128xf32>
    %339 = arith.mulf %330, %299 : vector<8x128xf32>
    %340 = arith.addf %338, %339 : vector<8x128xf32>
    %c0_96 = arith.constant 0 : index
    %341 = arith.index_cast %309 : i32 to index
    %c0_97 = arith.constant 0 : index
    %342 = vector.load %arg8[%c0_96, %341, %c0_97] : memref<1x64x128xf32, #tpu.memory_space<vmem>>, vector<1x8x128xf32>
    %343 = vector.shape_cast %342 : vector<1x8x128xf32> to vector<8x128xf32>
    %344 = vector.shape_cast %340 : vector<8x128xf32> to vector<1x8x128xf32>
    tpu.vector_store %arg8[%c0_96, %341, %c0_97], %344 {strides = array<i32>} : memref<1x64x128xf32, #tpu.memory_space<vmem>>, vector<1x8x128xf32>,
    %c8_i32_98 = arith.constant 8 : i32
    %c0_99 = arith.constant 0 : index
    %c0_100 = arith.constant 0 : index
    %345 = vector.load %arg11[%c0_99, %c0_100] : memref<8x128xf32, #tpu.memory_space<vmem>>, vector<8x128xf32>
    tpu.vector_store %arg11[%c0_99, %c0_100], %340 {strides = array<i32>} : memref<8x128xf32, #tpu.memory_space<vmem>>, vector<8x128xf32>,
    %c0_101 = arith.constant 0 : index
    %c0_102 = arith.constant 0 : index
    %c0_103 = arith.constant 0 : index
    %346 = vector.load %arg9[%c0_101, %c0_102, %c0_103] : memref<1x8x128xf32, #tpu.memory_space<vmem>>, vector<1x8x128xf32>
    %347 = vector.shape_cast %346 : vector<1x8x128xf32> to vector<8x128xf32>
    %348 = vector.shape_cast %340 : vector<8x128xf32> to vector<1x8x128xf32>
    tpu.vector_store %arg9[%c0_101, %c0_102, %c0_103], %348 {strides = array<i32>} : memref<1x8x128xf32, #tpu.memory_space<vmem>>, vector<1x8x128xf32>,
    return
  }
  func.func @transform_0(%arg0: i32, %arg1: i32) -> (i32, i32) {
    %c2_i32 = arith.constant 2 : i32
    %0 = arith.muli %c2_i32, %arg1 : i32
    %c0_i32 = arith.constant 0 : i32
    %1 = arith.subi %c0_i32, %0 : i32
    %2 = arith.muli %arg0, %1 : i32
    %3 = arith.addi %arg1, %2 : i32
    %c0_i32_0 = arith.constant 0 : i32
    %c0_i32_1 = arith.constant 0 : i32
    return %3, %c0_i32_0 : i32, i32
  }
  func.func @transform_1(%arg0: i32, %arg1: i32) -> (i32, i32, i32) {
    %c0_i32 = arith.constant 0 : i32
    %c0_i32_0 = arith.constant 0 : i32
    %c0_i32_1 = arith.constant 0 : i32
    return %arg0, %c0_i32, %c0_i32_0 : i32, i32, i32
  }
  func.func @transform_2(%arg0: i32, %arg1: i32) -> (i32, i32, i32) {
    %c0_i32 = arith.constant 0 : i32
    %c0_i32_0 = arith.constant 0 : i32
    %c0_i32_1 = arith.constant 0 : i32
    return %arg0, %c0_i32, %c0_i32_0 : i32, i32, i32
  }
  func.func @transform_3(%arg0: i32, %arg1: i32) -> (i32, i32, i32) {
    %c0_i32 = arith.constant 0 : i32
    %c0_i32_0 = arith.constant 0 : i32
    %c0_i32_1 = arith.constant 0 : i32
    return %arg0, %c0_i32, %c0_i32_0 : i32, i32, i32
  }
  func.func @transform_4(%arg0: i32, %arg1: i32) -> (i32, i32, i32) {
    %c0_i32 = arith.constant 0 : i32
    %c0_i32_0 = arith.constant 0 : i32
    %c0_i32_1 = arith.constant 0 : i32
    return %arg0, %c0_i32, %c0_i32_0 : i32, i32, i32
  }
  func.func @transform_5(%arg0: i32, %arg1: i32) -> (i32, i32, i32) {
    %c0_i32 = arith.constant 0 : i32
    %c0_i32_0 = arith.constant 0 : i32
    %c0_i32_1 = arith.constant 0 : i32
    return %arg0, %c0_i32, %c0_i32_0 : i32, i32, i32
  }
  func.func @transform_6(%arg0: i32, %arg1: i32) -> (i32, i32, i32) {
    %c2_i32 = arith.constant 2 : i32
    %0 = arith.muli %c2_i32, %arg1 : i32
    %c0_i32 = arith.constant 0 : i32
    %1 = arith.subi %c0_i32, %0 : i32
    %2 = arith.muli %arg0, %1 : i32
    %3 = arith.addi %arg1, %2 : i32
    %c0_i32_0 = arith.constant 0 : i32
    %c0_i32_1 = arith.constant 0 : i32
    return %arg0, %3, %c0_i32_0 : i32, i32, i32
  }
  func.func @transform_7(%arg0: i32, %arg1: i32) -> (i32, i32, i32) {
    %c0_i32 = arith.constant 0 : i32
    %c0_i32_0 = arith.constant 0 : i32
    %c0_i32_1 = arith.constant 0 : i32
    return %arg0, %c0_i32, %c0_i32_0 : i32, i32, i32
  }
}

module attributes {stable_mosaic.version = 11 : i64} {
  func.func @attn_kernel(%arg0: i32, %arg1: memref<4x16x128xf32, #tpu.memory_space<vmem>>, %arg2: memref<4x8x128xf32, #tpu.memory_space<vmem>>, %arg3: memref<128x128xf32, #tpu.memory_space<vmem>>, %arg4: memref<128x128xf32, #tpu.memory_space<vmem>>, %arg5: memref<1x128xf32, #tpu.memory_space<vmem>>, %arg6: memref<128x128xf32, #tpu.memory_space<vmem>>, %arg7: memref<1x128xf32, #tpu.memory_space<vmem>>, %arg8: memref<4x8x128xf32, #tpu.memory_space<vmem>>) attributes {dimension_semantics = [#tpu.dimension_semantics<parallel>], iteration_bounds = array<i64: 2>, scalar_prefetch = 0 : i64, scratch_operands = 0 : i64, tpu.core_type = #tpu.core_type<tc>, window_params = [{transform_indices = @transform_0, window_bounds = array<i64: 4, 16, 128>}, {transform_indices = @transform_1, window_bounds = array<i64: 4, 8, 128>}, {pipeline_mode = #tpu.pipeline_mode<synchronous>, transform_indices = @transform_2, window_bounds = array<i64: 128, 128>}, {pipeline_mode = #tpu.pipeline_mode<synchronous>, transform_indices = @transform_3, window_bounds = array<i64: 128, 128>}, {pipeline_mode = #tpu.pipeline_mode<synchronous>, transform_indices = @transform_4, window_bounds = array<i64: 1, 128>}, {pipeline_mode = #tpu.pipeline_mode<synchronous>, transform_indices = @transform_5, window_bounds = array<i64: 128, 128>}, {pipeline_mode = #tpu.pipeline_mode<synchronous>, transform_indices = @transform_6, window_bounds = array<i64: 1, 128>}, {transform_indices = @transform_7, window_bounds = array<i64: 4, 8, 128>}]} {
    %c0 = arith.constant 0 : index
    %c0_0 = arith.constant 0 : index
    %c0_1 = arith.constant 0 : index
    %0 = vector.load %arg1[%c0, %c0_0, %c0_1] : memref<4x16x128xf32, #tpu.memory_space<vmem>>, vector<4x16x128xf32>
    %c0_2 = arith.constant 0 : index
    %c0_3 = arith.constant 0 : index
    %c0_4 = arith.constant 0 : index
    %1 = vector.load %arg2[%c0_2, %c0_3, %c0_4] : memref<4x8x128xf32, #tpu.memory_space<vmem>>, vector<4x8x128xf32>
    %cst = arith.constant dense<0.000000e+00> : vector<4x8x16xf32>
    %2 = tpu.matmul %1, %0, %cst {dimension_numbers = #tpu.dot_dimension_numbers<[2], [2], [1], [1], [0, 0, 0, 1, 1, 1], [0], [0]>} : vector<4x8x128xf32>, vector<4x16x128xf32>, vector<4x8x16xf32> -> vector<4x8x16xf32>
    %cst_5 = arith.constant dense<0xFF800000> : vector<4x8xf32>
    %3 = vector.multi_reduction <maximumf>, %2, %cst_5 [2] : vector<4x8x16xf32> to vector<4x8xf32>
    %4 = vector.shape_cast %3 : vector<4x8xf32> to vector<4x8x1xf32>
    %5 = vector.broadcast %4 : vector<4x8x1xf32> to vector<4x8x16xf32>
    %6 = arith.subf %2, %5 : vector<4x8x16xf32>
    %7 = math.exp %6 : vector<4x8x16xf32>
    %cst_6 = arith.constant dense<0.000000e+00> : vector<4x8xf32>
    %8 = vector.multi_reduction <add>, %7, %cst_6 [2] : vector<4x8x16xf32> to vector<4x8xf32>
    %9 = vector.shape_cast %8 : vector<4x8xf32> to vector<4x8x1xf32>
    %10 = tpu.reciprocal %9 {approx = true} : vector<4x8x1xf32> -> vector<4x8x1xf32>
    %11 = vector.broadcast %10 : vector<4x8x1xf32> to vector<4x8x16xf32>
    %12 = arith.mulf %7, %11 : vector<4x8x16xf32>
    %cst_7 = arith.constant dense<0.000000e+00> : vector<4x8x128xf32>
    %13 = tpu.matmul %12, %0, %cst_7 {dimension_numbers = #tpu.dot_dimension_numbers<[2], [1], [1], [2], [0, 0, 0, 1, 1, 2], [0], [0]>} : vector<4x8x16xf32>, vector<4x16x128xf32>, vector<4x8x128xf32> -> vector<4x8x128xf32>
    %14 = vector.shape_cast %13 : vector<4x8x128xf32> to vector<32x128xf32>
    %15 = vector.shape_cast %1 : vector<4x8x128xf32> to vector<32x128xf32>
    %c0_8 = arith.constant 0 : index
    %c0_9 = arith.constant 0 : index
    %16 = vector.load %arg3[%c0_8, %c0_9] : memref<128x128xf32, #tpu.memory_space<vmem>>, vector<128x128xf32>
    %cst_10 = arith.constant dense<0.000000e+00> : vector<32x128xf32>
    %17 = tpu.matmul %14, %16, %cst_10 {dimension_numbers = #tpu.dot_dimension_numbers<[1], [0], [0], [1], [0, 0, 1, 1], [], []>} : vector<32x128xf32>, vector<128x128xf32>, vector<32x128xf32> -> vector<32x128xf32>
    %c0_11 = arith.constant 0 : index
    %c0_12 = arith.constant 0 : index
    %18 = vector.load %arg4[%c0_11, %c0_12] : memref<128x128xf32, #tpu.memory_space<vmem>>, vector<128x128xf32>
    %cst_13 = arith.constant dense<0.000000e+00> : vector<32x128xf32>
    %19 = tpu.matmul %15, %18, %cst_13 {dimension_numbers = #tpu.dot_dimension_numbers<[1], [0], [0], [1], [0, 0, 1, 1], [], []>} : vector<32x128xf32>, vector<128x128xf32>, vector<32x128xf32> -> vector<32x128xf32>
    %20 = arith.addf %17, %19 : vector<32x128xf32>
    %c0_14 = arith.constant 0 : index
    %c0_15 = arith.constant 0 : index
    %21 = vector.load %arg5[%c0_14, %c0_15] : memref<1x128xf32, #tpu.memory_space<vmem>>, vector<1x128xf32>
    %22 = vector.broadcast %21 : vector<1x128xf32> to vector<32x128xf32>
    %23 = arith.addf %20, %22 : vector<32x128xf32>
    %24 = math.tanh %23 : vector<32x128xf32>
    %c0_16 = arith.constant 0 : index
    %c0_17 = arith.constant 0 : index
    %25 = vector.load %arg6[%c0_16, %c0_17] : memref<128x128xf32, #tpu.memory_space<vmem>>, vector<128x128xf32>
    %cst_18 = arith.constant dense<0.000000e+00> : vector<32x128xf32>
    %26 = tpu.matmul %24, %25, %cst_18 {dimension_numbers = #tpu.dot_dimension_numbers<[1], [0], [0], [1], [0, 0, 1, 1], [], []>} : vector<32x128xf32>, vector<128x128xf32>, vector<32x128xf32> -> vector<32x128xf32>
    %c0_19 = arith.constant 0 : index
    %c0_20 = arith.constant 0 : index
    %27 = vector.load %arg7[%c0_19, %c0_20] : memref<1x128xf32, #tpu.memory_space<vmem>>, vector<1x128xf32>
    %28 = vector.broadcast %27 : vector<1x128xf32> to vector<32x128xf32>
    %29 = arith.addf %26, %28 : vector<32x128xf32>
    %30 = vector.shape_cast %29 : vector<32x128xf32> to vector<4x8x128xf32>
    %c0_21 = arith.constant 0 : index
    %c0_22 = arith.constant 0 : index
    %c0_23 = arith.constant 0 : index
    %31 = vector.load %arg8[%c0_21, %c0_22, %c0_23] : memref<4x8x128xf32, #tpu.memory_space<vmem>>, vector<4x8x128xf32>
    tpu.vector_store %arg8[%c0_21, %c0_22, %c0_23], %30 {strides = array<i32>} : memref<4x8x128xf32, #tpu.memory_space<vmem>>, vector<4x8x128xf32>,
    return
  }
  func.func @transform_0(%arg0: i32) -> (i32, i32, i32) {
    %c0_i32 = arith.constant 0 : i32
    %c0_i32_0 = arith.constant 0 : i32
    %c0_i32_1 = arith.constant 0 : i32
    return %arg0, %c0_i32, %c0_i32_0 : i32, i32, i32
  }
  func.func @transform_1(%arg0: i32) -> (i32, i32, i32) {
    %c0_i32 = arith.constant 0 : i32
    %c0_i32_0 = arith.constant 0 : i32
    %c0_i32_1 = arith.constant 0 : i32
    return %arg0, %c0_i32, %c0_i32_0 : i32, i32, i32
  }
  func.func @transform_2(%arg0: i32) -> (i32, i32) {
    %c0_i32 = arith.constant 0 : i32
    %c0_i32_0 = arith.constant 0 : i32
    %c0_i32_1 = arith.constant 0 : i32
    return %c0_i32, %c0_i32_0 : i32, i32
  }
  func.func @transform_3(%arg0: i32) -> (i32, i32) {
    %c0_i32 = arith.constant 0 : i32
    %c0_i32_0 = arith.constant 0 : i32
    %c0_i32_1 = arith.constant 0 : i32
    return %c0_i32, %c0_i32_0 : i32, i32
  }
  func.func @transform_4(%arg0: i32) -> (i32, i32) {
    %c0_i32 = arith.constant 0 : i32
    %c0_i32_0 = arith.constant 0 : i32
    %c0_i32_1 = arith.constant 0 : i32
    return %c0_i32, %c0_i32_0 : i32, i32
  }
  func.func @transform_5(%arg0: i32) -> (i32, i32) {
    %c0_i32 = arith.constant 0 : i32
    %c0_i32_0 = arith.constant 0 : i32
    %c0_i32_1 = arith.constant 0 : i32
    return %c0_i32, %c0_i32_0 : i32, i32
  }
  func.func @transform_6(%arg0: i32) -> (i32, i32) {
    %c0_i32 = arith.constant 0 : i32
    %c0_i32_0 = arith.constant 0 : i32
    %c0_i32_1 = arith.constant 0 : i32
    return %c0_i32, %c0_i32_0 : i32, i32
  }
  func.func @transform_7(%arg0: i32) -> (i32, i32, i32) {
    %c0_i32 = arith.constant 0 : i32
    %c0_i32_0 = arith.constant 0 : i32
    %c0_i32_1 = arith.constant 0 : i32
    return %arg0, %c0_i32, %c0_i32_0 : i32, i32, i32
  }
}

</mosaic_0001>

<bundles_post_ra>
// kernel: seq2seq_forward.5
= control target key start
LH: loop header
LB: loop body
LE: loop exit
PB: predicated region body
PF: predicated region fallthrough
CT: control target
= control target key end

     0   :  { %12 = vsyncpa [#allocation3], 0  ;;  %s2148_s0 = inlined_call_operand.vmem [shape: f32[8,16,128], index: 0, kind: input, shape index: {}]   ;;  %s2149_s1 = inlined_call_operand.vmem [shape: f32[8,8,128], index: 1, kind: input, shape index: {}]   ;;  %s2150_s2 = inlined_call_operand.vmem [shape: f32[128,128], index: 2, kind: input, shape index: {}]   ;;  %s2151_s3 = inlined_call_operand.vmem [shape: f32[128,128], index: 3, kind: input, shape index: {}]   ;;  %s2152_s4 = inlined_call_operand.vmem [shape: f32[1,128], index: 4, kind: input, shape index: {}]   ;;  %s2153_s5 = inlined_call_operand.vmem [shape: f32[128,128], index: 5, kind: input, shape index: {}]   ;;  %s2154_s6 = inlined_call_operand.vmem [shape: f32[1,128], index: 6, kind: input, shape index: {}]   ;;  %s2155_s7 = inlined_call_operand.hbm [shape: f32[8,8,128], index: 7, kind: output, shape index: {}]  }
   0x1   :  { %14 = vsyncpa [#allocation3 + $0x1], 0  ;;  %s1802_s24 = smov 0   ;;  %s1804_s25 = smov 0  }
   0x2   :  { %s1806_s26 = smov 0   ;;  %s1808_s27 = smov 0  }
   0x3 LB: > { %s1823_s28 = sadd.s32 4294967295, %s1755_s27   ;;  %s1351_s29 = sadd.s32 4294967294, %s1755_s27   ;;  %s1755_s27 = sphi %s1808_s27, %s2161_s27   ;;  %s1751_s26 = sphi %s1806_s26, %s2160_s26   ;;  %s1747_s25 = sphi %s1804_s25, %s2159_s25   ;;  %s1743_s24 = sphi %s1802_s24, %s2158_s24  }
   0x4   : > { %s1827_s30 = sadd.s32 1, %s1755_s27   ;;  %s184_s8 = sadd.s32 1, %s1751_s26 }
   0x5   : > { %s181_s9 = ssub.s32 %s1755_s27, %s1827_s30  ;;  %p194_p0 = scmp.ne.s32.totalorder %s1751_s26, %s1747_s25 }
   0x6   : > { %p182_p1 = scmp.eq.s32.totalorder %s181_s9, 0  ;;  %p195_p2 = scmp.eq.s32.totalorder %s1823_s28, 1 }
   0x7   : > { %p200_p3 = scmp.ne.s32.totalorder %s1747_s25, %s1743_s24  ;;  %p201_p4 = scmp.eq.s32.totalorder %s1351_s29, 1 }
   0x8   : > { %s1838_s10 = scalar_select %p182_p1, %s1751_s26, %s184_s8  }
   0x9   : > { %p1840_p5 = por %p195_p2, %p194_p0  ;;  %p1844_p6 = por %p201_p4, %p200_p3 }
   0xa   : > { %p1354_p7 = scmp.ge.s32.totalorder %s1755_s27, 1  ;;  %p253_p8 = scmp.lt.s32.totalorder %s1755_s27, 3 }
   0xc   : > { %p254_p9 = pnand %p1354_p7, %p253_p8 }
   0xd   : > { %s1356_s13 = sshll.u32 (!%p254_p9), %s1823_s28, 2  ;;  %s288_s22 = sand.u32 (!%p254_p9), 1, %s1747_s25  }
   0xe   : > { %257 = sbr.rel (%p254_p9) target bundleno = 1177 (0x499), region = 48  ;;  %p292_p10 = scmp.lt.s32.totalorder (!%p254_p9), %s1356_s13, 7 }
   0xf   : > { %s1355_s23 = sshll.u32 (!%p254_p9), %s288_s22, 5 }
  0x10   : > { %s290_s9 = scalar_lea.vmem (!%p254_p9), [#allocation2], %s1355_s23 }
  0x13   : > { %v1757_v0 = vmov 0.0   ;;  %vm1758_vm0 = vmmov 0   ;;  %s2163_s13 = smov (!%p292_p10, %s1356_s13), 7  ;;  %vm597_vm1 = vcmask 130048   ;;  %v965_v50 = vld [vmem:[%s2151_s3 + $0x78] sm:$0xff]  ;;  %v964_v57 = vld [vmem:[%s2151_s3 + $0x70] sm:$0xff] }
  0x14   : > { %1458 = vmatprep.subr.mxu1 %v1757_v0  ;;  %1462 = vmatprep.mubr.msk.f32.mxu1 %vm1758_vm0, %v1757_v0  ;;  %s1372_s14 = sshll.u32 %s2163_s13, 4  ;;  %s1360_s18 = sshll.u32 %s2163_s13, 3  ;;  %v949_v54 = vld [vmem:[%s2150_s2 + $0x78] sm:$0xff]  ;;  %v963_v58 = vld [vmem:[%s2151_s3 + $0x68] sm:$0xff]  ;;  %v962_v59 = vld [vmem:[%s2151_s3 + $0x60] sm:$0xff] }
  0x15   : > { %1486 = vmatprep.subr.mxu0 %v1757_v0  ;;  %1490 = vmatprep.mubr.msk.f32.mxu0 %vm1758_vm0, %v1757_v0  ;;  %s1860_s17 = scalar_lea.vmem %s2148_s0, %s1372_s14  ;;  %s1868_s21 = scalar_lea.vmem %s2149_s1, %s1360_s18  ;;  %v961_v61 = vld [vmem:[%s2151_s3 + $0x58] sm:$0xff]  ;;  %v948_v63 = vld [vmem:[%s2150_s2 + $0x70] sm:$0xff] }
  0x16   : > { %v306_v1 = vld [vmem:[%s1860_s17 + $0x8] sm:$0xff]  ;;  %v305_v2 = vld [vmem:[%s1860_s17] sm:$0xff]  ;;  %v308_v4 = vld [vmem:[%s1860_s17 + $0x18] sm:$0xff]  ;;  %s1277_s13 = sshll.u32 %s290_s9, 4  ;;  %s1373_s14 = sshll.u32 %s1823_s28, 9  ;;  %s2101_s13 = int_to_ptr.vmem [resolvable:$true] %s1277_s13 }
  0x17   : > { %1459 = vmatpush3.xpose.msra.mxu1 %v306_v1  ;;  %1487 = vmatpush3.msra.mxu0 %v306_v1  ;;  %v1873_v3 = vld [vmem:[%s1868_s21] sm:$0xff]  ;;  %v307_v5 = vld [vmem:[%s1860_s17 + $0x10] sm:$0xff]  ;;  %v1883_v6 = vld [vmem:[%s1868_s21 + $0x8] sm:$0xff]  ;;  %s2108_s18 = scalar_lea.sflag [#allocation3], %s288_s22  ;;  %s1695_s19 = scalar_lea.vmem %s2101_s13, 512 }
  0x18   : > { %1460 = vmatprep.subr.mxu1 %v1757_v0  ;;  %1488 = vmatprep.subr.mxu0 %v1757_v0  ;;  %v1887_v7 = vld [vmem:[%s1860_s17 + $0x28] sm:$0xff]  ;;  %v1895_v8 = vld [vmem:[%s1860_s17 + $0x20] sm:$0xff]  ;;  %v1899_v9 = vld [vmem:[%s1868_s21 + $0x10] sm:$0xff]  ;;  %p1696_p11 = scmp.ne.s32.totalorder %s2101_s13, %s1695_s19  ;;  %s1759_s28 = smov [#allocation2]  }
  0x19   : > { %1489 = vmatpush3.msra.mxu0 %v305_v2  ;;  %v1903_v10 = vld [vmem:[%s1860_s17 + $0x38] sm:$0xff]  ;;  %v1911_v11 = vld [vmem:[%s1860_s17 + $0x30] sm:$0xff]  ;;  %v947_v1 = vld [vmem:[%s2150_s2 + $0x68] sm:$0xff]  ;;  %s2106_s17 = scalar_lea.hbm %s2155_s7, %s1373_s14  ;;  %s1699_s20 = sshll.u32 %s1759_s28, 4  ;;  %s1700_s20 = int_to_ptr.vmem [resolvable:$false] %s1699_s20 }
  0x1a   : > { %1500 = vmatprep.subr.mxu0 %v1757_v0  ;;  %v1915_v12 = vld [vmem:[%s1868_s21 + $0x18] sm:$0xff]  ;;  %p1697_p12 = pnand %p1696_p11, %p1840_p5  ;;  %s1701_s21 = scalar_lea.vmem %s1700_s20, 1024 }
  0x1b   : > { %1461 = vmatpush3.xpose.msra.mxu1 %v305_v2  ;;  %v959_v2 = vld [vmem:[%s2151_s3 + $0x48] sm:$0xff]  ;;  %p1702_p0 = scmp.lt.s32.totalorder %s2101_s13, %s1700_s20  ;;  %p1703_p1 = scmp.lt.s32.totalorder %s1701_s21, %s1695_s19 }
  0x1c   : > { %1465 = vmatprep.subr.mxu1 %v1757_v0  ;;  %p1698_p13 = pneg %p1697_p12 }
  0x1d   : > { %p1704_p2 = por %p1703_p1, %p1702_p0 }
  0x1e   : > { %1463 = vmatmul.mubr.f32.vlgmr.msra.gmra.mxu1 %v1873_v3 }
  0x1f   : > { %1466 = vmatpush3.xpose.msra.mxu1 %v308_v4  ;;  %1469 = vmatprep.mubr.msk.f32.mxu1 %vm1758_vm0, %v1757_v0  ;;  %p1705_p3 = pnand %p1704_p2, %p1698_p13 }
  0x20   : > { %1467 = vmatprep.subr.mxu1 %v1757_v0 }
  0x23   : > { %1468 = vmatpush3.xpose.msra.mxu1 %v307_v5 }
  0x24   : > { %1472 = vmatprep.subr.mxu1 %v1757_v0 }
  0x26   : > { %1470 = vmatmul.mubr.f32.vlgmr.msra.gmra.mxu1 %v1883_v6 }
  0x27   : > { %1473 = vmatpush3.xpose.msra.mxu1 %v1887_v7  ;;  %1476 = vmatprep.mubr.msk.f32.mxu1 %vm1758_vm0, %v1757_v0 }
  0x28   : > { %1474 = vmatprep.subr.mxu1 %v1757_v0 }
  0x2b   : > { %1475 = vmatpush3.xpose.msra.mxu1 %v1895_v8 }
  0x2c   : > { %1479 = vmatprep.subr.mxu1 %v1757_v0 }
  0x2e   : > { %1477 = vmatmul.mubr.f32.vlgmr.msra.gmra.mxu1 %v1899_v9 }
  0x2f   : > { %1480 = vmatpush3.xpose.msra.mxu1 %v1903_v10  ;;  %1483 = vmatprep.mubr.msk.f32.mxu1 %vm1758_vm0, %v1757_v0 }
  0x30   : > { %1481 = vmatprep.subr.mxu1 %v1757_v0 }
  0x33   : > { %1482 = vmatpush3.xpose.msra.mxu1 %v1911_v11 }
  0x34   : > { %1493 = vmatprep.subr.mxu1 %v1757_v0 }
  0x36   : > { %1484 = vmatmul.mubr.f32.vlgmr.msra.gmra.mxu1 %v1915_v12 }
  0x37   : > { %1494 = vmatpush3.msra.mxu1 %v308_v4  ;;  %1497 = vmatprep.mubr.msk.f32.mxu1 %vm1758_vm0, %v1757_v0  ;;  %v958_v4 = vld [vmem:[%s2151_s3 + $0x40] sm:$0xff] }
  0x38   : > { %1495 = vmatprep.subr.mxu1 %v1757_v0 }
  0x39   : > { %1496 = vmatpush3.msra.mxu1 %v307_v5  ;;  %v945_v5 = vld [vmem:[%s2150_s2 + $0x58] sm:$0xff] }
  0x3a   : > { %1507 = vmatprep.subr.mxu1 %v1757_v0 }
  0xde   : > { %v383_v13 = vpop.f32.mrf.mxu1 }
  0xdf   : > { %v598_v14 = vsel %vm597_vm1, %v383_v13, -inf }
  0xe0   : > { %599 = vmax.xlane.f32.xlu0 %v598_v14  ;;  %v1464_v15 = vpop.f32.mrf.mxu1  ;;  %v942_v14 = vld [vmem:[%s2150_s2 + $0x40] sm:$0xff] }
  0xe1   : > { %v954_v15 = vld [vmem:[%s2151_s3 + $0x20] sm:$0xff] }
  0xe6   : > { %v453_v16 = vpop.f32.mrf.mxu1 }
  0xe7   : > { %v601_v17 = vsel %vm597_vm1, %v453_v16, -inf }
  0xe8   : > { %602 = vmax.xlane.f32.xlu0 %v601_v17  ;;  %v1471_v18 = vpop.f32.mrf.mxu1  ;;  %v940_v17 = vld [vmem:[%s2150_s2 + $0x30] sm:$0xff] }
  0xe9   : > { %v939_v18 = vld [vmem:[%s2150_s2 + $0x28] sm:$0xff] }
  0xee   : > { %v523_v19 = vpop.f32.mrf.mxu1 }
  0xef   : > { %v604_v20 = vsel %vm597_vm1, %v523_v19, -inf }
  0xf0   : > { %605 = vmax.xlane.f32.xlu1 %v604_v20  ;;  %v1478_v21 = vpop.f32.mrf.mxu1  ;;  %v953_v20 = vld [vmem:[%s2151_s3 + $0x18] sm:$0xff] }
  0xf1   : > { %v937_v21 = vld [vmem:[%s2150_s2 + $0x18] sm:$0xff] }
  0xf6   : > { %v593_v22 = vpop.f32.mrf.mxu1 }
  0xf7   : > { %v607_v23 = vsel %vm597_vm1, %v593_v22, -inf }
  0xf8   : > { %608 = vmax.xlane.f32.xlu1 %v607_v23  ;;  %v1485_v24 = vpop.f32.mrf.mxu1  ;;  %v936_v23 = vld [vmem:[%s2150_s2 + $0x10] sm:$0xff] }
  0xf9   : > { %v951_v24 = vld [vmem:[%s2151_s3 + $0x8] sm:$0xff] }
 0x169   : > { %v600_v25 = vpop.xlane.xlu0 %599 }
 0x16a   : > { %v610_v26 = vsub.f32 %v383_v13, %v600_v25  ;;  %v955_v13 = vld [vmem:[%s2151_s3 + $0x28] sm:$0xff] }
 0x16b   : > { %v935_v25 = vld [vmem:[%s2150_s2 + $0x8] sm:$0xff] }
 0x16c   : > { %v614_v27 = vmul.f32 1.442695, %v610_v26  ;;  %v950_v26 = vld [vmem:[%s2151_s3] sm:$0xff] }
 0x16e   : > { %1671 = vpow2.f32 %v614_v27  ;;  %v934_v27 = vld [vmem:[%s2150_s2] sm:$0xff] }
 0x171   : > { %v603_v28 = vpop.xlane.xlu0 %602 }
 0x172   : > { %v611_v29 = vsub.f32 %v453_v16, %v603_v28  ;;  %v941_v16 = vld [vmem:[%s2150_s2 + $0x38] sm:$0xff] }
 0x173   : > { %v1166_v28 = vld [vmem:[%s2153_s5 + $0x78] sm:$0xff] }
 0x174   : > { %v616_v30 = vmul.f32 1.442695, %v611_v29  ;;  %v1165_v29 = vld [vmem:[%s2153_s5 + $0x70] sm:$0xff] }
 0x176   : > { %1673 = vpow2.f32 %v616_v30  ;;  %v1164_v30 = vld [vmem:[%s2153_s5 + $0x68] sm:$0xff] }
 0x179   : > { %v606_v31 = vpop.xlane.xlu1 %605 }
 0x17a   : > { %v612_v32 = vsub.f32 %v523_v19, %v606_v31  ;;  %v938_v19 = vld [vmem:[%s2150_s2 + $0x20] sm:$0xff] }
 0x17b   : > { %v1672_v33 = vpop.eup %1671 }
 0x17c   : > { %v618_v34 = vmul.f32 1.442695, %v612_v32  ;;  %v622_v35 = vsel %vm597_vm1, %v1672_v33, 0.0 }
 0x17d   : > { %623 = vadd.xlane.f32.xlu0 %v622_v35 }
 0x17e   : > { %1675 = vpow2.f32 %v618_v34 }
 0x181   : > { %v609_v36 = vpop.xlane.xlu1 %608 }
 0x182   : > { %v613_v37 = vsub.f32 %v593_v22, %v609_v36  ;;  %v952_v22 = vld [vmem:[%s2151_s3 + $0x10] sm:$0xff] }
 0x183   : > { %v1674_v38 = vpop.eup %1673 }
 0x184   : > { %v620_v39 = vmul.f32 1.442695, %v613_v37  ;;  %v625_v40 = vsel %vm597_vm1, %v1674_v38, 0.0 }
 0x185   : > { %626 = vadd.xlane.f32.xlu1 %v625_v40  ;;  %v1159_v40 = vld [vmem:[%s2153_s5 + $0x40] sm:$0xff] }
 0x186   : > { %1677 = vpow2.f32 %v620_v39  ;;  %v1160_v39 = vld [vmem:[%s2153_s5 + $0x48] sm:$0xff] }
 0x18b   : > { %v1676_v41 = vpop.eup %1675 }
 0x18c   : > { %v628_v42 = vsel %vm597_vm1, %v1676_v41, 0.0 }
 0x18d   : > { %629 = vadd.xlane.f32.xlu0 %v628_v42  ;;  %v1157_v42 = vld [vmem:[%s2153_s5 + $0x30] sm:$0xff] }
 0x193   : > { %v1678_v43 = vpop.eup %1677 }
 0x194   : > { %v631_v44 = vsel %vm597_vm1, %v1678_v43, 0.0 }
 0x195   : > { %632 = vadd.xlane.f32.xlu1 %v631_v44  ;;  %v1155_v44 = vld [vmem:[%s2153_s5 + $0x20] sm:$0xff] }
 0x206   : > { %v624_v45 = vpop.xlane.xlu0 %623 }
 0x207   : > { %1679 = vrcp.f32 %v624_v45  ;;  %v1154_v45 = vld [vmem:[%s2153_s5 + $0x18] sm:$0xff] }
 0x20e   : > { %v627_v46 = vpop.xlane.xlu1 %626 }
 0x20f   : > { %1681 = vrcp.f32 %v627_v46  ;;  %v1153_v46 = vld [vmem:[%s2153_s5 + $0x10] sm:$0xff] }
 0x214   : > { %v1680_v47 = vpop.eup %1679 }
 0x215   : > { %v638_v48 = vmul.f32 %v1680_v47, %v1672_v33  ;;  %v1152_v47 = vld [vmem:[%s2153_s5 + $0x8] sm:$0xff] }
 0x216   : > { %v630_v49 = vpop.xlane.xlu0 %629 }
 0x217   : > { %1683 = vrcp.f32 %v630_v49  ;;  %1491 = vmatmul.mubr.msk.f32.vlgmr.msra.gmra.mxu0 %vm597_vm1, %v638_v48  ;;  %v1151_v48 = vld [vmem:[%s2153_s5] sm:$0xff] }
 0x218   : > { %1501 = vmatpush3.msra.mxu0 %v1887_v7  ;;  %1504 = vmatprep.mubr.msk.f32.mxu0 %vm1758_vm0, %v1757_v0  ;;  %v957_v7 = vld [vmem:[%s2151_s3 + $0x38] sm:$0xff] }
 0x219   : > { %1502 = vmatprep.subr.mxu0 %v1757_v0 }
 0x21a   : > { %1503 = vmatpush3.msra.mxu0 %v1895_v8  ;;  %v944_v8 = vld [vmem:[%s2150_s2 + $0x50] sm:$0xff] }
 0x21b   : > { %1514 = vmatprep.subr.mxu0 %v965_v50 }
 0x21c   : > { %v1682_v51 = vpop.eup %1681 }
 0x21d   : > { %v639_v52 = vmul.f32 %v1682_v51, %v1674_v38  ;;  %v1161_v38 = vld [vmem:[%s2153_s5 + $0x50] sm:$0xff] }
 0x21e   : > { %v633_v53 = vpop.xlane.xlu1 %632 }
 0x21f   : > { %1685 = vrcp.f32 %v633_v53  ;;  %1498 = vmatmul.mubr.msk.f32.vlgmr.msra.gmra.mxu1 %vm597_vm1, %v639_v52  ;;  %v1365_v53 = vld [vmem:[%s2152_s4] ss:$0 sm:$0xff] }
 0x220   : > { %1508 = vmatpush3.msra.mxu1 %v1903_v10  ;;  %1511 = vmatprep.mubr.msk.f32.mxu1 %vm1758_vm0, %v1757_v0  ;;  %v956_v10 = vld [vmem:[%s2151_s3 + $0x30] sm:$0xff] }
 0x221   : > { %1509 = vmatprep.subr.mxu1 %v1757_v0  ;;  %v960_v0 = vld [vmem:[%s2151_s3 + $0x50] sm:$0xff] }
 0x222   : > { %1510 = vmatpush3.msra.mxu1 %v1911_v11  ;;  %v943_v11 = vld [vmem:[%s2150_s2 + $0x48] sm:$0xff] }
 0x223   : > { %1552 = vmatprep.subr.mxu1 %v949_v54 }
 0x224   : > { %v1684_v55 = vpop.eup %1683 }
 0x225   : > { %v640_v56 = vmul.f32 %v1684_v55, %v1676_v41  ;;  %v1158_v41 = vld [vmem:[%s2153_s5 + $0x38] sm:$0xff] }
 0x227   : > { %1505 = vmatmul.mubr.msk.f32.vlgmr.msra.gmra.mxu0 %vm597_vm1, %v640_v56 }
 0x228   : > { %1515 = vmatpush3.msra.mxu0 %v965_v50  ;;  %1546 = vmatprep.mubr.f32.mxu0 %v1873_v3  ;;  %v946_v3 = vld [vmem:[%s2150_s2 + $0x60] sm:$0xff] }
 0x229   : > { %1516 = vmatprep.subr.mxu0 %v964_v57 }
 0x22a   : > { %1517 = vmatpush3.msra.mxu0 %v964_v57 }
 0x22b   : > { %1518 = vmatprep.subr.mxu0 %v963_v58 }
 0x22c   : > { %v1686_v60 = vpop.eup %1685  ;;  %1519 = vmatpush3.msra.mxu0 %v963_v58 }
 0x22d   : > { %v641_v62 = vmul.f32 %v1686_v60, %v1678_v43  ;;  %1520 = vmatprep.subr.mxu0 %v962_v59  ;;  %v1156_v43 = vld [vmem:[%s2153_s5 + $0x28] sm:$0xff] }
 0x22e   : > { %1521 = vmatpush3.msra.mxu0 %v962_v59 }
 0x22f   : > { %1512 = vmatmul.mubr.msk.f32.vlgmr.msra.gmra.mxu1 %vm597_vm1, %v641_v62  ;;  %1522 = vmatprep.subr.mxu0 %v961_v61 }
 0x230   : > { %1553 = vmatpush3.msra.mxu1 %v949_v54  ;;  %1523 = vmatpush3.msra.mxu0 %v961_v61 }
 0x231   : > { %1554 = vmatprep.subr.mxu1 %v948_v63  ;;  %1524 = vmatprep.subr.mxu0 %v960_v0 }
 0x232   : > { %1555 = vmatpush3.msra.mxu1 %v948_v63  ;;  %1525 = vmatpush3.msra.mxu0 %v960_v0 }
 0x233   : > { %1556 = vmatprep.subr.mxu1 %v947_v1  ;;  %1526 = vmatprep.subr.mxu0 %v959_v2 }
 0x234   : > { %1557 = vmatpush3.msra.mxu1 %v947_v1  ;;  %1527 = vmatpush3.msra.mxu0 %v959_v2 }
 0x235   : > { %1558 = vmatprep.subr.mxu1 %v946_v3  ;;  %1528 = vmatprep.subr.mxu0 %v958_v4 }
 0x236   : > { %1559 = vmatpush3.msra.mxu1 %v946_v3  ;;  %1529 = vmatpush3.msra.mxu0 %v958_v4 }
 0x237   : > { %1560 = vmatprep.subr.mxu1 %v945_v5  ;;  %1530 = vmatprep.subr.mxu0 %v957_v7 }
 0x238   : > { %1561 = vmatpush3.msra.mxu1 %v945_v5  ;;  %1531 = vmatpush3.msra.mxu0 %v957_v7  ;;  %v1366_v7 = vld [vmem:[%s2154_s6] ss:$0 sm:$0xff] }
 0x239   : > { %1562 = vmatprep.subr.mxu1 %v944_v8  ;;  %1532 = vmatprep.subr.mxu0 %v956_v10 }
 0x23a   : > { %1563 = vmatpush3.msra.mxu1 %v944_v8  ;;  %1533 = vmatpush3.msra.mxu0 %v956_v10 }
 0x23b   : > { %1564 = vmatprep.subr.mxu1 %v943_v11  ;;  %1534 = vmatprep.subr.mxu0 %v955_v13 }
 0x23c   : > { %1565 = vmatpush3.msra.mxu1 %v943_v11  ;;  %1535 = vmatpush3.msra.mxu0 %v955_v13 }
 0x23d   : > { %1566 = vmatprep.subr.mxu1 %v942_v14  ;;  %1536 = vmatprep.subr.mxu0 %v954_v15 }
 0x23e   : > { %1567 = vmatpush3.msra.mxu1 %v942_v14  ;;  %1537 = vmatpush3.msra.mxu0 %v954_v15 }
 0x23f   : > { %1568 = vmatprep.subr.mxu1 %v941_v16  ;;  %1538 = vmatprep.subr.mxu0 %v953_v20 }
 0x240   : > { %1569 = vmatpush3.msra.mxu1 %v941_v16  ;;  %1539 = vmatpush3.msra.mxu0 %v953_v20 }
 0x241   : > { %1570 = vmatprep.subr.mxu1 %v940_v17  ;;  %1540 = vmatprep.subr.mxu0 %v952_v22 }
 0x242   : > { %1571 = vmatpush3.msra.mxu1 %v940_v17  ;;  %1541 = vmatpush3.msra.mxu0 %v952_v22 }
 0x243   : > { %1572 = vmatprep.subr.mxu1 %v939_v18  ;;  %1542 = vmatprep.subr.mxu0 %v951_v24 }
 0x244   : > { %1573 = vmatpush3.msra.mxu1 %v939_v18  ;;  %1543 = vmatpush3.msra.mxu0 %v951_v24 }
 0x245   : > { %1574 = vmatprep.subr.mxu1 %v938_v19  ;;  %1544 = vmatprep.subr.mxu0 %v950_v26 }
 0x246   : > { %1575 = vmatpush3.msra.mxu1 %v938_v19  ;;  %1545 = vmatpush3.msra.mxu0 %v950_v26 }
 0x247   : > { %1576 = vmatprep.subr.mxu1 %v937_v21  ;;  %1547 = vmatmul.mubr.f32.vlgmr.msra.gmra.mxu0 %v1883_v6  ;;  %v1163_v6 = vld [vmem:[%s2153_s5 + $0x60] sm:$0xff] }
 0x248   : > { %1577 = vmatpush3.msra.mxu1 %v937_v21  ;;  %1549 = vmatprep.mubr.f32.mxu0 %v1899_v9  ;;  %v1162_v9 = vld [vmem:[%s2153_s5 + $0x58] sm:$0xff] }
 0x249   : > { %1578 = vmatprep.subr.mxu1 %v936_v23  ;;  %1590 = vmatprep.subr.mxu0 %v1166_v28 }
 0x24a   : > { %1579 = vmatpush3.msra.mxu1 %v936_v23  ;;  %1591 = vmatpush3.msra.mxu0 %v1166_v28 }
 0x24b   : > { %1580 = vmatprep.subr.mxu1 %v935_v25  ;;  %1550 = vmatmul.mubr.f32.gmra.mxu0 %v1915_v12 }
 0x24c   : > { %1581 = vmatpush3.msra.mxu1 %v935_v25  ;;  %1592 = vmatprep.subr.mxu0 %v1165_v29 }
 0x24d   : > { %1582 = vmatprep.subr.mxu1 %v934_v27  ;;  %1593 = vmatpush3.msra.mxu0 %v1165_v29 }
 0x24e   : > { %1583 = vmatpush3.msra.mxu1 %v934_v27  ;;  %1594 = vmatprep.subr.mxu0 %v1164_v30 }
 0x24f   : > { %1595 = vmatpush3.msra.mxu0 %v1164_v30 }
 0x250   : > { %1596 = vmatprep.subr.mxu0 %v1163_v6 }
 0x251   : > { %1597 = vmatpush3.msra.mxu0 %v1163_v6 }
 0x252   : > { %1598 = vmatprep.subr.mxu0 %v1162_v9 }
 0x253   : > { %1599 = vmatpush3.msra.mxu0 %v1162_v9 }
 0x254   : > { %1600 = vmatprep.subr.mxu0 %v1161_v38 }
 0x255   : > { %1601 = vmatpush3.msra.mxu0 %v1161_v38 }
 0x256   : > { %1602 = vmatprep.subr.mxu0 %v1160_v39 }
 0x257   : > { %1603 = vmatpush3.msra.mxu0 %v1160_v39 }
 0x258   : > { %1604 = vmatprep.subr.mxu0 %v1159_v40 }
 0x259   : > { %1605 = vmatpush3.msra.mxu0 %v1159_v40 }
 0x25a   : > { %1606 = vmatprep.subr.mxu0 %v1158_v41 }
 0x25b   : > { %1607 = vmatpush3.msra.mxu0 %v1158_v41 }
 0x25c   : > { %1608 = vmatprep.subr.mxu0 %v1157_v42 }
 0x25d   : > { %1609 = vmatpush3.msra.mxu0 %v1157_v42 }
 0x25e   : > { %1610 = vmatprep.subr.mxu0 %v1156_v43 }
 0x25f   : > { %1611 = vmatpush3.msra.mxu0 %v1156_v43 }
 0x260   : > { %1612 = vmatprep.subr.mxu0 %v1155_v44 }
 0x261   : > { %1613 = vmatpush3.msra.mxu0 %v1155_v44 }
 0x262   : > { %1614 = vmatprep.subr.mxu0 %v1154_v45 }
 0x263   : > { %1615 = vmatpush3.msra.mxu0 %v1154_v45 }
 0x264   : > { %1616 = vmatprep.subr.mxu0 %v1153_v46 }
 0x265   : > { %1617 = vmatpush3.msra.mxu0 %v1153_v46 }
 0x266   : > { %1618 = vmatprep.subr.mxu0 %v1152_v47 }
 0x267   : > { %1619 = vmatpush3.msra.mxu0 %v1152_v47 }
 0x268   : > { %1620 = vmatprep.subr.mxu0 %v1151_v48 }
 0x269   : > { %1621 = vmatpush3.msra.mxu0 %v1151_v48 }
 0x2d7   : > { %v711_v12 = vpop.f32.mrf.mxu0 }
 0x2d8   : > { %1584 = vmatprep.mubr.f32.mxu1 %v711_v12 }
 0x2d9   : > { %v1492_v31 = vpop.f32.mrf.mxu0 }
 0x2df   : > { %v784_v32 = vpop.f32.mrf.mxu1 }
 0x2e0   : > { %1585 = vmatmul.mubr.f32.vlgmr.msra.gmra.mxu1 %v784_v32 }
 0x2e1   : > { %v1499_v33 = vpop.f32.mrf.mxu1 }
 0x2e7   : > { %v857_v34 = vpop.f32.mrf.mxu0 }
 0x2e8   : > { %1587 = vmatprep.mubr.f32.mxu1 %v857_v34 }
 0x2e9   : > { %v1506_v35 = vpop.f32.mrf.mxu0 }
 0x2ef   : > { %v930_v36 = vpop.f32.mrf.mxu1 }
 0x2f0   : > { %1588 = vmatmul.mubr.f32.gmra.mxu1 %v930_v36 }
 0x2f1   : > { %v1513_v37 = vpop.f32.mrf.mxu1 }
 0x307   : > { %v1548_v49 = vpop.f32.mrf.mxu0 }
 0x309   : > { %v1032_v51 = vpop.f32.mrf.mxu0 }
 0x30b   : > { %v1551_v58 = vpop.f32.mrf.mxu0 }
 0x30d   : > { %v1042_v61 = vpop.f32.mrf.mxu0 }
 0x3a0   : > { %v1586_v50 = vpop.f32.mrf.mxu1 }
 0x3a1   : > { %v1123_v52 = vadd.f32 %v1586_v50, %v1548_v49 }
 0x3a2   : > { %v1117_v54 = vpop.f32.mrf.mxu1 }
 0x3a3   : > { %v1118_v55 = vadd.f32 %v1117_v54, %v1032_v51  ;;  %v1144_v56 = vadd.f32 %v1365_v53, %v1123_v52 }
 0x3a5   : > { %v1143_v57 = vadd.f32 %v1365_v53, %v1118_v55 }
 0x3a7   : > { %1687 = vtanh.f32 %v1143_v57 }
 0x3a8   : > { %1689 = vtanh.f32 %v1144_v56 }
 0x3b0   : > { %v1589_v59 = vpop.f32.mrf.mxu1 }
 0x3b1   : > { %v1133_v60 = vadd.f32 %v1589_v59, %v1551_v58 }
 0x3b2   : > { %v1127_v62 = vpop.f32.mrf.mxu1 }
 0x3b3   : > { %v1128_v63 = vadd.f32 %v1127_v62, %v1042_v61  ;;  %v1146_v1 = vadd.f32 %v1365_v53, %v1133_v60 }
 0x3b4   : > { %v1688_v0 = vpop.eup %1687 }
 0x3b5   : > { %v1690_v2 = vpop.eup %1689  ;;  %v1145_v3 = vadd.f32 %v1365_v53, %v1128_v63  ;;  %1622 = vmatprep.mubr.f32.mxu0 %v1688_v0 }
 0x3b6   : > { %1623 = vmatmul.mubr.f32.vlgmr.msra.gmra.mxu0 %v1690_v2 }
 0x3b7   : > { %1691 = vtanh.f32 %v1145_v3 }
 0x3b8   : > { %1693 = vtanh.f32 %v1146_v1 }
 0x3c4   : > { %v1692_v4 = vpop.eup %1691 }
 0x3c5   : > { %v1694_v5 = vpop.eup %1693  ;;  %1625 = vmatprep.mubr.f32.mxu0 %v1692_v4 }
 0x3c6   : > { %1626 = vmatmul.mubr.f32.gmra.mxu0 %v1694_v5 }
 0x476   : > { %v1624_v8 = vpop.f32.mrf.mxu0 }
 0x477   : > { %v1246_v10 = vadd.f32 %v1624_v8, %v1366_v7 }
 0x478   : > { %v1240_v11 = vpop.f32.mrf.mxu0 }
 0x479   : > { %1260 = vst [vmem:[%s290_s9 + $0x8] sm:$0xff] %v1246_v10  ;;  %v1241_v13 = vadd.f32 %v1366_v7, %v1240_v11 }
 0x47b   : > { %1259 = vst [vmem:[%s290_s9] sm:$0xff] %v1241_v13 }
 0x486   : > { %v1627_v14 = vpop.f32.mrf.mxu0 }
 0x487   : > { %v1256_v15 = vadd.f32 %v1627_v14, %v1366_v7 }
 0x488   : > { %v1250_v16 = vpop.f32.mrf.mxu0 }
 0x489   : > { %1262 = vst [vmem:[%s290_s9 + $0x18] sm:$0xff] %v1256_v15  ;;  %v1251_v17 = vadd.f32 %v1366_v7, %v1250_v16 }
 0x48b   : > { %1261 = vst [vmem:[%s290_s9 + $0x10] sm:$0xff] %v1251_v17 }
 0x48c   : > { %1708 = shalt.err (!%p1705_p3)
}
 0x48d   : > { %s1709_s22 = scalar_lea.hbm %s2106_s17, 512  ;;  %s1713_s8 = scalar_lea.hbm %s2155_s7, 1024 }
 0x48e   : > { %p1710_p4 = scmp.ne.s32.totalorder %s2106_s17, %s1709_s22  ;;  %p1714_p9 = scmp.lt.s32.totalorder %s2106_s17, %s2155_s7 }
 0x48f   : > { %p1715_p10 = scmp.lt.s32.totalorder %s1713_s8, %s1709_s22 }
 0x490   : > { %p1711_p7 = pnand %p1710_p4, %p1840_p5 }
 0x491   : > { %p1716_p11 = por %p1715_p10, %p1714_p9 }
 0x492   : > { %p1712_p8 = pneg %p1711_p7 }
 0x494   : > { %p1717_p12 = pnand %p1716_p11, %p1712_p8 }
 0x496   : > { %1720 = shalt.err (!%p1717_p12)
}
 0x497   : > { %s1760_s15 = smov 128   ;;  %s1761_s16 = smov 8  }
 0x498   : > { %1628 = dma.vmem_to_hbm [thread:$0]  (%p1840_p5), %s2101_s13, 512, %s2106_s17, %s2108_s18, %s1760_s15, %s1760_s15, %s1761_s16  }
 0x499 PF: > { %p1634_p13 = scmp.ge.s32.totalorder %s1755_s27, 2  ;;  %s1292_s19 = sand.u32 1, %s1743_s24  }
 0x49a   : > { %s1293_s28 = scalar_lea.sflag [#allocation3], %s1292_s19 }
 0x49b   : > { %p1631_p0 = pnand %p1634_p13, %p1844_p6 }
 0x49d   : > { %p1632_p1 = pneg %p1631_p0 }
 0x49f   : > { %1738 = dma.done.wait (%p1632_p1), %s1293_s28, 512  }
 0x4a0   : > { %1740 = vsyncadd (%p1632_p1), %s1293_s28, 4294966784  ;;  %p17_p2 = scmp.ge.s32.totalorder %s1827_s30, 4   ;;  %s2158_s24 = smov %s1747_s25 }
 0x4a1   : > { %s2159_s25 = smov %s1751_s26  ;;  %s2160_s26 = smov %s1838_s10 }
 0x4a2   : > { %s2161_s27 = smov %s1827_s30  ;;  %19 = sbr.rel (!%p17_p2) target bundleno = 3 (0x3), region = 86 }
 0x4a7   :  { %1298 = vsyncpa [#allocation3], 1 }
 0x4a8   :  { %1300 = vsyncpa [#allocation3 + $0x1], 1 }

// kernel: seq2seq_forward.3
= control target key start
LH: loop header
LB: loop body
LE: loop exit
PB: predicated region body
PF: predicated region fallthrough
CT: control target
= control target key end

     0   :  { %s2045_s24 = smov 0   ;;  %s2047_s25 = smov 0   ;;  %s2472_s0 = inlined_call_operand.vmem [shape: f32[128,32], index: 0, kind: input, shape index: {}]   ;;  %s2473_s1 = inlined_call_operand.vmem [shape: f32[2,32,192], index: 1, kind: input, shape index: {}]   ;;  %s2474_s2 = inlined_call_operand.vmem [shape: f32[2,1,192], index: 2, kind: input, shape index: {}]   ;;  %s2475_s3 = inlined_call_operand.vmem [shape: f32[2,64,192], index: 3, kind: input, shape index: {}]   ;;  %s2476_s4 = inlined_call_operand.vmem [shape: f32[2,1,192], index: 4, kind: input, shape index: {}]   ;;  %s2477_s5 = inlined_call_operand.vmem [shape: f32[2,8,64], index: 5, kind: input, shape index: {}]   ;;  %s2478_s6 = inlined_call_operand.vmem [shape: f32[2,128,64], index: 6, kind: output, shape index: {0}]   ;;  %s2479_s7 = inlined_call_operand.vmem [shape: f32[2,8,64], index: 7, kind: output, shape index: {1}]  }
   0x1   :  { %2480 = sst [smem:[#allocation4_spill]] %s2473_s1  ;;  %s2049_s26 = smov 0  }
   0x2   :  { %2481 = sst [smem:[#allocation5_spill]] %s2475_s3  ;;  %s2051_s27 = smov 0  }
   0x3   :  { %2482 = sst [smem:[#allocation6_spill]] %s2477_s5  ;;  %s2053_s28 = smov 0  }
   0x4 LB: > { %s27_s29 = sadd.s32 1, %s1993_s26  ;;  %s30_s30 = sadd.s32 1, %s1997_s27  ;;  %s2001_s28 = sphi %s2053_s28, %s18_s28   ;;  %s1997_s27 = sphi %s2051_s27, %s2489_s27   ;;  %s1993_s26 = sphi %s2049_s26, %s2488_s26   ;;  %s1989_s25 = sphi %s2047_s25, %s2487_s25   ;;  %s1985_s24 = sphi %s2045_s24, %s2486_s24  }
   0x5   : > { %p28_p0 = scmp.ge.s32.totalorder %s27_s29, 2  ;;  %p1768_p1 = scmp.ge.s32.totalorder %s2001_s28, 1 }
   0x6   : > { %p326_p2 = scmp.lt.s32.totalorder %s2001_s28, 5 }
   0x7   : > { %s2491_s29 = smov (%p28_p0, %s27_s29), 0  ;;  %s2493_s30 = smov (!%p28_p0, %s30_s30), %s1997_s27 }
   0x8   : > { %p327_p3 = pnand %p1768_p1, %p326_p2  ;;  %p32_p4 = scmp.ge.s32.totalorder %s2493_s30, 2 }
   0x9   : > { %p410_p5 = scmp.lt.s32.totalorder (!%p327_p3), %s1989_s25, 1  ;;  %s1769_s8 = sshll.u32 (!%p327_p3), %s1985_s24, 1 }
   0xa   : > { %s2495_s30 = smov (%p32_p4, %s2493_s30), 0  ;;  %330 = sbr.rel (%p327_p3) target bundleno = 4127 (0x101f), region = 44 }
   0xb   : > { %s397_s9 = ssub.s32 (!%p327_p3), 1, %s1769_s8  ;;  %s2483_s1 = sld [smem:[#allocation4_spill]] (!%p327_p3) }
   0xc   : > { %s398_s11 = smul.u32 (!%p327_p3), %s1989_s25, %s397_s9  ;;  %s2484_s3 = sld [smem:[#allocation5_spill]] (!%p327_p3) }
   0xd   : > { %s2485_s5 = sld [smem:[#allocation6_spill]] (!%p327_p3)  ;;  %p1792_p7 = scmp.ne.s32.totalorder (!%p327_p3), %s1985_s24, 0 }
   0xe   : > { %s399_s21 = sadd.s32 (!%p327_p3), %s1985_s24, %s398_s11 }
   0xf   : > { %v2003_v0 = vmov 0.0   ;;  %s2083_s10 = scalar_select %p410_p5, %s1989_s25, 1  ;;  %vm482_vm0 = vcmask 261120   ;;  %v472_v17 = vlaneseq  ;;  %vm621_vm1 = vcmask 523264  }
  0x10   : > { %571 = vmatprep.mubr.f32.mxu0 %v2003_v0 }
  0x11   : > { %s1846_s12 = sshll.u32 %s2083_s10, 6  ;;  %s1847_s13 = sshll.u32 %s2083_s10, 7  ;;  %v2140_v18 = vshrl.u32 %v472_v17, 7 }
  0x12   : > { %s414_s16 = scalar_lea.vmem %s2483_s1, %s1846_s12  ;;  %s2094_s19 = scalar_lea.vmem %s2484_s3, %s1847_s13 }
  0x13   : > { %s1778_s20 = sshll.u32 %s2083_s10, 3  ;;  %v469_v1 = vld [vmem:[%s414_s16 + $0x38] sm:$0xff]  ;;  %v468_v2 = vld [vmem:[%s414_s16 + $0x30] sm:$0xff]  ;;  %v467_v3 = vld [vmem:[%s414_s16 + $0x28] sm:$0xff]  ;;  %s1770_s13 = sshll.u32 %s399_s21, 3  ;;  %v474_v19 = vsub.s32 0, %v2140_v18 }
  0x14   : > { %s2101_s8 = scalar_lea.vmem %s2485_s5, %s1778_s20  ;;  %s2106_s14 = scalar_lea.vmem %s2479_s7, %s1778_s20  ;;  %531 = vmatprep.subr.mxu0 %v469_v1  ;;  %v466_v4 = vld [vmem:[%s414_s16 + $0x20] sm:$0xff]  ;;  %v465_v5 = vld [vmem:[%s414_s16 + $0x18] sm:$0xff]  ;;  %v464_v6 = vld [vmem:[%s414_s16 + $0x10] sm:$0xff]  ;;  %v478_v21 = vsub.s32 1, %v2140_v18 }
  0x15   : > { %532 = vmatpush1.msra.mxu0 %v468_v2  ;;  %p401_p6 = scmp.lt.s32.totalorder %s1770_s13, 15  ;;  %s1774_s15 = sshll.u32 %s2083_s10, 1  ;;  %v463_v7 = vld [vmem:[%s414_s16 + $0x8] sm:$0xff]  ;;  %v462_v8 = vld [vmem:[%s414_s16] sm:$0xff] }
  0x16   : > { %533 = vmatprep.subr.mxu0 %v467_v3  ;;  %s1781_s11 = sshll.u32 %s2083_s10, 4  ;;  %s2115_s22 = scalar_lea.vmem %s2476_s4, %s1774_s15 }
  0x17   : > { %534 = vmatpush1.msra.mxu0 %v466_v4  ;;  %s2497_s13 = smov (!%p401_p6, %s1770_s13), 15  ;;  %s418_s5 = scalar_lea.vmem %s2474_s2, %s1774_s15 }
  0x18   : > { %535 = vmatprep.subr.mxu0 %v465_v5  ;;  %s1771_s20 = sshll.u32 %s2497_s13, 3  ;;  %s442_s21 = sadd.s32 %s1781_s11, %s2497_s13  ;;  %v470_v20 = vld [vmem:[%s418_s5] sm:$0x3] }
  0x19   : > { %536 = vmatpush1.msra.mxu0 %v464_v6  ;;  %s404_s12 = scalar_lea.vmem %s2472_s0, %s1771_s20  ;;  %s1782_s1 = sshll.u32 %s442_s21, 3  ;;  %v475_v22 = vrot.slane %v470_v20, %v474_v19  ;;  %v479_v23 = vrot.slane %v470_v20, %v478_v21 }
  0x1a   : > { %537 = vmatprep.subr.mxu0 %v463_v7  ;;  %s2123_s17 = scalar_lea.vmem %s2478_s6, %s1782_s1  ;;  %v454_v9 = vld [vmem:[%s404_s12] sm:$0xff]  ;;  %v455_v10 = vld [vmem:[%s404_s12 + $0x8] sm:$0xff]  ;;  %v456_v11 = vld [vmem:[%s404_s12 + $0x10] sm:$0xff] }
  0x1b   : > { %538 = vmatpush1.msra.mxu0 %v462_v8  ;;  %v457_v12 = vld [vmem:[%s404_s12 + $0x18] sm:$0xff]  ;;  %v458_v13 = vld [vmem:[%s404_s12 + $0x20] sm:$0xff]  ;;  %v459_v14 = vld [vmem:[%s404_s12 + $0x28] sm:$0xff] }
  0x1c   : > { %1784 = vmatmul.mubr.msk.f32.vlgmr.msra.gmra.mxu0 %vm482_vm0, %v454_v9  ;;  %v460_v15 = vld [vmem:[%s404_s12 + $0x30] sm:$0xff]  ;;  %v461_v16 = vld [vmem:[%s404_s12 + $0x38] sm:$0xff] }
  0x1d   : > { %577 = vmatprep.mubr.f32.mxu0 %v2003_v0 }
  0x20   : > { %1785 = vmatmul.mubr.msk.f32.gmra.mxu0 %vm482_vm0, %v455_v10 }
  0x21   : > { %583 = vmatprep.mubr.f32.mxu0 %v2003_v0 }
  0x24   : > { %1786 = vmatmul.mubr.msk.f32.gmra.mxu0 %vm482_vm0, %v456_v11 }
  0x25   : > { %589 = vmatprep.mubr.f32.mxu0 %v2003_v0 }
  0x28   : > { %1787 = vmatmul.mubr.msk.f32.gmra.mxu0 %vm482_vm0, %v457_v12 }
  0x29   : > { %595 = vmatprep.mubr.f32.mxu0 %v2003_v0 }
  0x2c   : > { %1788 = vmatmul.mubr.msk.f32.gmra.mxu0 %vm482_vm0, %v458_v13 }
  0x2d   : > { %601 = vmatprep.mubr.f32.mxu0 %v2003_v0 }
  0x30   : > { %1789 = vmatmul.mubr.msk.f32.gmra.mxu0 %vm482_vm0, %v459_v14 }
  0x31   : > { %607 = vmatprep.mubr.f32.mxu0 %v2003_v0 }
  0x34   : > { %1790 = vmatmul.mubr.msk.f32.gmra.mxu0 %vm482_vm0, %v460_v15 }
  0x35   : > { %613 = vmatprep.mubr.f32.mxu0 %v2003_v0 }
  0x38   : > { %1791 = vmatmul.mubr.msk.f32.gmra.mxu0 %vm482_vm0, %v461_v16 }
  0xdc   : > { %v573_v24 = vpop.f32.mrf.mxu0 }
  0xdd   : > { %v574_v25 = vadd.f32 %v573_v24, %v475_v22 }
  0xde   : > { %v575_v26 = vpop.f32.mrf.mxu0 }
  0xdf   : > { %620 = vst [vmem:[#allocation2] sm:$0xff] %v574_v25  ;;  %v576_v27 = vadd.f32 %v575_v26, %v479_v23 }
  0xe0   : > { %v579_v28 = vpop.f32.mrf.mxu0 }
  0xe1   : > { %622 = vst.msk [vmem:[#allocation2 + $0x8] sm:$0xff] %vm621_vm1, %v576_v27  ;;  %v580_v29 = vadd.f32 %v579_v28, %v475_v22 }
  0xe2   : > { %v581_v30 = vpop.f32.mrf.mxu0 }
  0xe3   : > { %623 = vst [vmem:[#allocation2 + $0x10] sm:$0xff] %v580_v29  ;;  %v582_v31 = vadd.f32 %v581_v30, %v479_v23 }
  0xe4   : > { %v585_v32 = vpop.f32.mrf.mxu0 }
  0xe5   : > { %624 = vst.msk [vmem:[#allocation2 + $0x18] sm:$0xff] %vm621_vm1, %v582_v31  ;;  %v586_v33 = vadd.f32 %v585_v32, %v475_v22 }
  0xe6   : > { %v587_v34 = vpop.f32.mrf.mxu0 }
  0xe7   : > { %625 = vst [vmem:[#allocation2 + $0x20] sm:$0xff] %v586_v33  ;;  %v588_v35 = vadd.f32 %v587_v34, %v479_v23 }
  0xe8   : > { %v591_v36 = vpop.f32.mrf.mxu0 }
  0xe9   : > { %626 = vst.msk [vmem:[#allocation2 + $0x28] sm:$0xff] %vm621_vm1, %v588_v35  ;;  %v592_v37 = vadd.f32 %v591_v36, %v475_v22 }
  0xea   : > { %v593_v38 = vpop.f32.mrf.mxu0 }
  0xeb   : > { %627 = vst [vmem:[#allocation2 + $0x30] sm:$0xff] %v592_v37  ;;  %v594_v39 = vadd.f32 %v593_v38, %v479_v23 }
  0xec   : > { %v597_v40 = vpop.f32.mrf.mxu0 }
  0xed   : > { %628 = vst.msk [vmem:[#allocation2 + $0x38] sm:$0xff] %vm621_vm1, %v594_v39  ;;  %v598_v41 = vadd.f32 %v597_v40, %v475_v22 }
  0xee   : > { %v599_v42 = vpop.f32.mrf.mxu0 }
  0xef   : > { %629 = vst [vmem:[#allocation2 + $0x40] sm:$0xff] %v598_v41  ;;  %v600_v43 = vadd.f32 %v599_v42, %v479_v23 }
  0xf0   : > { %v603_v44 = vpop.f32.mrf.mxu0 }
  0xf1   : > { %630 = vst.msk [vmem:[#allocation2 + $0x48] sm:$0xff] %vm621_vm1, %v600_v43  ;;  %v604_v45 = vadd.f32 %v603_v44, %v475_v22 }
  0xf2   : > { %v605_v46 = vpop.f32.mrf.mxu0 }
  0xf3   : > { %631 = vst [vmem:[#allocation2 + $0x50] sm:$0xff] %v604_v45  ;;  %v606_v47 = vadd.f32 %v605_v46, %v479_v23 }
  0xf4   : > { %v609_v48 = vpop.f32.mrf.mxu0 }
  0xf5   : > { %632 = vst.msk [vmem:[#allocation2 + $0x58] sm:$0xff] %vm621_vm1, %v606_v47  ;;  %v610_v49 = vadd.f32 %v609_v48, %v475_v22 }
  0xf6   : > { %v611_v50 = vpop.f32.mrf.mxu0 }
  0xf7   : > { %633 = vst [vmem:[#allocation2 + $0x60] sm:$0xff] %v610_v49  ;;  %v612_v51 = vadd.f32 %v611_v50, %v479_v23 }
  0xf8   : > { %v615_v52 = vpop.f32.mrf.mxu0 }
  0xf9   : > { %634 = vst.msk [vmem:[#allocation2 + $0x68] sm:$0xff] %vm621_vm1, %v612_v51  ;;  %v616_v53 = vadd.f32 %v615_v52, %v475_v22  ;;  %640 = sbr.rel (%p1792_p7) target bundleno = 256 (0x100), region = 48 }
  0xfa   : > { %v617_v54 = vpop.f32.mrf.mxu0 }
  0xfb   : > { %635 = vst [vmem:[#allocation2 + $0x70] sm:$0xff] %v616_v53  ;;  %v618_v55 = vadd.f32 %v617_v54, %v479_v23 }
  0xfd   : > { %636 = vst.msk [vmem:[#allocation2 + $0x78] sm:$0xff] %vm621_vm1, %v618_v55 }
  0xfe   : > { %v641_v56 = vld [vmem:[%s2101_s8] sm:$0xff] }
  0xff   : > { %642 = vst.msk [vmem:[#allocation3] sm:$0xff] %vm621_vm1, %v641_v56 }
 0x100 PF: > { %v2165_v57 = vld [vmem:[%s2094_s19 + $0x78] sm:$0xff]  ;;  %v2168_v58 = vld [vmem:[%s2094_s19 + $0x70] sm:$0xff]  ;;  %v2171_v59 = vld [vmem:[%s2094_s19 + $0x68] sm:$0xff]  ;;  %747 = vmatprep.mubr.f32.mxu1 %v2003_v0  ;;  %964 = vmatprep.mubr.f32.mxu0 %v2003_v0  ;;  %s661_s24 = smul.u32 56, %s1989_s25  ;;  %s2004_s8 = smov 64  }
 0x101   : > { %699 = vmatprep.subr.mxu1 %v2165_v57  ;;  %v2177_v60 = vld [vmem:[%s2094_s19 + $0x60] sm:$0xff]  ;;  %916 = vmatprep.subr.mxu0 %v2165_v57  ;;  %v2182_v61 = vld [vmem:[%s2094_s19 + $0x58] sm:$0xff]  ;;  %v2187_v62 = vld [vmem:[%s2094_s19 + $0x50] sm:$0xff]  ;;  %s1868_s15 = smul.u32 40, %s1989_s25 }
 0x102   : > { %700 = vmatpush1.msra.mxu1 %v2168_v58  ;;  %917 = vmatpush1.msra.mxu0 %v2168_v58  ;;  %v2192_v63 = vld [vmem:[%s2094_s19 + $0x48] sm:$0xff]  ;;  %v2197_v1 = vld [vmem:[%s2094_s19 + $0x40] sm:$0xff]  ;;  %v2202_v2 = vld [vmem:[%s2094_s19 + $0x38] sm:$0xff]  ;;  %s662_s10 = sshra.s32 %s661_s24, 3  ;;  %s779_s13 = scalar_lea.vmem %s2123_s17, %s661_s24 }
 0x103   : > { %701 = vmatprep.subr.mxu1 %v2171_v59  ;;  %918 = vmatprep.subr.mxu0 %v2171_v59  ;;  %v2207_v3 = vld [vmem:[%s2094_s19 + $0x30] sm:$0xff]  ;;  %v2212_v4 = vld [vmem:[%s2094_s19 + $0x28] sm:$0xff]  ;;  %v2217_v5 = vld [vmem:[%s2094_s19 + $0x20] sm:$0xff]  ;;  %s1848_s16 = sshll.u32 %s662_s10, 4  ;;  %s1850_s11 = sadd.s32 8, %s1868_s15 }
 0x104   : > { %702 = vmatpush1.msra.mxu1 %v2177_v60  ;;  %919 = vmatpush1.msra.mxu0 %v2177_v60  ;;  %v2222_v6 = vld [vmem:[%s2094_s19 + $0x18] sm:$0xff]  ;;  %v2227_v7 = vld [vmem:[%s2094_s19 + $0x10] sm:$0xff]  ;;  %v2232_v8 = vld [vmem:[%s2094_s19 + $0x8] sm:$0xff]  ;;  %s784_s18 = sshra.s32 %s1850_s11, 3  ;;  %s1642_s21 = scalar_lea.vmem %s2123_s17, %s1868_s15 }
 0x105   : > { %703 = vmatprep.subr.mxu1 %v2182_v61  ;;  %920 = vmatprep.subr.mxu0 %v2182_v61  ;;  %v2237_v9 = vld [vmem:[%s2094_s19] sm:$0xff]  ;;  %s666_s19 = scalar_lea.vmem [#allocation2], %s1848_s16  ;;  %s1869_s23 = smul.u32 24, %s1989_s25 }
 0x106   : > { %704 = vmatpush1.msra.mxu1 %v2187_v62  ;;  %921 = vmatpush1.msra.mxu0 %v2187_v62  ;;  %v660_v10 = vld [vmem:[#allocation3] sm:$0xff]  ;;  %v668_v26 = vld [vmem:[%s666_s19 + $0x8] sm:$0xff]  ;;  %s1855_s24 = sshll.u32 %s1989_s25, 3  ;;  %s1101_s11 = ssub.s32 4, %s1989_s25 }
 0x107   : > { %705 = vmatprep.subr.mxu1 %v2192_v63  ;;  %922 = vmatprep.subr.mxu0 %v2192_v63  ;;  %v659_v11 = vld [vmem:[%s2115_s22] sm:$0x3]  ;;  %s1851_s22 = sshll.u32 %s784_s18, 4  ;;  %s1853_s9 = sadd.s32 16, %s1869_s23 }
 0x108   : > { %706 = vmatpush1.msra.mxu1 %v2197_v1  ;;  %923 = vmatpush1.msra.mxu0 %v2197_v1  ;;  %v2272_v12 = vrot.slane %v659_v11, %v474_v19  ;;  %v667_v13 = vld [vmem:[%s666_s19] sm:$0xff]  ;;  %v2277_v23 = vrot.slane %v659_v11, %v478_v21  ;;  %s788_s20 = scalar_lea.vmem [#allocation2], %s1851_s22  ;;  %s891_s12 = sshra.s32 %s1853_s9, 3 }
 0x109   : > { %707 = vmatprep.subr.mxu1 %v2202_v2  ;;  %924 = vmatprep.subr.mxu0 %v2202_v2  ;;  %v789_v35 = vld [vmem:[%s788_s20] sm:$0xff]  ;;  %v790_v45 = vld [vmem:[%s788_s20 + $0x8] sm:$0xff]  ;;  %s1854_s1 = sshll.u32 %s891_s12, 4  ;;  %s1648_s5 = scalar_lea.vmem %s2123_s17, %s1869_s23 }
 0x10a   : > { %708 = vmatpush1.msra.mxu1 %v2207_v3  ;;  %925 = vmatpush1.msra.mxu0 %v2207_v3  ;;  %s895_s3 = scalar_lea.vmem [#allocation2], %s1854_s1  ;;  %s1856_s10 = sadd.s32 24, %s1855_s24 }
 0x10b   : > { %709 = vmatprep.subr.mxu1 %v2212_v4  ;;  %926 = vmatprep.subr.mxu0 %v2212_v4  ;;  %v896_v55 = vld [vmem:[%s895_s3] sm:$0xff]  ;;  %s997_s16 = sshra.s32 %s1856_s10, 3  ;;  %s1653_s15 = scalar_lea.vmem %s2123_s17, %s1855_s24 }
 0x10c   : > { %710 = vmatpush1.msra.mxu1 %v2217_v5  ;;  %927 = vmatpush1.msra.mxu0 %v2217_v5  ;;  %s1857_s19 = sshll.u32 %s997_s16, 4  ;;  %s2392_s18 = sshll.u32 %s1101_s11, 3 }
 0x10d   : > { %711 = vmatprep.subr.mxu1 %v2222_v6  ;;  %928 = vmatprep.subr.mxu0 %v2222_v6  ;;  %s1103_s22 = sshra.s32 %s2392_s18, 3  ;;  %s1205_s23 = scalar_lea.vmem %s2123_s17, %s2392_s18 }
 0x10e   : > { %712 = vmatpush1.msra.mxu1 %v2227_v7  ;;  %929 = vmatpush1.msra.mxu0 %v2227_v7  ;;  %s1858_s20 = sshll.u32 %s1103_s22, 4  ;;  %s1870_s9 = smul.u32 4294967272, %s1989_s25 }
 0x10f   : > { %713 = vmatprep.subr.mxu1 %v2232_v8  ;;  %930 = vmatprep.subr.mxu0 %v2232_v8  ;;  %s1871_s10 = smul.u32 4294967256, %s1989_s25 }
 0x110   : > { %714 = vmatpush1.msra.mxu1 %v2237_v9  ;;  %931 = vmatpush1.msra.mxu0 %v2237_v9  ;;  %s1860_s12 = sadd.s32 40, %s1870_s9  ;;  %s1663_s24 = scalar_lea.vmem %s2123_s17, %s1870_s9 }
 0x111   : > { %1795 = vmatmul.mubr.msk.f32.vlgmr.msra.gmra.mxu1 %vm621_vm1, %v660_v10  ;;  %809 = vmatprep.subr.mxu1 %v2165_v57  ;;  %s1210_s1 = sshra.s32 %s1860_s12, 3  ;;  %s1863_s16 = sadd.s32 48, %s1871_s10 }
 0x112   : > { %810 = vmatpush1.msra.mxu1 %v2168_v58  ;;  %857 = vmatprep.mubr.f32.mxu1 %v2003_v0  ;;  %s1669_s11 = scalar_lea.vmem %s2123_s17, %s1871_s10  ;;  %s1872_s18 = smul.u32 4294967240, %s1989_s25 }
 0x113   : > { %811 = vmatprep.subr.mxu1 %v2171_v59  ;;  %1128 = vmatprep.subr.mxu0 %v2165_v57 }
 0x114   : > { %812 = vmatpush1.msra.mxu1 %v2177_v60  ;;  %s1866_s22 = sadd.s32 56, %s1872_s18  ;;  %s1675_s9 = scalar_lea.vmem %s2123_s17, %s1872_s18 }
 0x115   : > { %813 = vmatprep.subr.mxu1 %v2182_v61 }
 0x116   : > { %814 = vmatpush1.msra.mxu1 %v2187_v62 }
 0x117   : > { %815 = vmatprep.subr.mxu1 %v2192_v63 }
 0x118   : > { %816 = vmatpush1.msra.mxu1 %v2197_v1 }
 0x119   : > { %817 = vmatprep.subr.mxu1 %v2202_v2 }
 0x11a   : > { %818 = vmatpush1.msra.mxu1 %v2207_v3 }
 0x11b   : > { %819 = vmatprep.subr.mxu1 %v2212_v4 }
 0x11c   : > { %820 = vmatpush1.msra.mxu1 %v2217_v5 }
 0x11d   : > { %821 = vmatprep.subr.mxu1 %v2222_v6 }
 0x11e   : > { %822 = vmatpush1.msra.mxu1 %v2227_v7 }
 0x11f   : > { %823 = vmatprep.subr.mxu1 %v2232_v8 }
 0x120   : > { %824 = vmatpush1.msra.mxu1 %v2237_v9 }
 0x121   : > { %1022 = vmatprep.subr.mxu1 %v2165_v57 }
 0x1d1   : > { %v749_v14 = vpop.f32.mrf.mxu1 }
 0x1d2   : > { %v750_v15 = vadd.f32 %v749_v14, %v2272_v12 }
 0x1d3   : > { %v751_v24 = vpop.f32.mrf.mxu1 }
 0x1d4   : > { %v754_v16 = vadd.f32 %v750_v15, %v667_v13  ;;  %v752_v25 = vadd.f32 %v751_v24, %v2277_v23 }
 0x1d6   : > { %v1796_v17 = vmul.f32 -1.442695, %v754_v16 }
 0x1d8   : > { %1915 = vpow2.f32 %v1796_v17 }
 0x1e5   : > { %v1916_v20 = vpop.eup %1915 }
 0x1e6   : > { %v758_v22 = vadd.f32 1.0, %v1916_v20 }
 0x1e8   : > { %1917 = vrcp.f32 %v758_v22  ;;  %v897_v22 = vld [vmem:[%s895_s3 + $0x8] sm:$0xff]  ;;  %s1861_s3 = sshll.u32 %s1210_s1, 4 }
 0x1f5   : > { %v1918_v19 = vpop.eup %1917 }
 0x1f6   : > { %v761_v27 = vmul.f32 %v1918_v19, %v752_v25  ;;  %v764_v18 = vsub.f32 1.0, %v1918_v19 }
 0x1f8   : > { %v762_v28 = vadd.f32 %v761_v27, %v668_v26 }
 0x1fa   : > { %1919 = vtanh.f32 %v762_v28 }
 0x207   : > { %v1920_v29 = vpop.eup %1919 }
 0x208   : > { %766 = vrot.lane.b32.xlu0 %v1920_v29, %s2004_s8 }
 0x20c   : > { %770 = vrot.lane.b32.xlu0 %v660_v10, %s2004_s8 }
 0x27a   : > { %v767_v30 = vpop.permute.xlu0 %766 }
 0x27b   : > { %v769_v31 = vmul.f32 %v767_v30, %v764_v18 }
 0x27e   : > { %v771_v21 = vpop.permute.xlu0 %770 }
 0x27f   : > { %v773_v32 = vmul.f32 %v1918_v19, %v771_v21 }
 0x281   : > { %v774_v33 = vadd.f32 %v773_v32, %v769_v31 }
 0x283   : > { %776 = vrot.lane.b32.xlu1 %v774_v33, %s2004_s8 }
 0x2f5   : > { %v777_v34 = vpop.permute.xlu1 %776 }
 0x2f6   : > { %780 = vst.msk [vmem:[%s779_s13] sm:$0xff] %vm621_vm1, %v777_v34  ;;  %1800 = vmatmul.mubr.msk.f32.vlgmr.msra.gmra.mxu1 %vm621_vm1, %v777_v34  ;;  %s1001_s13 = scalar_lea.vmem [#allocation2], %s1857_s19  ;;  %s1317_s19 = sshra.s32 %s1863_s16, 3 }
 0x2f7   : > { %1023 = vmatpush1.msra.mxu1 %v2168_v58  ;;  %1070 = vmatprep.mubr.f32.mxu1 %v2003_v0  ;;  %v1002_v21 = vld [vmem:[%s1001_s13] sm:$0xff] }
 0x2f8   : > { %1024 = vmatprep.subr.mxu1 %v2171_v59 }
 0x2f9   : > { %1025 = vmatpush1.msra.mxu1 %v2177_v60 }
 0x2fa   : > { %1026 = vmatprep.subr.mxu1 %v2182_v61 }
 0x2fb   : > { %1027 = vmatpush1.msra.mxu1 %v2187_v62 }
 0x2fc   : > { %1028 = vmatprep.subr.mxu1 %v2192_v63 }
 0x2fd   : > { %1029 = vmatpush1.msra.mxu1 %v2197_v1 }
 0x2fe   : > { %1030 = vmatprep.subr.mxu1 %v2202_v2 }
 0x2ff   : > { %1031 = vmatpush1.msra.mxu1 %v2207_v3 }
 0x300   : > { %1032 = vmatprep.subr.mxu1 %v2212_v4 }
 0x301   : > { %1033 = vmatpush1.msra.mxu1 %v2217_v5 }
 0x302   : > { %1034 = vmatprep.subr.mxu1 %v2222_v6 }
 0x303   : > { %1035 = vmatpush1.msra.mxu1 %v2227_v7 }
 0x304   : > { %1036 = vmatprep.subr.mxu1 %v2232_v8 }
 0x305   : > { %1037 = vmatpush1.msra.mxu1 %v2237_v9 }
 0x306   : > { %1235 = vmatprep.subr.mxu1 %v2165_v57 }
 0x3b6   : > { %v859_v36 = vpop.f32.mrf.mxu1 }
 0x3b7   : > { %v860_v37 = vadd.f32 %v859_v36, %v2272_v12 }
 0x3b8   : > { %v861_v42 = vpop.f32.mrf.mxu1 }
 0x3b9   : > { %v864_v38 = vadd.f32 %v860_v37, %v789_v35  ;;  %v862_v43 = vadd.f32 %v861_v42, %v2277_v23 }
 0x3bb   : > { %v1801_v39 = vmul.f32 -1.442695, %v864_v38 }
 0x3bd   : > { %1921 = vpow2.f32 %v1801_v39  ;;  %v1003_v39 = vld [vmem:[%s1001_s13 + $0x8] sm:$0xff]  ;;  %s1864_s13 = sshll.u32 %s1317_s19, 4 }
 0x3ca   : > { %v1922_v40 = vpop.eup %1921 }
 0x3cb   : > { %v868_v41 = vadd.f32 1.0, %v1922_v40 }
 0x3cd   : > { %1923 = vrcp.f32 %v868_v41 }
 0x3da   : > { %v1924_v44 = vpop.eup %1923 }
 0x3db   : > { %v871_v46 = vmul.f32 %v1924_v44, %v862_v43  ;;  %v874_v49 = vsub.f32 1.0, %v1924_v44  ;;  %v880_v51 = vmul.f32 %v1924_v44, %v774_v33 }
 0x3dd   : > { %v872_v47 = vadd.f32 %v871_v46, %v790_v45 }
 0x3df   : > { %1925 = vtanh.f32 %v872_v47 }
 0x3ec   : > { %v1926_v48 = vpop.eup %1925 }
 0x3ed   : > { %876 = vrot.lane.b32.xlu1 %v1926_v48, %s2004_s8 }
 0x45f   : > { %v877_v50 = vpop.permute.xlu1 %876 }
 0x460   : > { %v879_v52 = vmul.f32 %v877_v50, %v874_v49 }
 0x462   : > { %v881_v53 = vadd.f32 %v880_v51, %v879_v52 }
 0x464   : > { %883 = vrot.lane.b32.xlu0 %v881_v53, %s2004_s8 }
 0x4d6   : > { %v884_v54 = vpop.permute.xlu0 %883 }
 0x4d7   : > { %1803 = vst.msk [vmem:[%s1642_s21 + $0x8] sm:$0xff] %vm621_vm1, %v884_v54  ;;  %1807 = vmatmul.mubr.msk.f32.vlgmr.msra.gmra.mxu0 %vm621_vm1, %v884_v54  ;;  %s1107_s21 = scalar_lea.vmem [#allocation2], %s1858_s20  ;;  %s1424_s20 = sshra.s32 %s1866_s22, 3 }
 0x4d8   : > { %1129 = vmatpush1.msra.mxu0 %v2168_v58  ;;  %1176 = vmatprep.mubr.f32.mxu0 %v2003_v0  ;;  %v1108_v49 = vld [vmem:[%s1107_s21] sm:$0xff] }
 0x4d9   : > { %1130 = vmatprep.subr.mxu0 %v2171_v59 }
 0x4da   : > { %1131 = vmatpush1.msra.mxu0 %v2177_v60 }
 0x4db   : > { %1132 = vmatprep.subr.mxu0 %v2182_v61 }
 0x4dc   : > { %1133 = vmatpush1.msra.mxu0 %v2187_v62 }
 0x4dd   : > { %1134 = vmatprep.subr.mxu0 %v2192_v63 }
 0x4de   : > { %1135 = vmatpush1.msra.mxu0 %v2197_v1 }
 0x4df   : > { %1136 = vmatprep.subr.mxu0 %v2202_v2 }
 0x4e0   : > { %1137 = vmatpush1.msra.mxu0 %v2207_v3 }
 0x4e1   : > { %1138 = vmatprep.subr.mxu0 %v2212_v4 }
 0x4e2   : > { %1139 = vmatpush1.msra.mxu0 %v2217_v5 }
 0x4e3   : > { %1140 = vmatprep.subr.mxu0 %v2222_v6 }
 0x4e4   : > { %1141 = vmatpush1.msra.mxu0 %v2227_v7 }
 0x4e5   : > { %1142 = vmatprep.subr.mxu0 %v2232_v8 }
 0x4e6   : > { %1143 = vmatpush1.msra.mxu0 %v2237_v9 }
 0x4e7   : > { %1342 = vmatprep.subr.mxu0 %v2165_v57 }
 0x597   : > { %v966_v56 = vpop.f32.mrf.mxu0 }
 0x598   : > { %v967_v10 = vadd.f32 %v966_v56, %v2272_v12 }
 0x599   : > { %v968_v16 = vpop.f32.mrf.mxu0 }
 0x59a   : > { %v971_v11 = vadd.f32 %v967_v10, %v896_v55  ;;  %v969_v17 = vadd.f32 %v968_v16, %v2277_v23 }
 0x59c   : > { %v1808_v13 = vmul.f32 -1.442695, %v971_v11 }
 0x59e   : > { %1927 = vpow2.f32 %v1808_v13  ;;  %v1109_v13 = vld [vmem:[%s1107_s21 + $0x8] sm:$0xff]  ;;  %s1867_s21 = sshll.u32 %s1424_s20, 4 }
 0x5ab   : > { %v1928_v14 = vpop.eup %1927 }
 0x5ac   : > { %v975_v15 = vadd.f32 1.0, %v1928_v14 }
 0x5ae   : > { %1929 = vrcp.f32 %v975_v15 }
 0x5bb   : > { %v1930_v20 = vpop.eup %1929 }
 0x5bc   : > { %v978_v24 = vmul.f32 %v1930_v20, %v969_v17  ;;  %v981_v26 = vsub.f32 1.0, %v1930_v20  ;;  %v987_v28 = vmul.f32 %v1930_v20, %v881_v53 }
 0x5be   : > { %v979_v25 = vadd.f32 %v978_v24, %v897_v22 }
 0x5c0   : > { %1931 = vtanh.f32 %v979_v25 }
 0x5cd   : > { %v1932_v19 = vpop.eup %1931 }
 0x5ce   : > { %983 = vrot.lane.b32.xlu1 %v1932_v19, %s2004_s8 }
 0x640   : > { %v984_v27 = vpop.permute.xlu1 %983 }
 0x641   : > { %v986_v29 = vmul.f32 %v984_v27, %v981_v26 }
 0x643   : > { %v988_v30 = vadd.f32 %v987_v28, %v986_v29 }
 0x645   : > { %990 = vrot.lane.b32.xlu0 %v988_v30, %s2004_s8 }
 0x6b7   : > { %v991_v18 = vpop.permute.xlu0 %990 }
 0x6b8   : > { %1810 = vst.msk [vmem:[%s1648_s5 + $0x10] sm:$0xff] %vm621_vm1, %v991_v18  ;;  %1814 = vmatmul.mubr.msk.f32.vlgmr.msra.gmra.mxu1 %vm621_vm1, %v991_v18  ;;  %s1214_s5 = scalar_lea.vmem [#allocation2], %s1861_s3 }
 0x6b9   : > { %1236 = vmatpush1.msra.mxu1 %v2168_v58  ;;  %1283 = vmatprep.mubr.f32.mxu1 %v2003_v0 }
 0x6ba   : > { %1237 = vmatprep.subr.mxu1 %v2171_v59 }
 0x6bb   : > { %1238 = vmatpush1.msra.mxu1 %v2177_v60 }
 0x6bc   : > { %1239 = vmatprep.subr.mxu1 %v2182_v61 }
 0x6bd   : > { %1240 = vmatpush1.msra.mxu1 %v2187_v62 }
 0x6be   : > { %1241 = vmatprep.subr.mxu1 %v2192_v63 }
 0x6bf   : > { %1242 = vmatpush1.msra.mxu1 %v2197_v1 }
 0x6c0   : > { %1243 = vmatprep.subr.mxu1 %v2202_v2 }
 0x6c1   : > { %1244 = vmatpush1.msra.mxu1 %v2207_v3 }
 0x6c2   : > { %1245 = vmatprep.subr.mxu1 %v2212_v4 }
 0x6c3   : > { %1246 = vmatpush1.msra.mxu1 %v2217_v5 }
 0x6c4   : > { %1247 = vmatprep.subr.mxu1 %v2222_v6 }
 0x6c5   : > { %1248 = vmatpush1.msra.mxu1 %v2227_v7 }
 0x6c6   : > { %1249 = vmatprep.subr.mxu1 %v2232_v8 }
 0x6c7   : > { %1250 = vmatpush1.msra.mxu1 %v2237_v9 }
 0x6c8   : > { %1449 = vmatprep.subr.mxu1 %v2165_v57 }
 0x778   : > { %v1072_v31 = vpop.f32.mrf.mxu1 }
 0x779   : > { %v1073_v32 = vadd.f32 %v1072_v31, %v2272_v12 }
 0x77a   : > { %v1074_v37 = vpop.f32.mrf.mxu1 }
 0x77b   : > { %v1077_v33 = vadd.f32 %v1073_v32, %v1002_v21  ;;  %v1075_v57 = vadd.f32 %v1074_v37, %v2277_v23 }
 0x77d   : > { %v1815_v34 = vmul.f32 -1.442695, %v1077_v33 }
 0x77f   : > { %1933 = vpow2.f32 %v1815_v34 }
 0x78c   : > { %v1934_v35 = vpop.eup %1933 }
 0x78d   : > { %v1081_v36 = vadd.f32 1.0, %v1934_v35 }
 0x78f   : > { %1935 = vrcp.f32 %v1081_v36 }
 0x79c   : > { %v1936_v38 = vpop.eup %1935 }
 0x79d   : > { %v1084_v40 = vmul.f32 %v1936_v38, %v1075_v57  ;;  %v1087_v43 = vsub.f32 1.0, %v1936_v38  ;;  %v1093_v45 = vmul.f32 %v1936_v38, %v988_v30 }
 0x79f   : > { %v1085_v41 = vadd.f32 %v1084_v40, %v1003_v39 }
 0x7a1   : > { %1937 = vtanh.f32 %v1085_v41 }
 0x7ae   : > { %v1938_v42 = vpop.eup %1937 }
 0x7af   : > { %1089 = vrot.lane.b32.xlu1 %v1938_v42, %s2004_s8 }
 0x821   : > { %v1090_v44 = vpop.permute.xlu1 %1089 }
 0x822   : > { %v1092_v46 = vmul.f32 %v1090_v44, %v1087_v43 }
 0x824   : > { %v1094_v47 = vadd.f32 %v1093_v45, %v1092_v46 }
 0x826   : > { %1096 = vrot.lane.b32.xlu0 %v1094_v47, %s2004_s8 }
 0x898   : > { %v1097_v48 = vpop.permute.xlu0 %1096 }
 0x899   : > { %1817 = vst.msk [vmem:[%s1653_s15 + $0x18] sm:$0xff] %vm621_vm1, %v1097_v48  ;;  %1821 = vmatmul.mubr.msk.f32.vlgmr.msra.gmra.mxu0 %vm621_vm1, %v1097_v48  ;;  %s1321_s15 = scalar_lea.vmem [#allocation2], %s1864_s13 }
 0x89a   : > { %1343 = vmatpush1.msra.mxu0 %v2168_v58  ;;  %1390 = vmatprep.mubr.f32.mxu0 %v2003_v0  ;;  %v1322_v30 = vld [vmem:[%s1321_s15] sm:$0xff]  ;;  %v1323_v57 = vld [vmem:[%s1321_s15 + $0x8] sm:$0xff] }
 0x89b   : > { %1344 = vmatprep.subr.mxu0 %v2171_v59 }
 0x89c   : > { %1345 = vmatpush1.msra.mxu0 %v2177_v60 }
 0x89d   : > { %1346 = vmatprep.subr.mxu0 %v2182_v61 }
 0x89e   : > { %1347 = vmatpush1.msra.mxu0 %v2187_v62 }
 0x89f   : > { %1348 = vmatprep.subr.mxu0 %v2192_v63 }
 0x8a0   : > { %1349 = vmatpush1.msra.mxu0 %v2197_v1 }
 0x8a1   : > { %1350 = vmatprep.subr.mxu0 %v2202_v2 }
 0x8a2   : > { %1351 = vmatpush1.msra.mxu0 %v2207_v3 }
 0x8a3   : > { %1352 = vmatprep.subr.mxu0 %v2212_v4 }
 0x8a4   : > { %1353 = vmatpush1.msra.mxu0 %v2217_v5 }
 0x8a5   : > { %1354 = vmatprep.subr.mxu0 %v2222_v6 }
 0x8a6   : > { %1355 = vmatpush1.msra.mxu0 %v2227_v7 }
 0x8a7   : > { %1356 = vmatprep.subr.mxu0 %v2232_v8 }
 0x8a8   : > { %1357 = vmatpush1.msra.mxu0 %v2237_v9 }
 0x959   : > { %v1178_v50 = vpop.f32.mrf.mxu0 }
 0x95a   : > { %v1179_v51 = vadd.f32 %v1178_v50, %v2272_v12 }
 0x95b   : > { %v1180_v56 = vpop.f32.mrf.mxu0 }
 0x95c   : > { %v1183_v52 = vadd.f32 %v1179_v51, %v1108_v49  ;;  %v1181_v10 = vadd.f32 %v1180_v56, %v2277_v23 }
 0x95e   : > { %v1822_v53 = vmul.f32 -1.442695, %v1183_v52 }
 0x960   : > { %1939 = vpow2.f32 %v1822_v53 }
 0x96d   : > { %v1940_v54 = vpop.eup %1939 }
 0x96e   : > { %v1187_v55 = vadd.f32 1.0, %v1940_v54 }
 0x970   : > { %1941 = vrcp.f32 %v1187_v55 }
 0x97d   : > { %v1942_v11 = vpop.eup %1941 }
 0x97e   : > { %v1190_v14 = vmul.f32 %v1942_v11, %v1181_v10  ;;  %v1193_v17 = vsub.f32 1.0, %v1942_v11  ;;  %v1199_v22 = vmul.f32 %v1942_v11, %v1094_v47 }
 0x980   : > { %v1191_v15 = vadd.f32 %v1190_v14, %v1109_v13 }
 0x982   : > { %1943 = vtanh.f32 %v1191_v15 }
 0x98f   : > { %v1944_v16 = vpop.eup %1943 }
 0x990   : > { %1195 = vrot.lane.b32.xlu1 %v1944_v16, %s2004_s8 }
 0xa02   : > { %v1196_v20 = vpop.permute.xlu1 %1195 }
 0xa03   : > { %v1198_v24 = vmul.f32 %v1196_v20, %v1193_v17 }
 0xa05   : > { %v1200_v25 = vadd.f32 %v1199_v22, %v1198_v24 }
 0xa07   : > { %1202 = vrot.lane.b32.xlu0 %v1200_v25, %s2004_s8 }
 0xa79   : > { %v1203_v19 = vpop.permute.xlu0 %1202 }
 0xa7a   : > { %1206 = vst.msk [vmem:[%s1205_s23] sm:$0xff] %vm621_vm1, %v1203_v19  ;;  %1826 = vmatmul.mubr.msk.f32.vlgmr.msra.gmra.mxu1 %vm621_vm1, %v1203_v19  ;;  %s1428_s23 = scalar_lea.vmem [#allocation2], %s1867_s21 }
 0xa7b   : > { %1450 = vmatpush1.msra.mxu1 %v2168_v58  ;;  %1497 = vmatprep.mubr.f32.mxu1 %v2003_v0  ;;  %v1215_v0 = vld [vmem:[%s1214_s5] sm:$0xff]  ;;  %v1430_v10 = vld [vmem:[%s1428_s23 + $0x8] sm:$0xff] }
 0xa7c   : > { %1451 = vmatprep.subr.mxu1 %v2171_v59  ;;  %v1429_v47 = vld [vmem:[%s1428_s23] sm:$0xff] }
 0xa7d   : > { %1452 = vmatpush1.msra.mxu1 %v2177_v60 }
 0xa7e   : > { %1453 = vmatprep.subr.mxu1 %v2182_v61 }
 0xa7f   : > { %1454 = vmatpush1.msra.mxu1 %v2187_v62 }
 0xa80   : > { %1455 = vmatprep.subr.mxu1 %v2192_v63 }
 0xa81   : > { %1456 = vmatpush1.msra.mxu1 %v2197_v1 }
 0xa82   : > { %1457 = vmatprep.subr.mxu1 %v2202_v2 }
 0xa83   : > { %1458 = vmatpush1.msra.mxu1 %v2207_v3 }
 0xa84   : > { %1459 = vmatprep.subr.mxu1 %v2212_v4  ;;  %v1216_v4 = vld [vmem:[%s1214_s5 + $0x8] sm:$0xff] }
 0xa85   : > { %1460 = vmatpush1.msra.mxu1 %v2217_v5 }
 0xa86   : > { %1461 = vmatprep.subr.mxu1 %v2222_v6 }
 0xa87   : > { %1462 = vmatpush1.msra.mxu1 %v2227_v7 }
 0xa88   : > { %1463 = vmatprep.subr.mxu1 %v2232_v8 }
 0xa89   : > { %1464 = vmatpush1.msra.mxu1 %v2237_v9 }
 0xb3a   : > { %v1285_v58 = vpop.f32.mrf.mxu1 }
 0xb3b   : > { %v1286_v59 = vadd.f32 %v1285_v58, %v2272_v12 }
 0xb3c   : > { %v1287_v1 = vpop.f32.mrf.mxu1 }
 0xb3d   : > { %v1290_v60 = vadd.f32 %v1286_v59, %v1215_v0  ;;  %v1288_v2 = vadd.f32 %v1287_v1, %v2277_v23 }
 0xb3f   : > { %v1827_v61 = vmul.f32 -1.442695, %v1290_v60 }
 0xb41   : > { %1945 = vpow2.f32 %v1827_v61 }
 0xb4e   : > { %v1946_v62 = vpop.eup %1945 }
 0xb4f   : > { %v1294_v63 = vadd.f32 1.0, %v1946_v62 }
 0xb51   : > { %1947 = vrcp.f32 %v1294_v63 }
 0xb5e   : > { %v1948_v3 = vpop.eup %1947 }
 0xb5f   : > { %v1297_v5 = vmul.f32 %v1948_v3, %v1288_v2  ;;  %v1300_v8 = vsub.f32 1.0, %v1948_v3  ;;  %v1306_v26 = vmul.f32 %v1948_v3, %v1200_v25 }
 0xb61   : > { %v1298_v6 = vadd.f32 %v1297_v5, %v1216_v4 }
 0xb63   : > { %1949 = vtanh.f32 %v1298_v6 }
 0xb70   : > { %v1950_v7 = vpop.eup %1949 }
 0xb71   : > { %1302 = vrot.lane.b32.xlu1 %v1950_v7, %s2004_s8 }
 0xbe3   : > { %v1303_v9 = vpop.permute.xlu1 %1302 }
 0xbe4   : > { %v1305_v27 = vmul.f32 %v1303_v9, %v1300_v8 }
 0xbe6   : > { %v1307_v28 = vadd.f32 %v1306_v26, %v1305_v27 }
 0xbe8   : > { %1309 = vrot.lane.b32.xlu0 %v1307_v28, %s2004_s8 }
 0xc5a   : > { %v1310_v29 = vpop.permute.xlu0 %1309 }
 0xc5b   : > { %1829 = vst.msk [vmem:[%s1663_s24 + $0x28] sm:$0xff] %vm621_vm1, %v1310_v29  ;;  %1833 = vmatmul.mubr.msk.f32.vlgmr.msra.gmra.mxu0 %vm621_vm1, %v1310_v29 }
 0xd1b   : > { %v1392_v18 = vpop.f32.mrf.mxu0 }
 0xd1c   : > { %v1393_v21 = vadd.f32 %v1392_v18, %v2272_v12 }
 0xd1d   : > { %v1394_v35 = vpop.f32.mrf.mxu0 }
 0xd1e   : > { %v1397_v31 = vadd.f32 %v1393_v21, %v1322_v30  ;;  %v1395_v36 = vadd.f32 %v1394_v35, %v2277_v23 }
 0xd20   : > { %v1834_v32 = vmul.f32 -1.442695, %v1397_v31 }
 0xd22   : > { %1951 = vpow2.f32 %v1834_v32 }
 0xd2f   : > { %v1952_v33 = vpop.eup %1951 }
 0xd30   : > { %v1401_v34 = vadd.f32 1.0, %v1952_v33 }
 0xd32   : > { %1953 = vrcp.f32 %v1401_v34 }
 0xd3f   : > { %v1954_v37 = vpop.eup %1953 }
 0xd40   : > { %v1404_v38 = vmul.f32 %v1954_v37, %v1395_v36  ;;  %v1407_v41 = vsub.f32 1.0, %v1954_v37  ;;  %v1413_v43 = vmul.f32 %v1954_v37, %v1307_v28 }
 0xd42   : > { %v1405_v39 = vadd.f32 %v1404_v38, %v1323_v57 }
 0xd44   : > { %1955 = vtanh.f32 %v1405_v39 }
 0xd51   : > { %v1956_v40 = vpop.eup %1955 }
 0xd52   : > { %1409 = vrot.lane.b32.xlu1 %v1956_v40, %s2004_s8 }
 0xdc4   : > { %v1410_v42 = vpop.permute.xlu1 %1409 }
 0xdc5   : > { %v1412_v44 = vmul.f32 %v1410_v42, %v1407_v41 }
 0xdc7   : > { %v1414_v45 = vadd.f32 %v1413_v43, %v1412_v44 }
 0xdc9   : > { %1416 = vrot.lane.b32.xlu0 %v1414_v45, %s2004_s8 }
 0xe3b   : > { %v1417_v46 = vpop.permute.xlu0 %1416 }
 0xe3c   : > { %1836 = vst.msk [vmem:[%s1669_s11 + $0x30] sm:$0xff] %vm621_vm1, %v1417_v46  ;;  %1840 = vmatmul.mubr.msk.f32.vlgmr.msra.gmra.mxu1 %vm621_vm1, %v1417_v46 }
 0xefc   : > { %v1499_v48 = vpop.f32.mrf.mxu1 }
 0xefd   : > { %v1500_v49 = vadd.f32 %v1499_v48, %v2272_v12 }
 0xefe   : > { %v1501_v54 = vpop.f32.mrf.mxu1 }
 0xeff   : > { %v1504_v50 = vadd.f32 %v1500_v49, %v1429_v47  ;;  %v1502_v55 = vadd.f32 %v1501_v54, %v2277_v23 }
 0xf01   : > { %v1841_v51 = vmul.f32 -1.442695, %v1504_v50 }
 0xf03   : > { %1957 = vpow2.f32 %v1841_v51 }
 0xf10   : > { %v1958_v52 = vpop.eup %1957 }
 0xf11   : > { %v1508_v53 = vadd.f32 1.0, %v1958_v52 }
 0xf13   : > { %1959 = vrcp.f32 %v1508_v53 }
 0xf20   : > { %v1960_v56 = vpop.eup %1959 }
 0xf21   : > { %v1511_v11 = vmul.f32 %v1960_v56, %v1502_v55  ;;  %v1514_v12 = vsub.f32 1.0, %v1960_v56  ;;  %v1520_v16 = vmul.f32 %v1960_v56, %v1414_v45 }
 0xf23   : > { %v1512_v13 = vadd.f32 %v1511_v11, %v1430_v10 }
 0xf25   : > { %1961 = vtanh.f32 %v1512_v13 }
 0xf32   : > { %v1962_v14 = vpop.eup %1961 }
 0xf33   : > { %1516 = vrot.lane.b32.xlu1 %v1962_v14, %s2004_s8 }
 0xfa5   : > { %v1517_v15 = vpop.permute.xlu1 %1516 }
 0xfa6   : > { %v1519_v17 = vmul.f32 %v1517_v15, %v1514_v12 }
 0xfa8   : > { %v1521_v20 = vadd.f32 %v1520_v16, %v1519_v17 }
 0xfaa   : > { %1523 = vrot.lane.b32.xlu0 %v1521_v20, %s2004_s8 }
0x101c   : > { %v1524_v22 = vpop.permute.xlu0 %1523 }
0x101d   : > { %1843 = vst.msk [vmem:[%s1675_s9 + $0x38] sm:$0xff] %vm621_vm1, %v1524_v22  ;;  %1528 = vst.msk [vmem:[#allocation3] sm:$0xff] %vm621_vm1, %v1524_v22 }
0x101e   : > { %1529 = vst.msk [vmem:[%s2106_s14] sm:$0xff] %vm621_vm1, %v1524_v22 }
0x101f PF: > { %s18_s28 = sadd.s32 1, %s2001_s28   ;;  %s2486_s24 = smov %s1993_s26 }
0x1020   : > { %p15_p8 = scmp.ge.s32.totalorder %s18_s28, 6   ;;  %s2487_s25 = smov %s1997_s27 }
0x1021   : > { %s2488_s26 = smov %s2491_s29  ;;  %s2489_s27 = smov %s2495_s30 }
0x1022   :  { %17 = sbr.rel (!%p15_p8) target bundleno = 4 (0x4), region = 121 }

// kernel: seq2seq_forward.4
= control target key start
LH: loop header
LB: loop body
LE: loop exit
PB: predicated region body
PF: predicated region fallthrough
CT: control target
= control target key end

     0   :  { %v3925_v4 = vmov 0.0   ;;  %vm123_vm0 = vcmask 261120   ;;  %s3917_s0 = inlined_call_operand.vmem [shape: f32[64,32], index: 0, kind: input, shape index: {}]   ;;  %s3918_s1 = inlined_call_operand.vmem [shape: f32[1,32,384], index: 1, kind: input, shape index: {}]   ;;  %s3919_s2 = inlined_call_operand.vmem [shape: f32[1,1,384], index: 2, kind: input, shape index: {}]   ;;  %s3920_s3 = inlined_call_operand.vmem [shape: f32[1,128,384], index: 3, kind: input, shape index: {}]   ;;  %s3921_s4 = inlined_call_operand.vmem [shape: f32[1,1,384], index: 4, kind: input, shape index: {}]   ;;  %s3922_s5 = inlined_call_operand.vmem [shape: f32[1,8,128], index: 5, kind: input, shape index: {}]   ;;  %s3923_s6 = inlined_call_operand.vmem [shape: f32[1,64,128], index: 6, kind: output, shape index: {0}]   ;;  %s3924_s7 = inlined_call_operand.hbm [shape: f32[1,8,128], index: 7, kind: output, shape index: {1}]  }
   0x1   :  { %v104_v0 = vld [vmem:[%s3918_s1 + $0x50] sm:$0xff]  ;;  %v103_v1 = vld [vmem:[%s3918_s1 + $0x48] sm:$0xff]  ;;  %v101_v2 = vld [vmem:[%s3918_s1 + $0x38] sm:$0xff]  ;;  %212 = vmatprep.mubr.f32.mxu0 %v3925_v4 }
   0x2   :  { %172 = vmatprep.subr.mxu0 %v104_v0  ;;  %v100_v3 = vld [vmem:[%s3918_s1 + $0x30] sm:$0xff]  ;;  %v98_v5 = vld [vmem:[%s3918_s1 + $0x20] sm:$0xff]  ;;  %v97_v7 = vld [vmem:[%s3918_s1 + $0x18] sm:$0xff] }
   0x3   :  { %173 = vmatpush1.msra.mxu0 %v103_v1  ;;  %v86_v6 = vld [vmem:[%s3917_s0] sm:$0xff]  ;;  %v95_v8 = vld [vmem:[%s3918_s1 + $0x8] sm:$0xff]  ;;  %v2654_v10 = vld [vmem:[%s3920_s3 + $0x170] sm:$0xff] }
   0x4   :  { %174 = vmatprep.subr.mxu0 %v101_v2  ;;  %2134 = vmatprep.mubr.msk.f32.mxu1 %vm123_vm0, %v86_v6  ;;  %v94_v9 = vld [vmem:[%s3918_s1] sm:$0xff]  ;;  %3953 = vst [vmem:[#allocation7_spill] sm:$0xff] %v2654_v10  ;;  %v2659_v11 = vld [vmem:[%s3920_s3 + $0x168] sm:$0xff]  ;;  %v2664_v12 = vld [vmem:[%s3920_s3 + $0x158] sm:$0xff] }
   0x5   :  { %175 = vmatpush1.msra.mxu0 %v100_v3  ;;  %v2671_v13 = vld [vmem:[%s3920_s3 + $0x150] sm:$0xff]  ;;  %v2678_v14 = vld [vmem:[%s3917_s0 + $0x8] sm:$0xff]  ;;  %v2683_v15 = vld [vmem:[%s3920_s3 + $0x140] sm:$0xff] }
   0x6   :  { %176 = vmatprep.subr.mxu0 %v98_v5  ;;  %v2689_v16 = vld [vmem:[%s3920_s3 + $0x138] sm:$0xff]  ;;  %v2695_v17 = vld [vmem:[%s3920_s3 + $0x128] sm:$0xff]  ;;  %v2703_v18 = vld [vmem:[%s3920_s3 + $0x120] sm:$0xff] }
   0x7   :  { %177 = vmatpush1.msra.mxu0 %v97_v7  ;;  %v105_v19 = vld [vmem:[%s3918_s1 + $0x58] sm:$0xff]  ;;  %v2713_v20 = vld [vmem:[%s3917_s0 + $0x10] sm:$0xff]  ;;  %v2724_v22 = vld [vmem:[%s3920_s3 + $0x108] sm:$0xff] }
   0x8   :  { %178 = vmatprep.subr.mxu0 %v95_v8  ;;  %v2718_v21 = vld [vmem:[%s3920_s3 + $0x110] sm:$0xff]  ;;  %2126 = vmatprep.subr.mxu1 %v105_v19  ;;  %v2730_v23 = vld [vmem:[%s3920_s3 + $0xf8] sm:$0xff]  ;;  %v102_v24 = vld [vmem:[%s3918_s1 + $0x40] sm:$0xff] }
   0x9   :  { %179 = vmatpush1.msra.mxu0 %v94_v9  ;;  %2127 = vmatpush3.msra.mxu1 %v105_v19  ;;  %v2741_v25 = vld [vmem:[%s3920_s3 + $0xf0] sm:$0xff]  ;;  %v2748_v26 = vld [vmem:[%s3917_s0 + $0x18] sm:$0xff]  ;;  %v2753_v27 = vld [vmem:[%s3920_s3 + $0xe0] sm:$0xff] }
   0xa   :  { %1939 = vmatmul.mubr.msk.f32.vlgmr.msra.gmra.mxu0 %vm123_vm0, %v86_v6  ;;  %471 = vmatprep.subr.mxu0 %v2654_v10  ;;  %v2759_v28 = vld [vmem:[%s3920_s3 + $0xd8] sm:$0xff]  ;;  %v2765_v29 = vld [vmem:[%s3920_s3 + $0xc8] sm:$0xff]  ;;  %v2776_v31 = vld [vmem:[%s3920_s3 + $0xc0] sm:$0xff] }
   0xb   :  { %472 = vmatpush1.msra.mxu0 %v2659_v11  ;;  %218 = vmatprep.mubr.f32.mxu0 %v3925_v4  ;;  %v99_v30 = vld [vmem:[%s3918_s1 + $0x28] sm:$0xff]  ;;  %v2783_v32 = vld [vmem:[%s3917_s0 + $0x20] sm:$0xff]  ;;  %v2788_v33 = vld [vmem:[%s3920_s3 + $0xb0] sm:$0xff] }
   0xc   :  { %473 = vmatprep.subr.mxu0 %v2664_v12  ;;  %2128 = vmatprep.subr.mxu1 %v102_v24  ;;  %v2794_v34 = vld [vmem:[%s3920_s3 + $0xa8] sm:$0xff] }
   0xd   :  { %474 = vmatpush1.msra.mxu0 %v2671_v13  ;;  %2129 = vmatpush3.msra.mxu1 %v102_v24 }
   0xe   :  { %1940 = vmatmul.mubr.msk.f32.gmra.mxu0 %vm123_vm0, %v2678_v14  ;;  %475 = vmatprep.subr.mxu0 %v2683_v15 }
   0xf   :  { %476 = vmatpush1.msra.mxu0 %v2689_v16  ;;  %224 = vmatprep.mubr.f32.mxu0 %v3925_v4 }
  0x10   :  { %477 = vmatprep.subr.mxu0 %v2695_v17  ;;  %2130 = vmatprep.subr.mxu1 %v99_v30 }
  0x11   :  { %478 = vmatpush1.msra.mxu0 %v2703_v18 }
  0x12   :  { %1941 = vmatmul.mubr.msk.f32.gmra.mxu0 %vm123_vm0, %v2713_v20  ;;  %479 = vmatprep.subr.mxu0 %v2718_v21 }
  0x13   :  { %480 = vmatpush1.msra.mxu0 %v2724_v22  ;;  %230 = vmatprep.mubr.f32.mxu0 %v3925_v4 }
  0x14   :  { %481 = vmatprep.subr.mxu0 %v2730_v23 }
  0x15   :  { %482 = vmatpush1.msra.mxu0 %v2741_v25 }
  0x16   :  { %1942 = vmatmul.mubr.msk.f32.gmra.mxu0 %vm123_vm0, %v2748_v26  ;;  %483 = vmatprep.subr.mxu0 %v2753_v27 }
  0x17   :  { %484 = vmatpush1.msra.mxu0 %v2759_v28  ;;  %236 = vmatprep.mubr.f32.mxu0 %v3925_v4 }
  0x18   :  { %485 = vmatprep.subr.mxu0 %v2765_v29 }
  0x19   :  { %13 = vsyncpa [#allocation5], 0  ;;  %486 = vmatpush1.msra.mxu0 %v2776_v31  ;;  %v2800_v35 = vld [vmem:[%s3920_s3 + $0x98] sm:$0xff]  ;;  %2131 = vmatpush3.msra.mxu1 %v99_v30  ;;  %v96_v36 = vld [vmem:[%s3918_s1 + $0x10] sm:$0xff]  ;;  %vm2580_vm1 = vmmov 0   ;;  %v108_v7 = vlaneseq  ;;  %s2581_s19 = smov [#allocation4]  }
  0x1a   :  { %1943 = vmatmul.mubr.msk.f32.gmra.mxu0 %vm123_vm0, %v2783_v32  ;;  %487 = vmatprep.subr.mxu0 %v2788_v33  ;;  %v2811_v37 = vld [vmem:[%s3920_s3 + $0x90] sm:$0xff]  ;;  %v2818_v38 = vld [vmem:[%s3917_s0 + $0x28] sm:$0xff]  ;;  %v2823_v39 = vld [vmem:[%s3920_s3 + $0x80] sm:$0xff] }
  0x1b   :  { %488 = vmatpush1.msra.mxu0 %v2794_v34  ;;  %242 = vmatprep.mubr.f32.mxu0 %v3925_v4  ;;  %v2829_v40 = vld [vmem:[%s3920_s3 + $0x78] sm:$0xff]  ;;  %v2835_v41 = vld [vmem:[%s3920_s3 + $0x68] sm:$0xff]  ;;  %v2843_v42 = vld [vmem:[%s3920_s3 + $0x60] sm:$0xff]  ;;  %v3109_v8 = vshrl.u32 %v108_v7, 7 }
  0x1c   :  { %489 = vmatprep.subr.mxu0 %v2800_v35  ;;  %2132 = vmatprep.subr.mxu1 %v96_v36  ;;  %v92_v43 = vld [vmem:[%s3917_s0 + $0x30] sm:$0xff]  ;;  %v2859_v45 = vld [vmem:[%s3920_s3 + $0x48] sm:$0xff]  ;;  %v2866_v46 = vld [vmem:[%s3920_s3 + $0x38] sm:$0xff] }
  0x1d   :  { %490 = vmatpush1.msra.mxu0 %v2811_v37  ;;  %2133 = vmatpush3.msra.mxu1 %v96_v36  ;;  %v2853_v44 = vld [vmem:[%s3920_s3 + $0x50] sm:$0xff]  ;;  %v2873_v47 = vld [vmem:[%s3920_s3 + $0x178] sm:$0xff]  ;;  %v2890_v50 = vld [vmem:[%s3920_s3 + $0x20] sm:$0xff]  ;;  %v110_v9 = vsub.s32 0, %v3109_v8 }
  0x1e   :  { %1944 = vmatmul.mubr.msk.f32.gmra.mxu0 %vm123_vm0, %v2818_v38  ;;  %491 = vmatprep.subr.mxu0 %v2823_v39  ;;  %v2880_v48 = vld [vmem:[%s3920_s3 + $0x30] sm:$0xff]  ;;  %v93_v49 = vld [vmem:[%s3917_s0 + $0x38] sm:$0xff]  ;;  %3955 = vst [vmem:[#allocation9_spill] sm:$0xff] %v2890_v50  ;;  %v2903_v52 = vld [vmem:[%s3920_s3 + $0x8] sm:$0xff] }
  0x1f   :  { %492 = vmatpush1.msra.mxu0 %v2829_v40  ;;  %248 = vmatprep.mubr.f32.mxu0 %v3925_v4  ;;  %3954 = vst [vmem:[#allocation8_spill] sm:$0xff] %v2880_v48  ;;  %v2896_v51 = vld [vmem:[%s3920_s3 + $0x18] sm:$0xff]  ;;  %3957 = vst [vmem:[#allocation11_spill] sm:$0xff] %v2903_v52  ;;  %v2909_v53 = vld [vmem:[%s3920_s3 + $0x160] sm:$0xff] }
  0x20   :  { %493 = vmatprep.subr.mxu0 %v2835_v41  ;;  %2146 = vmatprep.subr.mxu1 %v3925_v4  ;;  %3956 = vst [vmem:[#allocation10_spill] sm:$0xff] %v2896_v51  ;;  %v2916_v54 = vld [vmem:[%s3920_s3] sm:$0xff]  ;;  %v2928_v56 = vld [vmem:[%s3920_s3 + $0x148] sm:$0xff]  ;;  %v2937_v57 = vld [vmem:[%s3920_s3 + $0x130] sm:$0xff] }
  0x21   :  { %494 = vmatpush1.msra.mxu0 %v2843_v42  ;;  %2135 = vmatmul.mubr.msk.f32.vlgmr.msra.gmra.mxu1 %vm123_vm0, %v2678_v14  ;;  %3958 = vst [vmem:[#allocation12_spill] sm:$0xff] %v2916_v54  ;;  %v2923_v55 = vld [vmem:[%s3922_s5] sm:$0xff]  ;;  %v2945_v58 = vld [vmem:[%s3920_s3 + $0x118] sm:$0xff]  ;;  %v2966_v60 = vld [vmem:[%s3920_s3 + $0xe8] sm:$0xff] }
  0x22   :  { %1945 = vmatmul.mubr.msk.f32.gmra.mxu0 %vm123_vm0, %v92_v43  ;;  %495 = vmatprep.subr.mxu0 %v2853_v44  ;;  %v2955_v59 = vld [vmem:[%s3920_s3 + $0x100] sm:$0xff]  ;;  %v2975_v61 = vld [vmem:[%s3920_s3 + $0xd0] sm:$0xff]  ;;  %v2985_v62 = vld [vmem:[%s3920_s3 + $0xb8] sm:$0xff] }
  0x23   :  { %496 = vmatpush1.msra.mxu0 %v2859_v45  ;;  %254 = vmatprep.mubr.f32.mxu0 %v3925_v4  ;;  %v2994_v63 = vld [vmem:[%s3920_s3 + $0xa0] sm:$0xff]  ;;  %v3004_v0 = vld [vmem:[%s3920_s3 + $0x88] sm:$0xff]  ;;  %v3013_v1 = vld [vmem:[%s3920_s3 + $0x70] sm:$0xff] }
  0x24   :  { %497 = vmatprep.subr.mxu0 %v2866_v46  ;;  %2147 = vmatpush3.msra.mxu1 %v2873_v47  ;;  %v3022_v2 = vld [vmem:[%s3920_s3 + $0x58] sm:$0xff]  ;;  %v3031_v3 = vld [vmem:[%s3920_s3 + $0x40] sm:$0xff]  ;;  %v3040_v5 = vld [vmem:[%s3920_s3 + $0x28] sm:$0xff] }
  0x25   :  { %498 = vmatpush1.msra.mxu0 %v2880_v48  ;;  %2148 = vmatprep.subr.mxu1 %v3925_v4  ;;  %3959 = vst [vmem:[#allocation13_spill] sm:$0xff] %v3031_v3  ;;  %3960 = vst [vmem:[#allocation14_spill] sm:$0xff] %v3040_v5  ;;  %v3049_v6 = vld [vmem:[%s3920_s3 + $0x10] sm:$0xff]  ;;  %v106_v14 = vld [vmem:[%s3919_s2] sm:$0x7]  ;;  %s1882_s2 = sshll.u32 %s2581_s19, 4  ;;  %s1883_s2 = int_to_ptr.vmem [resolvable:$true] %s1882_s2 }
  0x26   :  { %1946 = vmatmul.mubr.msk.f32.gmra.mxu0 %vm123_vm0, %v93_v49  ;;  %499 = vmatprep.subr.mxu0 %v2890_v50  ;;  %3961 = vst [vmem:[#allocation15_spill] sm:$0xff] %v3049_v6  ;;  %s2557_s20 = scalar_lea.vmem %s1883_s2, 128  ;;  %p2562_p1 = scmp.lt.s32.totalorder %s1883_s2, %s1883_s2 }
  0x27   :  { %500 = vmatpush1.msra.mxu0 %v2896_v51  ;;  %535 = vmatprep.mubr.f32.mxu0 %v3925_v4  ;;  %p2558_p0 = scmp.ne.s32.totalorder %s1883_s2, %s2557_s20  ;;  %p2563_p2 = scmp.lt.s32.totalorder %s2557_s20, %s2557_s20 }
  0x28   :  { %501 = vmatprep.subr.mxu0 %v2903_v52  ;;  %2149 = vmatpush3.msra.mxu1 %v2909_v53 }
  0x29   :  { %502 = vmatpush1.msra.mxu0 %v2916_v54  ;;  %2150 = vmatprep.subr.mxu1 %v3925_v4  ;;  %p2564_p3 = por %p2563_p2, %p2562_p1 }
  0x2a   :  { %536 = vmatmul.mubr.f32.vlgmr.msra.gmra.mxu0 %v2923_v55  ;;  %2151 = vmatpush3.msra.mxu1 %v2928_v56 }
  0x2b   :  { %2152 = vmatprep.subr.mxu1 %v3925_v4  ;;  %2137 = vmatprep.mubr.msk.f32.mxu1 %vm123_vm0, %v2713_v20  ;;  %v114_v20 = vsub.s32 1, %v3109_v8  ;;  %p2565_p4 = pnand %p2564_p3, %p2558_p0 }
  0x2c   :  { %2153 = vmatpush3.msra.mxu1 %v2937_v57  ;;  %646 = vmatprep.subr.mxu0 %v2654_v10 }
  0x2d   :  { %2154 = vmatprep.subr.mxu1 %v3925_v4  ;;  %2138 = vmatmul.mubr.msk.f32.gmra.mxu1 %vm123_vm0, %v2748_v26  ;;  %v111_v26 = vrot.slane %v106_v14, %v110_v9 }
  0x2e   :  { %2155 = vmatpush3.msra.mxu1 %v2945_v58  ;;  %2140 = vmatprep.mubr.msk.f32.mxu1 %vm123_vm0, %v2783_v32  ;;  %v115_v32 = vrot.slane %v106_v14, %v114_v20 }
  0x2f   :  { %2156 = vmatprep.subr.mxu1 %v3925_v4  ;;  %647 = vmatpush1.msra.mxu0 %v2659_v11 }
  0x30   :  { %2157 = vmatpush3.msra.mxu1 %v2955_v59  ;;  %648 = vmatprep.subr.mxu0 %v2664_v12 }
  0x31   :  { %2158 = vmatprep.subr.mxu1 %v3925_v4  ;;  %2141 = vmatmul.mubr.msk.f32.gmra.mxu1 %vm123_vm0, %v2818_v38 }
  0x32   :  { %2159 = vmatpush3.msra.mxu1 %v2966_v60  ;;  %2143 = vmatprep.mubr.msk.f32.mxu1 %vm123_vm0, %v92_v43 }
  0x33   :  { %2160 = vmatprep.subr.mxu1 %v3925_v4  ;;  %649 = vmatpush1.msra.mxu0 %v2671_v13 }
  0x34   :  { %2161 = vmatpush3.msra.mxu1 %v2975_v61  ;;  %650 = vmatprep.subr.mxu0 %v2683_v15 }
  0x35   :  { %2162 = vmatprep.subr.mxu1 %v3925_v4  ;;  %2144 = vmatmul.mubr.msk.f32.gmra.mxu1 %vm123_vm0, %v93_v49 }
  0x36   :  { %2163 = vmatpush3.msra.mxu1 %v2985_v62  ;;  %2178 = vmatprep.mubr.msk.f32.mxu1 %vm2580_vm1, %v3925_v4 }
  0x37   :  { %2164 = vmatprep.subr.mxu1 %v3925_v4  ;;  %651 = vmatpush1.msra.mxu0 %v2689_v16 }
  0x38   :  { %2165 = vmatpush3.msra.mxu1 %v2994_v63  ;;  %652 = vmatprep.subr.mxu0 %v2695_v17 }
  0x39   :  { %2166 = vmatprep.subr.mxu1 %v3925_v4  ;;  %653 = vmatpush1.msra.mxu0 %v2703_v18 }
  0x3a   :  { %2167 = vmatpush3.msra.mxu1 %v3004_v0  ;;  %654 = vmatprep.subr.mxu0 %v2718_v21 }
  0x3b   :  { %2168 = vmatprep.subr.mxu1 %v3925_v4  ;;  %655 = vmatpush1.msra.mxu0 %v2724_v22 }
  0x3c   :  { %2169 = vmatpush3.msra.mxu1 %v3013_v1  ;;  %656 = vmatprep.subr.mxu0 %v2730_v23 }
  0x3d   :  { %2170 = vmatprep.subr.mxu1 %v3925_v4  ;;  %657 = vmatpush1.msra.mxu0 %v2741_v25 }
  0x3e   :  { %2171 = vmatpush3.msra.mxu1 %v3022_v2  ;;  %658 = vmatprep.subr.mxu0 %v2753_v27 }
  0x3f   :  { %2172 = vmatprep.subr.mxu1 %v3925_v4  ;;  %659 = vmatpush1.msra.mxu0 %v2759_v28 }
  0x40   :  { %2173 = vmatpush3.msra.mxu1 %v3031_v3  ;;  %660 = vmatprep.subr.mxu0 %v2765_v29 }
  0x41   :  { %2174 = vmatprep.subr.mxu1 %v3925_v4  ;;  %661 = vmatpush1.msra.mxu0 %v2776_v31 }
  0x42   :  { %2175 = vmatpush3.msra.mxu1 %v3040_v5  ;;  %662 = vmatprep.subr.mxu0 %v2788_v33 }
  0x43   :  { %2176 = vmatprep.subr.mxu1 %v3925_v4  ;;  %663 = vmatpush1.msra.mxu0 %v2794_v34 }
  0x44   :  { %2177 = vmatpush3.msra.mxu1 %v3049_v6  ;;  %664 = vmatprep.subr.mxu0 %v2800_v35 }
  0x45   :  { %2179 = vmatmul.mubr.f32.vlgmr.msra.gmra.mxu1 %v2923_v55  ;;  %2181 = vmatprep.subr.mxu1 %v3925_v4 }
  0x46   :  { %2182 = vmatpush3.msra.mxu1 %v2873_v47  ;;  %665 = vmatpush1.msra.mxu0 %v2811_v37 }
  0x47   :  { %2183 = vmatprep.subr.mxu1 %v3925_v4  ;;  %666 = vmatprep.subr.mxu0 %v2823_v39 }
  0x48   :  { %2184 = vmatpush3.msra.mxu1 %v2909_v53  ;;  %667 = vmatpush1.msra.mxu0 %v2829_v40 }
  0x49   :  { %2185 = vmatprep.subr.mxu1 %v3925_v4  ;;  %668 = vmatprep.subr.mxu0 %v2835_v41 }
  0x4a   :  { %2186 = vmatpush3.msra.mxu1 %v2928_v56  ;;  %669 = vmatpush1.msra.mxu0 %v2843_v42 }
  0x4b   :  { %2187 = vmatprep.subr.mxu1 %v3925_v4  ;;  %670 = vmatprep.subr.mxu0 %v2853_v44 }
  0x4c   :  { %2188 = vmatpush3.msra.mxu1 %v2937_v57  ;;  %671 = vmatpush1.msra.mxu0 %v2859_v45 }
  0x4d   :  { %2189 = vmatprep.subr.mxu1 %v3925_v4  ;;  %672 = vmatprep.subr.mxu0 %v2866_v46 }
  0x4e   :  { %2190 = vmatpush3.msra.mxu1 %v2945_v58  ;;  %673 = vmatpush1.msra.mxu0 %v2880_v48 }
  0x4f   :  { %2191 = vmatprep.subr.mxu1 %v3925_v4  ;;  %674 = vmatprep.subr.mxu0 %v2890_v50  ;;  %v118_v50 = vsub.s32 2, %v3109_v8 }
  0x50   :  { %2192 = vmatpush3.msra.mxu1 %v2955_v59  ;;  %675 = vmatpush1.msra.mxu0 %v2896_v51 }
  0x51   :  { %2193 = vmatprep.subr.mxu1 %v3925_v4  ;;  %676 = vmatprep.subr.mxu0 %v2903_v52 }
  0x52   :  { %2194 = vmatpush3.msra.mxu1 %v2966_v60  ;;  %677 = vmatpush1.msra.mxu0 %v2916_v54 }
  0x53   :  { %2195 = vmatprep.subr.mxu1 %v3925_v4  ;;  %710 = vmatprep.mubr.f32.mxu0 %v3925_v4 }
  0x54   :  { %2196 = vmatpush3.msra.mxu1 %v2975_v61  ;;  %2213 = vmatprep.mubr.msk.f32.mxu1 %vm2580_vm1, %v3925_v4 }
  0x55   :  { %2197 = vmatprep.subr.mxu1 %v3925_v4  ;;  %821 = vmatprep.subr.mxu0 %v2654_v10 }
  0x56   :  { %2198 = vmatpush3.msra.mxu1 %v2985_v62 }
  0x57   :  { %2199 = vmatprep.subr.mxu1 %v3925_v4 }
  0x58   :  { %2200 = vmatpush3.msra.mxu1 %v2994_v63 }
  0x59   :  { %2201 = vmatprep.subr.mxu1 %v3925_v4 }
  0x5a   :  { %2202 = vmatpush3.msra.mxu1 %v3004_v0 }
  0x5b   :  { %2203 = vmatprep.subr.mxu1 %v3925_v4 }
  0x5c   :  { %2204 = vmatpush3.msra.mxu1 %v3013_v1 }
  0x5d   :  { %2205 = vmatprep.subr.mxu1 %v3925_v4 }
  0x5e   :  { %2206 = vmatpush3.msra.mxu1 %v3022_v2 }
  0x5f   :  { %2207 = vmatprep.subr.mxu1 %v3925_v4 }
  0x60   :  { %2208 = vmatpush3.msra.mxu1 %v3031_v3 }
  0x61   :  { %2209 = vmatprep.subr.mxu1 %v3925_v4 }
  0x62   :  { %2210 = vmatpush3.msra.mxu1 %v3040_v5 }
  0x63   :  { %2211 = vmatprep.subr.mxu1 %v3925_v4 }
  0x64   :  { %2212 = vmatpush3.msra.mxu1 %v3049_v6 }
  0x65   :  { %2216 = vmatprep.subr.mxu1 %v3925_v4 }
  0xca   :  { %v214_v19 = vpop.f32.mrf.mxu0 }
  0xcc   :  { %v216_v24 = vpop.f32.mrf.mxu0 }
  0xce   :  { %v220_v30 = vpop.f32.mrf.mxu0 }
  0xcf   :  { %v3116_v36 = vadd.f32 %v220_v30, %v111_v26 }
  0xd0   :  { %v222_v38 = vpop.f32.mrf.mxu0 }
  0xd1   :  { %3962 = vst [vmem:[#allocation16_spill] sm:$0xff] %v3116_v36  ;;  %v3118_v43 = vadd.f32 %v222_v38, %v115_v32 }
  0xd2   :  { %v226_v49 = vpop.f32.mrf.mxu0 }
  0xd3   :  { %3963 = vst [vmem:[#allocation17_spill] sm:$0xff] %v3118_v43  ;;  %v3120_v7 = vadd.f32 %v226_v49, %v111_v26  ;;  %v119_v49 = vrot.slane %v106_v14, %v118_v50 }
  0xd4   :  { %v228_v4 = vpop.f32.mrf.mxu0 }
  0xd5   :  { %3964 = vst [vmem:[#allocation18_spill] sm:$0xff] %v3120_v7  ;;  %v3122_v10 = vadd.f32 %v228_v4, %v115_v32 }
  0xd6   :  { %v232_v6 = vpop.f32.mrf.mxu0 }
  0xd7   :  { %3965 = vst [vmem:[#allocation19_spill] sm:$0xff] %v3122_v10  ;;  %v3124_v54 = vadd.f32 %v232_v6, %v111_v26 }
  0xd8   :  { %v234_v52 = vpop.f32.mrf.mxu0 }
  0xd9   :  { %3966 = vst [vmem:[#allocation20_spill] sm:$0xff] %v3124_v54  ;;  %v3126_v5 = vadd.f32 %v234_v52, %v115_v32 }
  0xda   :  { %v238_v51 = vpop.f32.mrf.mxu0 }
  0xdb   :  { %3967 = vst [vmem:[#allocation21_spill] sm:$0xff] %v3126_v5  ;;  %v3129_v30 = vadd.f32 %v238_v51, %v111_v26  ;;  %v444_v51 = vld [vmem:[%s3921_s4] sm:$0x7] }
  0xdc   :  { %v240_v36 = vpop.f32.mrf.mxu0 }
  0xdd   :  { %3968 = vst [vmem:[#allocation22_spill] sm:$0xff] %v3129_v30  ;;  %v3131_v38 = vadd.f32 %v240_v36, %v115_v32 }
  0xde   :  { %v244_v43 = vpop.f32.mrf.mxu0 }
  0xdf   :  { %3969 = vst [vmem:[#allocation23_spill] sm:$0xff] %v3131_v38  ;;  %v3133_v7 = vadd.f32 %v244_v43, %v111_v26  ;;  %v3148_v43 = vrot.slane %v444_v51, %v110_v9 }
  0xe0   :  { %v246_v4 = vpop.f32.mrf.mxu0 }
  0xe1   :  { %3970 = vst [vmem:[#allocation24_spill] sm:$0xff] %v3133_v7  ;;  %v3135_v10 = vadd.f32 %v246_v4, %v115_v32  ;;  %v2136_v6 = vpop.f32.mrf.mxu1  ;;  %3976 = vst [vmem:[#allocation30_spill] sm:$0xff] %v3148_v43 }
  0xe2   :  { %v250_v54 = vpop.f32.mrf.mxu0  ;;  %v3137_v3 = vadd.f32 %v2136_v6, %v119_v49  ;;  %v215_v6 = vadd.f32 %v214_v19, %v111_v26 }
  0xe3   :  { %3971 = vst [vmem:[#allocation25_spill] sm:$0xff] %v3135_v10  ;;  %v3139_v52 = vadd.f32 %v250_v54, %v111_v26  ;;  %v327_v38 = vpop.f32.mrf.mxu1 }
  0xe4   :  { %3972 = vst [vmem:[#allocation26_spill] sm:$0xff] %v3137_v3  ;;  %v252_v5 = vpop.f32.mrf.mxu0 }
  0xe5   :  { %3973 = vst [vmem:[#allocation27_spill] sm:$0xff] %v3139_v52  ;;  %v3144_v8 = vadd.f32 %v252_v5, %v115_v32  ;;  %v3153_v52 = vrot.slane %v444_v51, %v114_v20 }
  0xe6   :  { %v256_v36 = vpop.f32.mrf.mxu0 }
  0xe7   :  { %3974 = vst [vmem:[#allocation28_spill] sm:$0xff] %v3144_v8  ;;  %v3146_v14 = vadd.f32 %v256_v36, %v111_v26 }
  0xe8   :  { %v258_v4 = vpop.f32.mrf.mxu0 }
  0xe9   :  { %3975 = vst [vmem:[#allocation29_spill] sm:$0xff] %v3146_v14  ;;  %v3150_v10 = vadd.f32 %v258_v4, %v115_v32  ;;  %v217_v4 = vadd.f32 %v216_v24, %v115_v32  ;;  %v3168_v32 = vrot.slane %v444_v51, %v118_v50  ;;  %v3984_v50 = vmov 0.0   ;;  %v3988_v51 = vld [vmem:[#allocation10_spill] sm:$0xff] }
  0xea   :  { %v537_v7 = vpop.f32.mrf.mxu0 }
  0xeb   :  { %3977 = vst [vmem:[#allocation31_spill] sm:$0xff] %v3150_v10  ;;  %v538_v54 = vadd.f32 %v537_v7, %v3148_v43 }
  0xec   :  { %v539_v30 = vpop.f32.mrf.mxu0 }
  0xed   :  { %v612_v3 = vadd.f32 %v538_v54, %v215_v6  ;;  %v2139_v48 = vpop.f32.mrf.mxu1  ;;  %v540_v36 = vadd.f32 %v539_v30, %v3153_v52 }
  0xee   :  { %v3155_v5 = vadd.f32 %v2139_v48, %v119_v49 }
  0xef   :  { %v1955_v8 = vmul.f32 -1.442695, %v612_v3  ;;  %v337_v9 = vpop.f32.mrf.mxu1  ;;  %v619_v26 = vadd.f32 %v540_v36, %v217_v4 }
  0xf0   :  { %3978 = vst [vmem:[#allocation32_spill] sm:$0xff] %v3155_v5  ;;  %v3158_v14 = vadd.f32 %v337_v9, %v119_v49  ;;  %v3996_v5 = vld [vmem:[#allocation17_spill] sm:$0xff] }
  0xf1   :  { %2429 = vpow2.f32 %v1955_v8  ;;  %v2142_v10 = vpop.f32.mrf.mxu1  ;;  %v1956_v48 = vmul.f32 -1.442695, %v619_v26 }
  0xf2   :  { %3979 = vst [vmem:[#allocation33_spill] sm:$0xff] %v3158_v14  ;;  %v3160_v19 = vadd.f32 %v2142_v10, %v119_v49 }
  0xf3   :  { %v347_v20 = vpop.f32.mrf.mxu1  ;;  %2431 = vpow2.f32 %v1956_v48 }
  0xf4   :  { %3980 = vst [vmem:[#allocation34_spill] sm:$0xff] %v3160_v19  ;;  %v3162_v7 = vadd.f32 %v347_v20, %v119_v49 }
  0xf5   :  { %v2145_v43 = vpop.f32.mrf.mxu1 }
  0xf6   :  { %3981 = vst [vmem:[#allocation35_spill] sm:$0xff] %v3162_v7  ;;  %v3164_v6 = vadd.f32 %v2145_v43, %v119_v49  ;;  %v328_v43 = vadd.f32 %v327_v38, %v119_v49  ;;  %v3986_v38 = vld [vmem:[#allocation13_spill] sm:$0xff] }
  0xf7   :  { %v357_v54 = vpop.f32.mrf.mxu1 }
  0xf8   :  { %3982 = vst [vmem:[#allocation36_spill] sm:$0xff] %v3164_v6  ;;  %v3166_v3 = vadd.f32 %v357_v54, %v119_v49  ;;  %v3987_v49 = vld [vmem:[#allocation9_spill] sm:$0xff] }
  0xfa   :  { %3983 = vst [vmem:[#allocation37_spill] sm:$0xff] %v3166_v3 }
  0xfe   :  { %v2430_v30 = vpop.eup %2429 }
  0xff   :  { %v616_v9 = vadd.f32 1.0, %v2430_v30 }
 0x100   :  { %v2432_v8 = vpop.eup %2431 }
 0x101   :  { %2433 = vrcp.f32 %v616_v9  ;;  %v623_v36 = vadd.f32 1.0, %v2432_v8 }
 0x103   :  { %2435 = vrcp.f32 %v623_v36 }
 0x105   :  { %v608_v24 = vpop.f32.mrf.mxu1 }
 0x106   :  { %v609_v4 = vadd.f32 %v608_v24, %v3168_v32  ;;  %v3992_v24 = vld [vmem:[#allocation15_spill] sm:$0xff] }
 0x107   :  { %v2180_v10 = vpop.f32.mrf.mxu1 }
 0x108   :  { %v3993_v10 = vld [vmem:[#allocation7_spill] sm:$0xff] }
 0x10e   :  { %v2434_v20 = vpop.eup %2433 }
 0x10f   :  { %v626_v6 = vmul.f32 %v2434_v20, %v609_v4  ;;  %v3994_v4 = vld [vmem:[#allocation30_spill] sm:$0xff] }
 0x110   :  { %v2436_v54 = vpop.eup %2435 }
 0x111   :  { %v627_v26 = vadd.f32 %v626_v6, %v328_v43  ;;  %v629_v3 = vsub.f32 1.0, %v2436_v54  ;;  %v631_v30 = vmul.f32 %v2436_v54, %v2923_v55  ;;  %v3985_v55 = vld [vmem:[#allocation8_spill] sm:$0xff]  ;;  %v3990_v6 = vld [vmem:[#allocation11_spill] sm:$0xff] }
 0x112   :  { %v3995_v54 = vld [vmem:[#allocation16_spill] sm:$0xff] }
 0x113   :  { %2437 = vtanh.f32 %v627_v26 }
 0x120   :  { %v2438_v48 = vpop.eup %2437 }
 0x121   :  { %v630_v19 = vmul.f32 %v2438_v48, %v629_v3  ;;  %v3991_v3 = vld [vmem:[#allocation12_spill] sm:$0xff] }
 0x123   :  { %v3172_v9 = vadd.f32 %v631_v30, %v630_v19  ;;  %v3989_v19 = vld [vmem:[#allocation14_spill] sm:$0xff] }
 0x125   :  { %634 = vst [vmem:[%s3923_s6] sm:$0xff] %v3172_v9  ;;  %711 = vmatmul.mubr.f32.vlgmr.msra.gmra.mxu0 %v3172_v9  ;;  %2214 = vmatmul.mubr.f32.vlgmr.msra.gmra.mxu1 %v3172_v9 }
 0x126   :  { %822 = vmatpush1.msra.mxu0 %v2659_v11  ;;  %2217 = vmatpush3.msra.mxu1 %v2873_v47 }
 0x127   :  { %823 = vmatprep.subr.mxu0 %v2664_v12  ;;  %2218 = vmatprep.subr.mxu1 %v3984_v50 }
 0x128   :  { %824 = vmatpush1.msra.mxu0 %v2671_v13  ;;  %2219 = vmatpush3.msra.mxu1 %v2909_v53 }
 0x129   :  { %825 = vmatprep.subr.mxu0 %v2683_v15  ;;  %2220 = vmatprep.subr.mxu1 %v3984_v50 }
 0x12a   :  { %826 = vmatpush1.msra.mxu0 %v2689_v16  ;;  %2221 = vmatpush3.msra.mxu1 %v2928_v56 }
 0x12b   :  { %827 = vmatprep.subr.mxu0 %v2695_v17  ;;  %2222 = vmatprep.subr.mxu1 %v3984_v50 }
 0x12c   :  { %828 = vmatpush1.msra.mxu0 %v2703_v18  ;;  %2223 = vmatpush3.msra.mxu1 %v2937_v57 }
 0x12d   :  { %829 = vmatprep.subr.mxu0 %v2718_v21  ;;  %2224 = vmatprep.subr.mxu1 %v3984_v50 }
 0x12e   :  { %830 = vmatpush1.msra.mxu0 %v2724_v22  ;;  %2225 = vmatpush3.msra.mxu1 %v2945_v58 }
 0x12f   :  { %831 = vmatprep.subr.mxu0 %v2730_v23  ;;  %2226 = vmatprep.subr.mxu1 %v3984_v50 }
 0x130   :  { %832 = vmatpush1.msra.mxu0 %v2741_v25  ;;  %2227 = vmatpush3.msra.mxu1 %v2955_v59 }
 0x131   :  { %833 = vmatprep.subr.mxu0 %v2753_v27  ;;  %2228 = vmatprep.subr.mxu1 %v3984_v50 }
 0x132   :  { %834 = vmatpush1.msra.mxu0 %v2759_v28  ;;  %2229 = vmatpush3.msra.mxu1 %v2966_v60 }
 0x133   :  { %835 = vmatprep.subr.mxu0 %v2765_v29  ;;  %2230 = vmatprep.subr.mxu1 %v3984_v50 }
 0x134   :  { %836 = vmatpush1.msra.mxu0 %v2776_v31  ;;  %2231 = vmatpush3.msra.mxu1 %v2975_v61 }
 0x135   :  { %837 = vmatprep.subr.mxu0 %v2788_v33  ;;  %2232 = vmatprep.subr.mxu1 %v3984_v50 }
 0x136   :  { %838 = vmatpush1.msra.mxu0 %v2794_v34  ;;  %2233 = vmatpush3.msra.mxu1 %v2985_v62 }
 0x137   :  { %839 = vmatprep.subr.mxu0 %v2800_v35  ;;  %2234 = vmatprep.subr.mxu1 %v3984_v50 }
 0x138   :  { %840 = vmatpush1.msra.mxu0 %v2811_v37  ;;  %2235 = vmatpush3.msra.mxu1 %v2994_v63 }
 0x139   :  { %841 = vmatprep.subr.mxu0 %v2823_v39  ;;  %2236 = vmatprep.subr.mxu1 %v3984_v50 }
 0x13a   :  { %842 = vmatpush1.msra.mxu0 %v2829_v40  ;;  %2237 = vmatpush3.msra.mxu1 %v3004_v0 }
 0x13b   :  { %843 = vmatprep.subr.mxu0 %v2835_v41  ;;  %2238 = vmatprep.subr.mxu1 %v3984_v50 }
 0x13c   :  { %844 = vmatpush1.msra.mxu0 %v2843_v42  ;;  %2239 = vmatpush3.msra.mxu1 %v3013_v1 }
 0x13d   :  { %845 = vmatprep.subr.mxu0 %v2853_v44  ;;  %2240 = vmatprep.subr.mxu1 %v3984_v50 }
 0x13e   :  { %846 = vmatpush1.msra.mxu0 %v2859_v45  ;;  %2241 = vmatpush3.msra.mxu1 %v3022_v2 }
 0x13f   :  { %847 = vmatprep.subr.mxu0 %v2866_v46  ;;  %2242 = vmatprep.subr.mxu1 %v3984_v50 }
 0x140   :  { %848 = vmatpush1.msra.mxu0 %v3985_v55  ;;  %2243 = vmatpush3.msra.mxu1 %v3986_v38 }
 0x141   :  { %849 = vmatprep.subr.mxu0 %v3987_v49  ;;  %2244 = vmatprep.subr.mxu1 %v3984_v50 }
 0x142   :  { %850 = vmatpush1.msra.mxu0 %v3988_v51  ;;  %2245 = vmatpush3.msra.mxu1 %v3989_v19 }
 0x143   :  { %851 = vmatprep.subr.mxu0 %v3990_v6  ;;  %2246 = vmatprep.subr.mxu1 %v3984_v50 }
 0x144   :  { %852 = vmatpush1.msra.mxu0 %v3991_v3  ;;  %885 = vmatprep.mubr.f32.mxu0 %v3984_v50 }
 0x145   :  { %2247 = vmatpush3.msra.mxu1 %v3992_v24  ;;  %2248 = vmatprep.mubr.msk.f32.mxu1 %vm2580_vm1, %v3984_v50 }
 0x146   :  { %995 = vmatprep.subr.mxu0 %v3993_v10  ;;  %2251 = vmatprep.subr.mxu1 %v3984_v50 }
 0x1e5   :  { %v712_v8 = vpop.f32.mrf.mxu0  ;;  %v783_v36 = vpop.f32.mrf.mxu1 }
 0x1e6   :  { %v713_v20 = vadd.f32 %v712_v8, %v3994_v4  ;;  %v784_v51 = vadd.f32 %v783_v36, %v3168_v32 }
 0x1e7   :  { %v714_v43 = vpop.f32.mrf.mxu0  ;;  %v2215_v26 = vpop.f32.mrf.mxu1 }
 0x1e8   :  { %v787_v48 = vadd.f32 %v713_v20, %v3995_v54  ;;  %v715_v7 = vadd.f32 %v714_v43, %v3153_v52  ;;  %v3997_v26 = vld [vmem:[#allocation26_spill] sm:$0xff] }
 0x1ea   :  { %v1957_v30 = vmul.f32 -1.442695, %v787_v48  ;;  %v794_v14 = vadd.f32 %v715_v7, %v3996_v5 }
 0x1ec   :  { %2439 = vpow2.f32 %v1957_v30  ;;  %v1958_v24 = vmul.f32 -1.442695, %v794_v14 }
 0x1ee   :  { %2441 = vpow2.f32 %v1958_v24 }
 0x1f9   :  { %v2440_v3 = vpop.eup %2439 }
 0x1fa   :  { %v791_v10 = vadd.f32 1.0, %v2440_v3  ;;  %v4005_v3 = vld [vmem:[#allocation18_spill] sm:$0xff] }
 0x1fb   :  { %v2442_v6 = vpop.eup %2441 }
 0x1fc   :  { %2443 = vrcp.f32 %v791_v10  ;;  %v798_v19 = vadd.f32 1.0, %v2442_v6 }
 0x1fe   :  { %2445 = vrcp.f32 %v798_v19 }
 0x209   :  { %v2444_v8 = vpop.eup %2443 }
 0x20a   :  { %v801_v4 = vmul.f32 %v2444_v8, %v784_v51 }
 0x20b   :  { %v2446_v54 = vpop.eup %2445 }
 0x20c   :  { %v802_v20 = vadd.f32 %v801_v4, %v3997_v26  ;;  %v804_v43 = vsub.f32 1.0, %v2446_v54  ;;  %v806_v14 = vmul.f32 %v2446_v54, %v3172_v9  ;;  %v4004_v9 = vld [vmem:[#allocation30_spill] sm:$0xff]  ;;  %v4006_v4 = vld [vmem:[#allocation19_spill] sm:$0xff] }
 0x20e   :  { %2447 = vtanh.f32 %v802_v20 }
 0x21b   :  { %v2448_v48 = vpop.eup %2447 }
 0x21c   :  { %v805_v30 = vmul.f32 %v2448_v48, %v804_v43 }
 0x21e   :  { %v3254_v5 = vadd.f32 %v806_v14, %v805_v30 }
 0x220   :  { %1959 = vst [vmem:[%s3923_s6 + $0x8] sm:$0xff] %v3254_v5  ;;  %886 = vmatmul.mubr.f32.vlgmr.msra.gmra.mxu0 %v3254_v5  ;;  %2249 = vmatmul.mubr.f32.vlgmr.msra.gmra.mxu1 %v3254_v5 }
 0x221   :  { %996 = vmatpush1.msra.mxu0 %v2659_v11  ;;  %2252 = vmatpush3.msra.mxu1 %v2873_v47  ;;  %v3998_v11 = vld [vmem:[#allocation10_spill] sm:$0xff] }
 0x222   :  { %997 = vmatprep.subr.mxu0 %v2664_v12  ;;  %2253 = vmatprep.subr.mxu1 %v3984_v50  ;;  %v3999_v12 = vld [vmem:[#allocation14_spill] sm:$0xff] }
 0x223   :  { %998 = vmatpush1.msra.mxu0 %v2671_v13  ;;  %2254 = vmatpush3.msra.mxu1 %v2909_v53  ;;  %v4000_v13 = vld [vmem:[#allocation11_spill] sm:$0xff] }
 0x224   :  { %999 = vmatprep.subr.mxu0 %v2683_v15  ;;  %2255 = vmatprep.subr.mxu1 %v3984_v50  ;;  %v4001_v15 = vld [vmem:[#allocation12_spill] sm:$0xff] }
 0x225   :  { %1000 = vmatpush1.msra.mxu0 %v2689_v16  ;;  %2256 = vmatpush3.msra.mxu1 %v2928_v56  ;;  %v4002_v16 = vld [vmem:[#allocation15_spill] sm:$0xff] }
 0x226   :  { %1001 = vmatprep.subr.mxu0 %v2695_v17  ;;  %2257 = vmatprep.subr.mxu1 %v3984_v50  ;;  %v4003_v17 = vld [vmem:[#allocation7_spill] sm:$0xff] }
 0x227   :  { %1002 = vmatpush1.msra.mxu0 %v2703_v18  ;;  %2258 = vmatpush3.msra.mxu1 %v2937_v57 }
 0x228   :  { %1003 = vmatprep.subr.mxu0 %v2718_v21  ;;  %2259 = vmatprep.subr.mxu1 %v3984_v50 }
 0x229   :  { %1004 = vmatpush1.msra.mxu0 %v2724_v22  ;;  %2260 = vmatpush3.msra.mxu1 %v2945_v58 }
 0x22a   :  { %1005 = vmatprep.subr.mxu0 %v2730_v23  ;;  %2261 = vmatprep.subr.mxu1 %v3984_v50 }
 0x22b   :  { %1006 = vmatpush1.msra.mxu0 %v2741_v25  ;;  %2262 = vmatpush3.msra.mxu1 %v2955_v59 }
 0x22c   :  { %1007 = vmatprep.subr.mxu0 %v2753_v27  ;;  %2263 = vmatprep.subr.mxu1 %v3984_v50 }
 0x22d   :  { %1008 = vmatpush1.msra.mxu0 %v2759_v28  ;;  %2264 = vmatpush3.msra.mxu1 %v2966_v60 }
 0x22e   :  { %1009 = vmatprep.subr.mxu0 %v2765_v29  ;;  %2265 = vmatprep.subr.mxu1 %v3984_v50 }
 0x22f   :  { %1010 = vmatpush1.msra.mxu0 %v2776_v31  ;;  %2266 = vmatpush3.msra.mxu1 %v2975_v61 }
 0x230   :  { %1011 = vmatprep.subr.mxu0 %v2788_v33  ;;  %2267 = vmatprep.subr.mxu1 %v3984_v50 }
 0x231   :  { %1012 = vmatpush1.msra.mxu0 %v2794_v34  ;;  %2268 = vmatpush3.msra.mxu1 %v2985_v62 }
 0x232   :  { %1013 = vmatprep.subr.mxu0 %v2800_v35  ;;  %2269 = vmatprep.subr.mxu1 %v3984_v50 }
 0x233   :  { %1014 = vmatpush1.msra.mxu0 %v2811_v37  ;;  %2270 = vmatpush3.msra.mxu1 %v2994_v63 }
 0x234   :  { %1015 = vmatprep.subr.mxu0 %v2823_v39  ;;  %2271 = vmatprep.subr.mxu1 %v3984_v50 }
 0x235   :  { %1016 = vmatpush1.msra.mxu0 %v2829_v40  ;;  %2272 = vmatpush3.msra.mxu1 %v3004_v0 }
 0x236   :  { %1017 = vmatprep.subr.mxu0 %v2835_v41  ;;  %2273 = vmatprep.subr.mxu1 %v3984_v50 }
 0x237   :  { %1018 = vmatpush1.msra.mxu0 %v2843_v42  ;;  %2274 = vmatpush3.msra.mxu1 %v3013_v1 }
 0x238   :  { %1019 = vmatprep.subr.mxu0 %v2853_v44  ;;  %2275 = vmatprep.subr.mxu1 %v3984_v50 }
 0x239   :  { %1020 = vmatpush1.msra.mxu0 %v2859_v45  ;;  %2276 = vmatpush3.msra.mxu1 %v3022_v2 }
 0x23a   :  { %1021 = vmatprep.subr.mxu0 %v2866_v46  ;;  %2277 = vmatprep.subr.mxu1 %v3984_v50 }
 0x23b   :  { %1022 = vmatpush1.msra.mxu0 %v3985_v55  ;;  %2278 = vmatpush3.msra.mxu1 %v3986_v38 }
 0x23c   :  { %1023 = vmatprep.subr.mxu0 %v3987_v49  ;;  %2279 = vmatprep.subr.mxu1 %v3984_v50 }
 0x23d   :  { %1024 = vmatpush1.msra.mxu0 %v3998_v11  ;;  %2280 = vmatpush3.msra.mxu1 %v3999_v12 }
 0x23e   :  { %1025 = vmatprep.subr.mxu0 %v4000_v13  ;;  %2281 = vmatprep.subr.mxu1 %v3984_v50 }
 0x23f   :  { %1026 = vmatpush1.msra.mxu0 %v4001_v15  ;;  %1059 = vmatprep.mubr.f32.mxu0 %v3984_v50 }
 0x240   :  { %2282 = vmatpush3.msra.mxu1 %v4002_v16  ;;  %2283 = vmatprep.mubr.msk.f32.mxu1 %vm2580_vm1, %v3984_v50 }
 0x241   :  { %1169 = vmatprep.subr.mxu0 %v4003_v17  ;;  %2286 = vmatprep.subr.mxu1 %v3984_v50 }
 0x2e0   :  { %v887_v18 = vpop.f32.mrf.mxu0  ;;  %v958_v7 = vpop.f32.mrf.mxu1 }
 0x2e1   :  { %v888_v51 = vadd.f32 %v887_v18, %v4004_v9  ;;  %v959_v30 = vadd.f32 %v958_v7, %v3168_v32  ;;  %v4007_v18 = vld [vmem:[#allocation33_spill] sm:$0xff]  ;;  %v3347_v7 = vld [vmem:[%s3920_s3 + $0x168] sm:$0xff] }
 0x2e2   :  { %v889_v19 = vpop.f32.mrf.mxu0  ;;  %v2250_v6 = vpop.f32.mrf.mxu1 }
 0x2e3   :  { %v962_v24 = vadd.f32 %v888_v51, %v4005_v3  ;;  %v890_v36 = vadd.f32 %v889_v19, %v3153_v52 }
 0x2e5   :  { %v1960_v10 = vmul.f32 -1.442695, %v962_v24  ;;  %v969_v8 = vadd.f32 %v890_v36, %v4006_v4  ;;  %v3361_v4 = vld [vmem:[%s3920_s3 + $0x150] sm:$0xff] }
 0x2e7   :  { %2449 = vpow2.f32 %v1960_v10  ;;  %v1961_v26 = vmul.f32 -1.442695, %v969_v8  ;;  %v3375_v8 = vld [vmem:[%s3920_s3 + $0x138] sm:$0xff] }
 0x2e9   :  { %2451 = vpow2.f32 %v1961_v26  ;;  %v3389_v26 = vld [vmem:[%s3920_s3 + $0x120] sm:$0xff] }
 0x2f4   :  { %v2450_v20 = vpop.eup %2449 }
 0x2f5   :  { %v966_v54 = vadd.f32 1.0, %v2450_v20  ;;  %v3503_v20 = vld [vmem:[%s3920_s3 + $0x110] sm:$0xff] }
 0x2f6   :  { %v2452_v43 = vpop.eup %2451 }
 0x2f7   :  { %2453 = vrcp.f32 %v966_v54  ;;  %v973_v48 = vadd.f32 1.0, %v2452_v43  ;;  %v3510_v54 = vld [vmem:[%s3920_s3 + $0x108] sm:$0xff]  ;;  %v3516_v43 = vld [vmem:[%s3920_s3 + $0x118] sm:$0xff] }
 0x2f9   :  { %2455 = vrcp.f32 %v973_v48  ;;  %v3522_v48 = vld [vmem:[%s3920_s3 + $0xf8] sm:$0xff] }
 0x304   :  { %v2454_v14 = vpop.eup %2453 }
 0x305   :  { %v976_v17 = vmul.f32 %v2454_v14, %v959_v30  ;;  %v3529_v30 = vld [vmem:[%s3920_s3 + $0xf0] sm:$0xff]  ;;  %v3535_v14 = vld [vmem:[%s3920_s3 + $0x100] sm:$0xff] }
 0x306   :  { %v2456_v6 = vpop.eup %2455 }
 0x307   :  { %v977_v51 = vadd.f32 %v976_v17, %v4007_v18  ;;  %v979_v19 = vsub.f32 1.0, %v2456_v6  ;;  %v981_v10 = vmul.f32 %v2456_v6, %v3254_v5  ;;  %v3354_v5 = vld [vmem:[%s3920_s3 + $0x158] sm:$0xff]  ;;  %v3541_v17 = vld [vmem:[%s3920_s3 + $0xe0] sm:$0xff]  ;;  %v3560_v6 = vld [vmem:[%s3920_s3 + $0xc8] sm:$0xff] }
 0x308   :  { %v3548_v18 = vld [vmem:[%s3920_s3 + $0xd8] sm:$0xff] }
 0x309   :  { %2457 = vtanh.f32 %v977_v51  ;;  %v3554_v51 = vld [vmem:[%s3920_s3 + $0xe8] sm:$0xff] }
 0x316   :  { %v2458_v3 = vpop.eup %2457 }
 0x317   :  { %v980_v24 = vmul.f32 %v2458_v3, %v979_v19  ;;  %v3567_v19 = vld [vmem:[%s3920_s3 + $0xc0] sm:$0xff]  ;;  %v3573_v3 = vld [vmem:[%s3920_s3 + $0xd0] sm:$0xff] }
 0x319   :  { %v3336_v36 = vadd.f32 %v981_v10, %v980_v24  ;;  %v3579_v24 = vld [vmem:[%s3920_s3 + $0xb0] sm:$0xff]  ;;  %v3586_v10 = vld [vmem:[%s3920_s3 + $0xa8] sm:$0xff] }
 0x31b   :  { %1962 = vst [vmem:[%s3923_s6 + $0x10] sm:$0xff] %v3336_v36  ;;  %1060 = vmatmul.mubr.f32.vlgmr.msra.gmra.mxu0 %v3336_v36  ;;  %2284 = vmatmul.mubr.f32.vlgmr.msra.gmra.mxu1 %v3336_v36 }
 0x31c   :  { %1170 = vmatpush1.msra.mxu0 %v3347_v7  ;;  %2287 = vmatpush3.msra.mxu1 %v2873_v47  ;;  %v3368_v47 = vld [vmem:[%s3920_s3 + $0x140] sm:$0xff] }
 0x31d   :  { %1171 = vmatprep.subr.mxu0 %v3354_v5  ;;  %2288 = vmatprep.subr.mxu1 %v3984_v50 }
 0x31e   :  { %1172 = vmatpush1.msra.mxu0 %v3361_v4  ;;  %2289 = vmatpush3.msra.mxu1 %v2909_v53  ;;  %v3382_v53 = vld [vmem:[%s3920_s3 + $0x128] sm:$0xff] }
 0x31f   :  { %1173 = vmatprep.subr.mxu0 %v3368_v47  ;;  %2290 = vmatprep.subr.mxu1 %v3984_v50 }
 0x320   :  { %1174 = vmatpush1.msra.mxu0 %v3375_v8  ;;  %2291 = vmatpush3.msra.mxu1 %v2928_v56 }
 0x321   :  { %1175 = vmatprep.subr.mxu0 %v3382_v53  ;;  %2292 = vmatprep.subr.mxu1 %v3984_v50 }
 0x322   :  { %1176 = vmatpush1.msra.mxu0 %v3389_v26  ;;  %2293 = vmatpush3.msra.mxu1 %v2937_v57  ;;  %v4010_v57 = vld [vmem:[#allocation32_spill] sm:$0xff] }
 0x323   :  { %1177 = vmatprep.subr.mxu0 %v2718_v21  ;;  %2294 = vmatprep.subr.mxu1 %v3984_v50  ;;  %v3447_v21 = vld [vmem:[%s3920_s3 + $0x170] sm:$0xff] }
 0x324   :  { %1178 = vmatpush1.msra.mxu0 %v2724_v22  ;;  %2295 = vmatpush3.msra.mxu1 %v2945_v58 }
 0x325   :  { %1179 = vmatprep.subr.mxu0 %v2730_v23  ;;  %2296 = vmatprep.subr.mxu1 %v3984_v50 }
 0x326   :  { %1180 = vmatpush1.msra.mxu0 %v2741_v25  ;;  %2297 = vmatpush3.msra.mxu1 %v2955_v59 }
 0x327   :  { %1181 = vmatprep.subr.mxu0 %v2753_v27  ;;  %2298 = vmatprep.subr.mxu1 %v3984_v50 }
 0x328   :  { %1182 = vmatpush1.msra.mxu0 %v2759_v28  ;;  %2299 = vmatpush3.msra.mxu1 %v2966_v60 }
 0x329   :  { %1183 = vmatprep.subr.mxu0 %v2765_v29  ;;  %2300 = vmatprep.subr.mxu1 %v3984_v50  ;;  %v4008_v29 = vld [vmem:[#allocation20_spill] sm:$0xff] }
 0x32a   :  { %1184 = vmatpush1.msra.mxu0 %v2776_v31  ;;  %2301 = vmatpush3.msra.mxu1 %v2975_v61 }
 0x32b   :  { %1185 = vmatprep.subr.mxu0 %v2788_v33  ;;  %2302 = vmatprep.subr.mxu1 %v3984_v50 }
 0x32c   :  { %1186 = vmatpush1.msra.mxu0 %v2794_v34  ;;  %2303 = vmatpush3.msra.mxu1 %v2985_v62 }
 0x32d   :  { %1187 = vmatprep.subr.mxu0 %v2800_v35  ;;  %2304 = vmatprep.subr.mxu1 %v3984_v50  ;;  %v4009_v35 = vld [vmem:[#allocation21_spill] sm:$0xff] }
 0x32e   :  { %1188 = vmatpush1.msra.mxu0 %v2811_v37  ;;  %2305 = vmatpush3.msra.mxu1 %v2994_v63 }
 0x32f   :  { %1189 = vmatprep.subr.mxu0 %v2823_v39  ;;  %2306 = vmatprep.subr.mxu1 %v3984_v50 }
 0x330   :  { %1190 = vmatpush1.msra.mxu0 %v2829_v40  ;;  %2307 = vmatpush3.msra.mxu1 %v3004_v0 }
 0x331   :  { %1191 = vmatprep.subr.mxu0 %v2835_v41  ;;  %2308 = vmatprep.subr.mxu1 %v3984_v50 }
 0x332   :  { %1192 = vmatpush1.msra.mxu0 %v2843_v42  ;;  %2309 = vmatpush3.msra.mxu1 %v3013_v1 }
 0x333   :  { %1193 = vmatprep.subr.mxu0 %v2853_v44  ;;  %2310 = vmatprep.subr.mxu1 %v3984_v50 }
 0x334   :  { %1194 = vmatpush1.msra.mxu0 %v2859_v45  ;;  %2311 = vmatpush3.msra.mxu1 %v3022_v2 }
 0x335   :  { %1195 = vmatprep.subr.mxu0 %v2866_v46  ;;  %2312 = vmatprep.subr.mxu1 %v3984_v50 }
 0x336   :  { %1196 = vmatpush1.msra.mxu0 %v3985_v55  ;;  %2313 = vmatpush3.msra.mxu1 %v3986_v38 }
 0x337   :  { %1197 = vmatprep.subr.mxu0 %v3987_v49  ;;  %2314 = vmatprep.subr.mxu1 %v3984_v50  ;;  %v3470_v49 = vld [vmem:[%s3920_s3 + $0x178] sm:$0xff] }
 0x338   :  { %1198 = vmatpush1.msra.mxu0 %v3998_v11  ;;  %2315 = vmatpush3.msra.mxu1 %v3999_v12  ;;  %v3479_v11 = vld [vmem:[%s3920_s3 + $0x160] sm:$0xff] }
 0x339   :  { %1199 = vmatprep.subr.mxu0 %v4000_v13  ;;  %2316 = vmatprep.subr.mxu1 %v3984_v50  ;;  %v3488_v13 = vld [vmem:[%s3920_s3 + $0x148] sm:$0xff] }
 0x33a   :  { %1200 = vmatpush1.msra.mxu0 %v4001_v15  ;;  %1233 = vmatprep.mubr.f32.mxu0 %v3984_v50  ;;  %v3497_v15 = vld [vmem:[%s3920_s3 + $0x130] sm:$0xff] }
 0x33b   :  { %2317 = vmatpush3.msra.mxu1 %v4002_v16  ;;  %2318 = vmatprep.mubr.msk.f32.mxu1 %vm2580_vm1, %v3984_v50 }
 0x33c   :  { %1344 = vmatprep.subr.mxu0 %v3447_v21  ;;  %2321 = vmatprep.subr.mxu1 %v3984_v50 }
 0x3db   :  { %v1061_v22 = vpop.f32.mrf.mxu0  ;;  %v1132_v23 = vpop.f32.mrf.mxu1 }
 0x3dc   :  { %v1062_v25 = vadd.f32 %v1061_v22, %v4004_v9  ;;  %v1133_v45 = vadd.f32 %v1132_v23, %v3168_v32  ;;  %v3598_v22 = vld [vmem:[%s3920_s3 + $0x98] sm:$0xff]  ;;  %v3605_v23 = vld [vmem:[%s3920_s3 + $0x90] sm:$0xff] }
 0x3dd   :  { %v1063_v27 = vpop.f32.mrf.mxu0  ;;  %v2285_v28 = vpop.f32.mrf.mxu1 }
 0x3de   :  { %v1136_v31 = vadd.f32 %v1062_v25, %v4008_v29  ;;  %v1064_v34 = vadd.f32 %v1063_v27, %v3153_v52  ;;  %v3611_v25 = vld [vmem:[%s3920_s3 + $0xa0] sm:$0xff]  ;;  %v3624_v28 = vld [vmem:[%s3920_s3 + $0x78] sm:$0xff]  ;;  %v3631_v29 = vld [vmem:[%s3920_s3 + $0x68] sm:$0xff] }
 0x3df   :  { %v3617_v27 = vld [vmem:[%s3920_s3 + $0x80] sm:$0xff] }
 0x3e0   :  { %v1963_v33 = vmul.f32 -1.442695, %v1136_v31  ;;  %v1143_v37 = vadd.f32 %v1064_v34, %v4009_v35  ;;  %v3638_v31 = vld [vmem:[%s3920_s3 + $0x60] sm:$0xff]  ;;  %v3666_v34 = vld [vmem:[%s3920_s3 + $0x30] sm:$0xff]  ;;  %v3680_v35 = vld [vmem:[%s3920_s3 + $0x18] sm:$0xff] }
 0x3e1   :  { %4011 = vst [vmem:[#allocation8_spill] sm:$0xff] %v3680_v35 }
 0x3e2   :  { %2459 = vpow2.f32 %v1963_v33  ;;  %v1964_v39 = vmul.f32 -1.442695, %v1143_v37  ;;  %v3652_v33 = vld [vmem:[%s3920_s3 + $0x48] sm:$0xff]  ;;  %v3694_v37 = vld [vmem:[%s3920_s3] sm:$0xff] }
 0x3e3   :  { %4013 = vst [vmem:[#allocation9_spill] sm:$0xff] %v3694_v37 }
 0x3e4   :  { %2461 = vpow2.f32 %v1964_v39 }
 0x3ef   :  { %v2460_v40 = vpop.eup %2459 }
 0x3f0   :  { %v1140_v41 = vadd.f32 1.0, %v2460_v40 }
 0x3f1   :  { %v2462_v42 = vpop.eup %2461 }
 0x3f2   :  { %2463 = vrcp.f32 %v1140_v41  ;;  %v1147_v44 = vadd.f32 1.0, %v2462_v42 }
 0x3f4   :  { %2465 = vrcp.f32 %v1147_v44  ;;  %v4014_v44 = vld [vmem:[#allocation22_spill] sm:$0xff] }
 0x3ff   :  { %v2464_v46 = vpop.eup %2463 }
 0x400   :  { %v1150_v56 = vmul.f32 %v2464_v46, %v1133_v45 }
 0x401   :  { %v2466_v59 = vpop.eup %2465 }
 0x402   :  { %v1151_v58 = vadd.f32 %v1150_v56, %v4010_v57  ;;  %v1153_v60 = vsub.f32 1.0, %v2466_v59  ;;  %v1155_v63 = vmul.f32 %v2466_v59, %v3336_v36  ;;  %v3592_v36 = vld [vmem:[%s3920_s3 + $0xb8] sm:$0xff] }
 0x404   :  { %2467 = vtanh.f32 %v1151_v58 }
 0x411   :  { %v2468_v61 = vpop.eup %2467 }
 0x412   :  { %v1154_v62 = vmul.f32 %v2468_v61, %v1153_v60 }
 0x414   :  { %v3458_v55 = vadd.f32 %v1155_v63, %v1154_v62 }
 0x416   :  { %1965 = vst [vmem:[%s3923_s6 + $0x18] sm:$0xff] %v3458_v55  ;;  %1234 = vmatmul.mubr.f32.vlgmr.msra.gmra.mxu0 %v3458_v55  ;;  %2319 = vmatmul.mubr.f32.vlgmr.msra.gmra.mxu1 %v3458_v55 }
 0x417   :  { %1345 = vmatpush1.msra.mxu0 %v3347_v7  ;;  %2322 = vmatpush3.msra.mxu1 %v3470_v49 }
 0x418   :  { %1346 = vmatprep.subr.mxu0 %v3354_v5  ;;  %2323 = vmatprep.subr.mxu1 %v3984_v50 }
 0x419   :  { %1347 = vmatpush1.msra.mxu0 %v3361_v4  ;;  %2324 = vmatpush3.msra.mxu1 %v3479_v11 }
 0x41a   :  { %1348 = vmatprep.subr.mxu0 %v3368_v47  ;;  %2325 = vmatprep.subr.mxu1 %v3984_v50 }
 0x41b   :  { %1349 = vmatpush1.msra.mxu0 %v3375_v8  ;;  %2326 = vmatpush3.msra.mxu1 %v3488_v13 }
 0x41c   :  { %1350 = vmatprep.subr.mxu0 %v3382_v53  ;;  %2327 = vmatprep.subr.mxu1 %v3984_v50 }
 0x41d   :  { %1351 = vmatpush1.msra.mxu0 %v3389_v26  ;;  %2328 = vmatpush3.msra.mxu1 %v3497_v15 }
 0x41e   :  { %1352 = vmatprep.subr.mxu0 %v3503_v20  ;;  %2329 = vmatprep.subr.mxu1 %v3984_v50 }
 0x41f   :  { %1353 = vmatpush1.msra.mxu0 %v3510_v54  ;;  %2330 = vmatpush3.msra.mxu1 %v3516_v43 }
 0x420   :  { %1354 = vmatprep.subr.mxu0 %v3522_v48  ;;  %2331 = vmatprep.subr.mxu1 %v3984_v50 }
 0x421   :  { %1355 = vmatpush1.msra.mxu0 %v3529_v30  ;;  %2332 = vmatpush3.msra.mxu1 %v3535_v14 }
 0x422   :  { %1356 = vmatprep.subr.mxu0 %v3541_v17  ;;  %2333 = vmatprep.subr.mxu1 %v3984_v50 }
 0x423   :  { %1357 = vmatpush1.msra.mxu0 %v3548_v18  ;;  %2334 = vmatpush3.msra.mxu1 %v3554_v51 }
 0x424   :  { %1358 = vmatprep.subr.mxu0 %v3560_v6  ;;  %2335 = vmatprep.subr.mxu1 %v3984_v50 }
 0x425   :  { %1359 = vmatpush1.msra.mxu0 %v3567_v19  ;;  %2336 = vmatpush3.msra.mxu1 %v3573_v3 }
 0x426   :  { %1360 = vmatprep.subr.mxu0 %v3579_v24  ;;  %2337 = vmatprep.subr.mxu1 %v3984_v50 }
 0x427   :  { %1361 = vmatpush1.msra.mxu0 %v3586_v10  ;;  %2338 = vmatpush3.msra.mxu1 %v3592_v36 }
 0x428   :  { %1362 = vmatprep.subr.mxu0 %v3598_v22  ;;  %2339 = vmatprep.subr.mxu1 %v3984_v50 }
 0x429   :  { %1363 = vmatpush1.msra.mxu0 %v3605_v23  ;;  %2340 = vmatpush3.msra.mxu1 %v3611_v25 }
 0x42a   :  { %1364 = vmatprep.subr.mxu0 %v3617_v27  ;;  %2341 = vmatprep.subr.mxu1 %v3984_v50 }
 0x42b   :  { %1365 = vmatpush1.msra.mxu0 %v3624_v28  ;;  %2342 = vmatpush3.msra.mxu1 %v3004_v0  ;;  %v3645_v0 = vld [vmem:[%s3920_s3 + $0x50] sm:$0xff] }
 0x42c   :  { %1366 = vmatprep.subr.mxu0 %v3631_v29  ;;  %2343 = vmatprep.subr.mxu1 %v3984_v50 }
 0x42d   :  { %1367 = vmatpush1.msra.mxu0 %v3638_v31  ;;  %2344 = vmatpush3.msra.mxu1 %v3013_v1  ;;  %v3659_v1 = vld [vmem:[%s3920_s3 + $0x38] sm:$0xff] }
 0x42e   :  { %1368 = vmatprep.subr.mxu0 %v3645_v0  ;;  %2345 = vmatprep.subr.mxu1 %v3984_v50 }
 0x42f   :  { %1369 = vmatpush1.msra.mxu0 %v3652_v33  ;;  %2346 = vmatpush3.msra.mxu1 %v3022_v2  ;;  %v3673_v2 = vld [vmem:[%s3920_s3 + $0x20] sm:$0xff] }
 0x430   :  { %1370 = vmatprep.subr.mxu0 %v3659_v1  ;;  %2347 = vmatprep.subr.mxu1 %v3984_v50 }
 0x431   :  { %1371 = vmatpush1.msra.mxu0 %v3666_v34  ;;  %2348 = vmatpush3.msra.mxu1 %v3986_v38  ;;  %v3687_v38 = vld [vmem:[%s3920_s3 + $0x8] sm:$0xff] }
 0x432   :  { %1372 = vmatprep.subr.mxu0 %v3673_v2  ;;  %2349 = vmatprep.subr.mxu1 %v3984_v50  ;;  %4012 = vst [vmem:[#allocation13_spill] sm:$0xff] %v3687_v38 }
 0x433   :  { %1373 = vmatpush1.msra.mxu0 %v3680_v35  ;;  %2350 = vmatpush3.msra.mxu1 %v3999_v12 }
 0x434   :  { %1374 = vmatprep.subr.mxu0 %v3687_v38  ;;  %2351 = vmatprep.subr.mxu1 %v3984_v50 }
 0x435   :  { %1375 = vmatpush1.msra.mxu0 %v3694_v37  ;;  %1408 = vmatprep.mubr.f32.mxu0 %v3984_v50 }
 0x436   :  { %2352 = vmatpush3.msra.mxu1 %v4002_v16  ;;  %2353 = vmatprep.mubr.msk.f32.mxu1 %vm2580_vm1, %v3984_v50  ;;  %v4015_v16 = vld [vmem:[#allocation23_spill] sm:$0xff] }
 0x437   :  { %1519 = vmatprep.subr.mxu0 %v3447_v21  ;;  %2356 = vmatprep.subr.mxu1 %v3984_v50 }
 0x4d6   :  { %v1235_v12 = vpop.f32.mrf.mxu0  ;;  %v1306_v39 = vpop.f32.mrf.mxu1 }
 0x4d7   :  { %v1236_v40 = vadd.f32 %v1235_v12, %v4004_v9  ;;  %v1307_v63 = vadd.f32 %v1306_v39, %v3168_v32  ;;  %v3780_v39 = vld [vmem:[%s3920_s3 + $0x58] sm:$0xff] }
 0x4d8   :  { %v1237_v41 = vpop.f32.mrf.mxu0  ;;  %v2320_v42 = vpop.f32.mrf.mxu1 }
 0x4d9   :  { %v1310_v45 = vadd.f32 %v1236_v40, %v4014_v44  ;;  %v1238_v56 = vadd.f32 %v1237_v41, %v3153_v52  ;;  %v4016_v42 = vld [vmem:[#allocation35_spill] sm:$0xff] }
 0x4db   :  { %v1966_v46 = vmul.f32 -1.442695, %v1310_v45  ;;  %v1317_v57 = vadd.f32 %v1238_v56, %v4015_v16 }
 0x4dd   :  { %2469 = vpow2.f32 %v1966_v46  ;;  %v1967_v58 = vmul.f32 -1.442695, %v1317_v57  ;;  %v3789_v57 = vld [vmem:[%s3920_s3 + $0x40] sm:$0xff] }
 0x4df   :  { %2471 = vpow2.f32 %v1967_v58  ;;  %v3798_v58 = vld [vmem:[%s3920_s3 + $0x28] sm:$0xff] }
 0x4e0   :  { %4017 = vst [vmem:[#allocation16_spill] sm:$0xff] %v3798_v58 }
 0x4ea   :  { %v2470_v59 = vpop.eup %2469 }
 0x4eb   :  { %v1314_v60 = vadd.f32 1.0, %v2470_v59  ;;  %v3808_v59 = vld [vmem:[%s3920_s3 + $0x10] sm:$0xff] }
 0x4ec   :  { %v2472_v61 = vpop.eup %2471  ;;  %4018 = vst [vmem:[#allocation17_spill] sm:$0xff] %v3808_v59 }
 0x4ed   :  { %2473 = vrcp.f32 %v1314_v60  ;;  %v1321_v62 = vadd.f32 1.0, %v2472_v61 }
 0x4ef   :  { %2475 = vrcp.f32 %v1321_v62  ;;  %v4019_v62 = vld [vmem:[#allocation30_spill] sm:$0xff] }
 0x4fa   :  { %v2474_v12 = vpop.eup %2473 }
 0x4fb   :  { %v1324_v9 = vmul.f32 %v2474_v12, %v1307_v63 }
 0x4fc   :  { %v2476_v44 = vpop.eup %2475 }
 0x4fd   :  { %v1325_v40 = vadd.f32 %v1324_v9, %v4016_v42  ;;  %v1327_v41 = vsub.f32 1.0, %v2476_v44  ;;  %v1329_v56 = vmul.f32 %v2476_v44, %v3458_v55  ;;  %v3762_v9 = vld [vmem:[%s3920_s3 + $0x88] sm:$0xff]  ;;  %v3771_v55 = vld [vmem:[%s3920_s3 + $0x70] sm:$0xff] }
 0x4ff   :  { %2477 = vtanh.f32 %v1325_v40  ;;  %v4020_v40 = vld [vmem:[#allocation24_spill] sm:$0xff] }
 0x50c   :  { %v2478_v45 = vpop.eup %2477 }
 0x50d   :  { %v1328_v46 = vmul.f32 %v2478_v45, %v1327_v41 }
 0x50f   :  { %v3710_v16 = vadd.f32 %v1329_v56, %v1328_v46  ;;  %v4021_v46 = vld [vmem:[#allocation25_spill] sm:$0xff] }
 0x511   :  { %1968 = vst [vmem:[%s3923_s6 + $0x20] sm:$0xff] %v3710_v16  ;;  %1409 = vmatmul.mubr.f32.vlgmr.msra.gmra.mxu0 %v3710_v16  ;;  %2354 = vmatmul.mubr.f32.vlgmr.msra.gmra.mxu1 %v3710_v16 }
 0x512   :  { %1520 = vmatpush1.msra.mxu0 %v3347_v7  ;;  %2357 = vmatpush3.msra.mxu1 %v3470_v49 }
 0x513   :  { %1521 = vmatprep.subr.mxu0 %v3354_v5  ;;  %2358 = vmatprep.subr.mxu1 %v3984_v50 }
 0x514   :  { %1522 = vmatpush1.msra.mxu0 %v3361_v4  ;;  %2359 = vmatpush3.msra.mxu1 %v3479_v11 }
 0x515   :  { %1523 = vmatprep.subr.mxu0 %v3368_v47  ;;  %2360 = vmatprep.subr.mxu1 %v3984_v50 }
 0x516   :  { %1524 = vmatpush1.msra.mxu0 %v3375_v8  ;;  %2361 = vmatpush3.msra.mxu1 %v3488_v13 }
 0x517   :  { %1525 = vmatprep.subr.mxu0 %v3382_v53  ;;  %2362 = vmatprep.subr.mxu1 %v3984_v50 }
 0x518   :  { %1526 = vmatpush1.msra.mxu0 %v3389_v26  ;;  %2363 = vmatpush3.msra.mxu1 %v3497_v15 }
 0x519   :  { %1527 = vmatprep.subr.mxu0 %v3503_v20  ;;  %2364 = vmatprep.subr.mxu1 %v3984_v50 }
 0x51a   :  { %1528 = vmatpush1.msra.mxu0 %v3510_v54  ;;  %2365 = vmatpush3.msra.mxu1 %v3516_v43 }
 0x51b   :  { %1529 = vmatprep.subr.mxu0 %v3522_v48  ;;  %2366 = vmatprep.subr.mxu1 %v3984_v50 }
 0x51c   :  { %1530 = vmatpush1.msra.mxu0 %v3529_v30  ;;  %2367 = vmatpush3.msra.mxu1 %v3535_v14 }
 0x51d   :  { %1531 = vmatprep.subr.mxu0 %v3541_v17  ;;  %2368 = vmatprep.subr.mxu1 %v3984_v50 }
 0x51e   :  { %1532 = vmatpush1.msra.mxu0 %v3548_v18  ;;  %2369 = vmatpush3.msra.mxu1 %v3554_v51 }
 0x51f   :  { %1533 = vmatprep.subr.mxu0 %v3560_v6  ;;  %2370 = vmatprep.subr.mxu1 %v3984_v50 }
 0x520   :  { %1534 = vmatpush1.msra.mxu0 %v3567_v19  ;;  %2371 = vmatpush3.msra.mxu1 %v3573_v3 }
 0x521   :  { %1535 = vmatprep.subr.mxu0 %v3579_v24  ;;  %2372 = vmatprep.subr.mxu1 %v3984_v50 }
 0x522   :  { %1536 = vmatpush1.msra.mxu0 %v3586_v10  ;;  %2373 = vmatpush3.msra.mxu1 %v3592_v36 }
 0x523   :  { %1537 = vmatprep.subr.mxu0 %v3598_v22  ;;  %2374 = vmatprep.subr.mxu1 %v3984_v50 }
 0x524   :  { %1538 = vmatpush1.msra.mxu0 %v3605_v23  ;;  %2375 = vmatpush3.msra.mxu1 %v3611_v25 }
 0x525   :  { %1539 = vmatprep.subr.mxu0 %v3617_v27  ;;  %2376 = vmatprep.subr.mxu1 %v3984_v50 }
 0x526   :  { %1540 = vmatpush1.msra.mxu0 %v3624_v28  ;;  %2377 = vmatpush3.msra.mxu1 %v3762_v9 }
 0x527   :  { %1541 = vmatprep.subr.mxu0 %v3631_v29  ;;  %2378 = vmatprep.subr.mxu1 %v3984_v50 }
 0x528   :  { %1542 = vmatpush1.msra.mxu0 %v3638_v31  ;;  %2379 = vmatpush3.msra.mxu1 %v3771_v55 }
 0x529   :  { %1543 = vmatprep.subr.mxu0 %v3645_v0  ;;  %2380 = vmatprep.subr.mxu1 %v3984_v50 }
 0x52a   :  { %1544 = vmatpush1.msra.mxu0 %v3652_v33  ;;  %2381 = vmatpush3.msra.mxu1 %v3780_v39 }
 0x52b   :  { %1545 = vmatprep.subr.mxu0 %v3659_v1  ;;  %2382 = vmatprep.subr.mxu1 %v3984_v50 }
 0x52c   :  { %1546 = vmatpush1.msra.mxu0 %v3666_v34  ;;  %2383 = vmatpush3.msra.mxu1 %v3789_v57 }
 0x52d   :  { %1547 = vmatprep.subr.mxu0 %v3673_v2  ;;  %2384 = vmatprep.subr.mxu1 %v3984_v50 }
 0x52e   :  { %1548 = vmatpush1.msra.mxu0 %v3680_v35  ;;  %2385 = vmatpush3.msra.mxu1 %v3798_v58 }
 0x52f   :  { %1549 = vmatprep.subr.mxu0 %v3687_v38  ;;  %2386 = vmatprep.subr.mxu1 %v3984_v50 }
 0x530   :  { %1550 = vmatpush1.msra.mxu0 %v3694_v37  ;;  %1583 = vmatprep.mubr.f32.mxu0 %v3984_v50 }
 0x531   :  { %2387 = vmatpush3.msra.mxu1 %v3808_v59  ;;  %2388 = vmatprep.mubr.msk.f32.mxu1 %vm2580_vm1, %v3984_v50 }
 0x532   :  { %1694 = vmatprep.subr.mxu0 %v3447_v21  ;;  %2391 = vmatprep.subr.mxu1 %v3984_v50 }
 0x5d1   :  { %v1410_v60 = vpop.f32.mrf.mxu0  ;;  %v1481_v61 = vpop.f32.mrf.mxu1 }
 0x5d2   :  { %v1411_v63 = vadd.f32 %v1410_v60, %v4019_v62  ;;  %v1482_v35 = vadd.f32 %v1481_v61, %v3168_v32 }
 0x5d3   :  { %v1412_v12 = vpop.f32.mrf.mxu0  ;;  %v2355_v42 = vpop.f32.mrf.mxu1 }
 0x5d4   :  { %v1485_v44 = vadd.f32 %v1411_v63, %v4020_v40  ;;  %v1413_v45 = vadd.f32 %v1412_v12, %v3153_v52  ;;  %v4022_v42 = vld [vmem:[#allocation34_spill] sm:$0xff] }
 0x5d6   :  { %v1969_v41 = vmul.f32 -1.442695, %v1485_v44  ;;  %v1492_v56 = vadd.f32 %v1413_v45, %v4021_v46 }
 0x5d8   :  { %2479 = vpow2.f32 %v1969_v41  ;;  %v1970_v59 = vmul.f32 -1.442695, %v1492_v56 }
 0x5da   :  { %2481 = vpow2.f32 %v1970_v59 }
 0x5e5   :  { %v2480_v37 = vpop.eup %2479 }
 0x5e6   :  { %v1489_v21 = vadd.f32 1.0, %v2480_v37 }
 0x5e7   :  { %v2482_v38 = vpop.eup %2481 }
 0x5e8   :  { %2483 = vrcp.f32 %v1489_v21  ;;  %v1496_v58 = vadd.f32 1.0, %v2482_v38  ;;  %v4034_v21 = vld [vmem:[#allocation36_spill] sm:$0xff] }
 0x5ea   :  { %2485 = vrcp.f32 %v1496_v58 }
 0x5f5   :  { %v2484_v60 = vpop.eup %2483 }
 0x5f6   :  { %v1499_v62 = vmul.f32 %v2484_v60, %v1482_v35 }
 0x5f7   :  { %v2486_v40 = vpop.eup %2485 }
 0x5f8   :  { %v1500_v63 = vadd.f32 %v1499_v62, %v4022_v42  ;;  %v1502_v12 = vsub.f32 1.0, %v2486_v40  ;;  %v1504_v45 = vmul.f32 %v2486_v40, %v3710_v16  ;;  %v4033_v16 = vld [vmem:[#allocation31_spill] sm:$0xff] }
 0x5fa   :  { %2487 = vtanh.f32 %v1500_v63 }
 0x607   :  { %v2488_v44 = vpop.eup %2487 }
 0x608   :  { %v1503_v41 = vmul.f32 %v2488_v44, %v1502_v12 }
 0x60a   :  { %v3822_v59 = vadd.f32 %v1504_v45, %v1503_v41 }
 0x60c   :  { %1971 = vst [vmem:[%s3923_s6 + $0x28] sm:$0xff] %v3822_v59  ;;  %1584 = vmatmul.mubr.f32.vlgmr.msra.gmra.mxu0 %v3822_v59  ;;  %2389 = vmatmul.mubr.f32.vlgmr.msra.gmra.mxu1 %v3822_v59 }
 0x60d   :  { %1695 = vmatpush1.msra.mxu0 %v3347_v7  ;;  %2392 = vmatpush3.msra.mxu1 %v3470_v49  ;;  %v4023_v7 = vld [vmem:[#allocation8_spill] sm:$0xff]  ;;  %v4028_v49 = vld [vmem:[#allocation30_spill] sm:$0xff] }
 0x60e   :  { %1696 = vmatprep.subr.mxu0 %v3354_v5  ;;  %2393 = vmatprep.subr.mxu1 %v3984_v50  ;;  %v4024_v5 = vld [vmem:[#allocation16_spill] sm:$0xff] }
 0x60f   :  { %1697 = vmatpush1.msra.mxu0 %v3361_v4  ;;  %2394 = vmatpush3.msra.mxu1 %v3479_v11  ;;  %v4025_v4 = vld [vmem:[#allocation13_spill] sm:$0xff] }
 0x610   :  { %1698 = vmatprep.subr.mxu0 %v3368_v47  ;;  %2395 = vmatprep.subr.mxu1 %v3984_v50  ;;  %v4026_v47 = vld [vmem:[#allocation9_spill] sm:$0xff] }
 0x611   :  { %1699 = vmatpush1.msra.mxu0 %v3375_v8  ;;  %2396 = vmatpush3.msra.mxu1 %v3488_v13  ;;  %v4027_v8 = vld [vmem:[#allocation17_spill] sm:$0xff] }
 0x612   :  { %1700 = vmatprep.subr.mxu0 %v3382_v53  ;;  %2397 = vmatprep.subr.mxu1 %v3984_v50 }
 0x613   :  { %1701 = vmatpush1.msra.mxu0 %v3389_v26  ;;  %2398 = vmatpush3.msra.mxu1 %v3497_v15 }
 0x614   :  { %1702 = vmatprep.subr.mxu0 %v3503_v20  ;;  %2399 = vmatprep.subr.mxu1 %v3984_v50  ;;  %v4029_v20 = vld [vmem:[#allocation27_spill] sm:$0xff] }
 0x615   :  { %1703 = vmatpush1.msra.mxu0 %v3510_v54  ;;  %2400 = vmatpush3.msra.mxu1 %v3516_v43 }
 0x616   :  { %1704 = vmatprep.subr.mxu0 %v3522_v48  ;;  %2401 = vmatprep.subr.mxu1 %v3984_v50 }
 0x617   :  { %1705 = vmatpush1.msra.mxu0 %v3529_v30  ;;  %2402 = vmatpush3.msra.mxu1 %v3535_v14  ;;  %v4030_v30 = vld [vmem:[#allocation28_spill] sm:$0xff] }
 0x618   :  { %1706 = vmatprep.subr.mxu0 %v3541_v17  ;;  %2403 = vmatprep.subr.mxu1 %v3984_v50 }
 0x619   :  { %1707 = vmatpush1.msra.mxu0 %v3548_v18  ;;  %2404 = vmatpush3.msra.mxu1 %v3554_v51 }
 0x61a   :  { %1708 = vmatprep.subr.mxu0 %v3560_v6  ;;  %2405 = vmatprep.subr.mxu1 %v3984_v50 }
 0x61b   :  { %1709 = vmatpush1.msra.mxu0 %v3567_v19  ;;  %2406 = vmatpush3.msra.mxu1 %v3573_v3 }
 0x61c   :  { %1710 = vmatprep.subr.mxu0 %v3579_v24  ;;  %2407 = vmatprep.subr.mxu1 %v3984_v50 }
 0x61d   :  { %1711 = vmatpush1.msra.mxu0 %v3586_v10  ;;  %2408 = vmatpush3.msra.mxu1 %v3592_v36  ;;  %v4031_v10 = vld [vmem:[#allocation37_spill] sm:$0xff] }
 0x61e   :  { %1712 = vmatprep.subr.mxu0 %v3598_v22  ;;  %2409 = vmatprep.subr.mxu1 %v3984_v50 }
 0x61f   :  { %1713 = vmatpush1.msra.mxu0 %v3605_v23  ;;  %2410 = vmatpush3.msra.mxu1 %v3611_v25 }
 0x620   :  { %1714 = vmatprep.subr.mxu0 %v3617_v27  ;;  %2411 = vmatprep.subr.mxu1 %v3984_v50 }
 0x621   :  { %1715 = vmatpush1.msra.mxu0 %v3624_v28  ;;  %2412 = vmatpush3.msra.mxu1 %v3762_v9 }
 0x622   :  { %1716 = vmatprep.subr.mxu0 %v3631_v29  ;;  %2413 = vmatprep.subr.mxu1 %v3984_v50 }
 0x623   :  { %1717 = vmatpush1.msra.mxu0 %v3638_v31  ;;  %2414 = vmatpush3.msra.mxu1 %v3771_v55 }
 0x624   :  { %1718 = vmatprep.subr.mxu0 %v3645_v0  ;;  %2415 = vmatprep.subr.mxu1 %v3984_v50 }
 0x625   :  { %1719 = vmatpush1.msra.mxu0 %v3652_v33  ;;  %2416 = vmatpush3.msra.mxu1 %v3780_v39 }
 0x626   :  { %1720 = vmatprep.subr.mxu0 %v3659_v1  ;;  %2417 = vmatprep.subr.mxu1 %v3984_v50 }
 0x627   :  { %1721 = vmatpush1.msra.mxu0 %v3666_v34  ;;  %2418 = vmatpush3.msra.mxu1 %v3789_v57 }
 0x628   :  { %1722 = vmatprep.subr.mxu0 %v3673_v2  ;;  %2419 = vmatprep.subr.mxu1 %v3984_v50  ;;  %v4032_v2 = vld [vmem:[#allocation29_spill] sm:$0xff] }
 0x629   :  { %1723 = vmatpush1.msra.mxu0 %v4023_v7  ;;  %2420 = vmatpush3.msra.mxu1 %v4024_v5 }
 0x62a   :  { %1724 = vmatprep.subr.mxu0 %v4025_v4  ;;  %2421 = vmatprep.subr.mxu1 %v3984_v50 }
 0x62b   :  { %1725 = vmatpush1.msra.mxu0 %v4026_v47  ;;  %1758 = vmatprep.mubr.f32.mxu0 %v3984_v50 }
 0x62c   :  { %2422 = vmatpush3.msra.mxu1 %v4027_v8  ;;  %2423 = vmatprep.mubr.msk.f32.mxu1 %vm2580_vm1, %v3984_v50 }
 0x6cc   :  { %v1585_v53 = vpop.f32.mrf.mxu0  ;;  %v1656_v26 = vpop.f32.mrf.mxu1 }
 0x6cd   :  { %v1586_v11 = vadd.f32 %v1585_v53, %v4028_v49  ;;  %v1657_v19 = vadd.f32 %v1656_v26, %v3168_v32 }
 0x6ce   :  { %v1587_v13 = vpop.f32.mrf.mxu0  ;;  %v2390_v15 = vpop.f32.mrf.mxu1 }
 0x6cf   :  { %v1660_v54 = vadd.f32 %v1586_v11, %v4029_v20  ;;  %v1588_v48 = vadd.f32 %v1587_v13, %v3153_v52 }
 0x6d1   :  { %v1972_v43 = vmul.f32 -1.442695, %v1660_v54  ;;  %v1667_v14 = vadd.f32 %v1588_v48, %v4030_v30 }
 0x6d3   :  { %2489 = vpow2.f32 %v1972_v43  ;;  %v1973_v17 = vmul.f32 -1.442695, %v1667_v14 }
 0x6d5   :  { %2491 = vpow2.f32 %v1973_v17 }
 0x6e0   :  { %v2490_v18 = vpop.eup %2489 }
 0x6e1   :  { %v1664_v51 = vadd.f32 1.0, %v2490_v18 }
 0x6e2   :  { %v2492_v50 = vpop.eup %2491 }
 0x6e3   :  { %2493 = vrcp.f32 %v1664_v51  ;;  %v1671_v6 = vadd.f32 1.0, %v2492_v50 }
 0x6e5   :  { %2495 = vrcp.f32 %v1671_v6 }
 0x6f0   :  { %v2494_v3 = vpop.eup %2493 }
 0x6f1   :  { %v1674_v24 = vmul.f32 %v2494_v3, %v1657_v19 }
 0x6f2   :  { %v2496_v22 = vpop.eup %2495 }
 0x6f3   :  { %v1675_v36 = vadd.f32 %v1674_v24, %v4031_v10  ;;  %v1677_v23 = vsub.f32 1.0, %v2496_v22  ;;  %v1679_v28 = vmul.f32 %v2496_v22, %v3822_v59 }
 0x6f5   :  { %2497 = vtanh.f32 %v1675_v36 }
 0x702   :  { %v2498_v25 = vpop.eup %2497 }
 0x703   :  { %v1678_v27 = vmul.f32 %v2498_v25, %v1677_v23 }
 0x705   :  { %v1680_v29 = vadd.f32 %v1679_v28, %v1678_v27 }
 0x707   :  { %1974 = vst [vmem:[%s3923_s6 + $0x30] sm:$0xff] %v1680_v29  ;;  %1759 = vmatmul.mubr.f32.vlgmr.msra.gmra.mxu0 %v1680_v29  ;;  %2424 = vmatmul.mubr.f32.vlgmr.msra.gmra.mxu1 %v1680_v29 }
 0x7c7   :  { %v1760_v31 = vpop.f32.mrf.mxu0  ;;  %v1831_v0 = vpop.f32.mrf.mxu1 }
 0x7c8   :  { %v1761_v33 = vadd.f32 %v1760_v31, %v4028_v49  ;;  %v1832_v62 = vadd.f32 %v1831_v0, %v3168_v32 }
 0x7c9   :  { %v1762_v1 = vpop.f32.mrf.mxu0  ;;  %v2425_v34 = vpop.f32.mrf.mxu1 }
 0x7ca   :  { %v1835_v35 = vadd.f32 %v1761_v33, %v4032_v2  ;;  %v1763_v37 = vadd.f32 %v1762_v1, %v3153_v52 }
 0x7cc   :  { %v1975_v38 = vmul.f32 -1.442695, %v1835_v35  ;;  %v1842_v9 = vadd.f32 %v1763_v37, %v4033_v16 }
 0x7ce   :  { %2499 = vpow2.f32 %v1975_v38  ;;  %v1976_v55 = vmul.f32 -1.442695, %v1842_v9 }
 0x7d0   :  { %2501 = vpow2.f32 %v1976_v55 }
 0x7db   :  { %v2500_v39 = vpop.eup %2499 }
 0x7dc   :  { %v1839_v57 = vadd.f32 1.0, %v2500_v39 }
 0x7dd   :  { %v2502_v58 = vpop.eup %2501 }
 0x7de   :  { %2503 = vrcp.f32 %v1839_v57  ;;  %v1846_v61 = vadd.f32 1.0, %v2502_v58 }
 0x7e0   :  { %2505 = vrcp.f32 %v1846_v61 }
 0x7eb   :  { %v2504_v46 = vpop.eup %2503 }
 0x7ec   :  { %v1849_v56 = vmul.f32 %v2504_v46, %v1832_v62 }
 0x7ed   :  { %v2506_v42 = vpop.eup %2505 }
 0x7ee   :  { %v1850_v60 = vadd.f32 %v1849_v56, %v4034_v21  ;;  %v1852_v52 = vsub.f32 1.0, %v2506_v42  ;;  %v1854_v12 = vmul.f32 %v2506_v42, %v1680_v29 }
 0x7f0   :  { %2507 = vtanh.f32 %v1850_v60 }
 0x7fd   :  { %v2508_v63 = vpop.eup %2507 }
 0x7fe   :  { %v1853_v40 = vmul.f32 %v2508_v63, %v1852_v52 }
 0x800   :  { %v1855_v44 = vadd.f32 %v1854_v12, %v1853_v40 }
 0x802   :  { %1977 = vst [vmem:[%s3923_s6 + $0x38] sm:$0xff] %v1855_v44  ;;  %1859 = vst [vmem:[#allocation4] sm:$0xff] %v1855_v44 }
 0x803   :  { %2568 = shalt.err (!%p2565_p4)
}
 0x804   :  { %1885 = dma.vmem_to_hbm [thread:$0]  %s1883_s2, 128, %s3924_s7, [#allocation5]  }
 0x805   :  { %2577 = dma.done.wait [#allocation5], 128  }
 0x806   :  { %2578 = vsyncadd [#allocation5], 4294967168 }
 0x807   :  { %1900 = vsyncpa [#allocation5], 1 }

</bundles_post_ra>
